<compile_context>
chip_gen: v7x
topology: tpu7x:2x2x1
jax: 0.10.0
libtpu: 0.0.40
codegen_flags: <defaults>
</compile_context>

<pallas_src>
import functools

import jax
import jax.numpy as jnp
import numpy as np
from jax.experimental import pallas as pl
from jax.experimental.pallas import tpu as pltpu


def _vmem_limit_bytes():
    """~85% of physical VMEM (v5e/v6e: 128 MiB, v7x: 64 MiB); safe fallback."""
    try:
        cap = int(getattr(pltpu.get_tpu_info(), "vmem_capacity_bytes"))
        if cap <= 0:
            raise ValueError("bad vmem capacity")
        return min(int(cap * 0.85), 110 * 1024 * 1024)
    except Exception:
        return 64 * 1024 * 1024


_VMEM_LIMIT = _vmem_limit_bytes()


def _layernorm(z, eps=1e-6):
    mu = jnp.mean(z, axis=-1, keepdims=True)
    var = jnp.mean(jnp.square(z - mu), axis=-1, keepdims=True)
    return (z - mu) * jax.lax.rsqrt(var + eps)


def _gelu_tanh(z):
    return jax.nn.gelu(z, approximate=True)  # matches nn.GELU(approximate='tanh')


def _pick_tile(n, cap, align):
    """Largest divisor of n that is <= cap, preferring multiples of `align`."""
    cap = min(cap, n)
    best = None
    for t in range(cap, 0, -1):
        if n % t == 0:
            if t % align == 0:
                return t
            if best is None:
                best = t
    return best if best is not None else n


def _pick_seq_tile(seg_len, seg_start, cap, align):
    """Largest divisor of seg_len that also divides seg_start (block-offset reads)."""
    cap = min(cap, seg_len)
    best = None
    for t in range(cap, 0, -1):
        if seg_len % t == 0 and seg_start % t == 0:
            if t % align == 0:
                return t
            if best is None:
                best = t
    return best if best is not None else 1


def _pick_head_group(num_heads, head_dim):
    """Largest divisor G of num_heads with G*head_dim <= 512 and G <= 8."""
    best = 1
    for g in range(1, num_heads + 1):
        if num_heads % g == 0 and g * head_dim <= 512 and g <= 8:
            best = g
    return best


def _cost_estimate(flops, transcendentals, in_arrays, out_bytes):
    nbytes = int(sum(int(a.size) * a.dtype.itemsize for a in in_arrays)) + int(out_bytes)
    return pl.CostEstimate(flops=int(flops), transcendentals=int(transcendentals),
                           bytes_accessed=nbytes)


# --------------------------------------------------------------------------
# Attention kernel: grid = (batch, head_group); the head-group axis is the
# reduction axis for the output-projection accumulator.
# --------------------------------------------------------------------------
def _attn_kernel(join_ref, shift_ref, scale_ref, gate_ref,
                 wq_ref, wk_ref, wv_ref, bq_ref, bk_ref, bv_ref,
                 wo_ref, bo_ref,
                 out_ref,
                 ai_scr, acc_scr, *, head_dim, heads_per_group):
    gs = pl.program_id(1)

    @pl.when(gs == 0)
    def _():
        x0 = join_ref[0].astype(jnp.float32)                         # (S, H)
        ai = _layernorm(x0) * (1.0 + scale_ref[0]) + shift_ref[0]
        ai_scr[...] = ai.astype(ai_scr.dtype)   # cast once; stays in weight dtype
        acc_scr[...] = jnp.zeros_like(acc_scr)

    wdt = wq_ref.dtype
    ai = ai_scr[...]                                                  # (S, H), weight dtype

    # Wide QKV dots: N = heads_per_group * head_dim lanes.
    # hd**-0.5 is already folded into wq / bq at weight-prep time.
    q = jnp.dot(ai, wq_ref[0], preferred_element_type=jnp.float32) + bq_ref[0]
    k = jnp.dot(ai, wk_ref[0], preferred_element_type=jnp.float32) + bk_ref[0]
    v = jnp.dot(ai, wv_ref[0], preferred_element_type=jnp.float32) + bv_ref[0]
    qc = q.astype(wdt)
    kc = k.astype(wdt)
    vc = v.astype(wdt)

    # TODO(synk): for very large S, replace the per-head (S, S) logits with a
    #             K-tiled online-softmax (flash-style) loop + a q-tile grid axis
    #             (needed for v7x's 64 MiB VMEM and B=1 megacore sharding).
    o_parts = []
    for g in range(heads_per_group):
        lo = g * head_dim
        qg = qc[:, lo:lo + head_dim]
        kg = kc[:, lo:lo + head_dim]
        vg = vc[:, lo:lo + head_dim]
        logits = jax.lax.dot_general(qg, kg, (((1,), (1,)), ((), ())),
                                     preferred_element_type=jnp.float32)     # (S, S)
        m = jnp.max(logits, axis=-1, keepdims=True)
        e = jnp.exp(logits - m)
        l = jnp.sum(e, axis=-1, keepdims=True)
        p = (e * pl.reciprocal(l, approx=True)).astype(wdt)                  # EUP divide
        o_parts.append(jnp.dot(p, vg, preferred_element_type=jnp.float32))   # (S, hd)

    o_grp = jnp.concatenate(o_parts, axis=-1) if heads_per_group > 1 else o_parts[0]
    acc_scr[...] += jnp.dot(o_grp.astype(wo_ref.dtype), wo_ref[0],
                            preferred_element_type=jnp.float32)              # (S, H)

    @pl.when(gs == pl.num_programs(1) - 1)
    def _():
        x0 = join_ref[0].astype(jnp.float32)
        attn = acc_scr[...] + bo_ref[...].astype(jnp.float32)
        out_ref[0] = (x0 + gate_ref[0] * attn).astype(out_ref.dtype)


def _attention_pallas(join, shift, scale, gate,
                      wq_g, wk_g, wv_g, bq_g, bk_g, bv_g, wo_g, bo,
                      num_heads):
    B, S, H = join.shape
    n_groups, _, ghd = wq_g.shape
    heads_per_group = num_heads // n_groups
    head_dim = ghd // heads_per_group

    def mod_spec():
        return pl.BlockSpec((1, 1, H), lambda b, g: (b, 0, 0))

    def group_spec(shape):
        return pl.BlockSpec((1,) + tuple(shape[1:]), lambda b, g: (g, 0, 0))

    in_specs = [
        # join block is constant across the inner group axis: single-buffer it.
        pl.BlockSpec((1, S, H), lambda b, g: (b, 0, 0), pipeline_mode=pl.Buffered(1)),
        mod_spec(), mod_spec(), mod_spec(),                 # shift/scale/gate (msa)
        group_spec(wq_g.shape), group_spec(wk_g.shape), group_spec(wv_g.shape),
        group_spec(bq_g.shape), group_spec(bk_g.shape), group_spec(bv_g.shape),
        group_spec(wo_g.shape),
        pl.BlockSpec((1, H), lambda b, g: (0, 0),
                     pipeline_mode=pl.Buffered(1)),         # proj bias: constant block
    ]
    out_specs = pl.BlockSpec((1, S, H), lambda b, g: (b, 0, 0))

    cost = _cost_estimate(
        B * (8 * S * H * H + 4 * S * S * H),
        B * num_heads * S * S,
        [join, shift, scale, gate, wq_g, wk_g, wv_g, bq_g, bk_g, bv_g, wo_g, bo],
        join.size * join.dtype.itemsize)

    kernel = functools.partial(_attn_kernel, head_dim=head_dim,
                               heads_per_group=heads_per_group)
    return pl.pallas_call(
        kernel,
        grid=(B, n_groups),
        in_specs=in_specs,
        out_specs=out_specs,
        out_shape=jax.ShapeDtypeStruct((B, S, H), join.dtype),
        scratch_shapes=[pltpu.VMEM((S, H), wq_g.dtype),     # modulated LN (weight dtype)
                        pltpu.VMEM((S, H), jnp.float32)],   # output-proj accumulator
        input_output_aliases={0: 0},                        # write result over `join`
        compiler_params=pltpu.CompilerParams(
            dimension_semantics=("parallel", "arbitrary"),
            vmem_limit_bytes=_VMEM_LIMIT),
        cost_estimate=cost,
    )(join, shift, scale, gate, wq_g, wk_g, wv_g, bq_g, bk_g, bv_g, wo_g, bo)


# --------------------------------------------------------------------------
# MLP kernels.  Resident variant: fc1/fc2 live in VMEM for the whole call
# (grid = (B, seq_tiles)).  Streaming variant: hidden (4H) axis is a
# reduction and fc1/fc2 tiles stream (grid = (B, seq_tiles, hidden_tiles)).
# --------------------------------------------------------------------------
def _mlp_resident_kernel(x_ref, shift_ref, scale_ref, gate_ref,
                         w1_ref, b1_ref, w2_ref, b2_ref,
                         out_ref, *, multiplicative):
    xt = x_ref[0].astype(jnp.float32)                                 # (TS, H)
    ln = _layernorm(xt) * (1.0 + scale_ref[0]) + shift_ref[0]
    h1 = jnp.dot(ln.astype(w1_ref.dtype), w1_ref[...],
                 preferred_element_type=jnp.float32) + b1_ref[...]
    h1 = _gelu_tanh(h1)
    y = jnp.dot(h1.astype(w2_ref.dtype), w2_ref[...],
                preferred_element_type=jnp.float32) + b2_ref[...].astype(jnp.float32)
    g = gate_ref[0]
    if multiplicative:
        out = xt + g * y
    else:
        # Matches the PyTorch source for the x_c branch: gate is ADDED:
        #   x_c + gate_mlp_c + mlp_c(...)
        out = xt + g + y
    out_ref[0] = out.astype(out_ref.dtype)


def _mlp_stream_kernel(x_ref, shift_ref, scale_ref, gate_ref,
                       w1_ref, b1_ref, w2_ref, b2_ref,
                       out_ref, ln_scr, acc_scr, *, multiplicative):
    mi = pl.program_id(2)

    @pl.when(mi == 0)
    def _():
        xt = x_ref[0].astype(jnp.float32)
        ln = _layernorm(xt) * (1.0 + scale_ref[0]) + shift_ref[0]
        ln_scr[...] = ln.astype(ln_scr.dtype)
        acc_scr[...] = jnp.zeros_like(acc_scr)

    h1 = jnp.dot(ln_scr[...], w1_ref[...],
                 preferred_element_type=jnp.float32) + b1_ref[...]
    h1 = _gelu_tanh(h1)
    acc_scr[...] += jnp.dot(h1.astype(w2_ref.dtype), w2_ref[...],
                            preferred_element_type=jnp.float32)

    @pl.when(mi == pl.num_programs(2) - 1)
    def _():
        y = acc_scr[...] + b2_ref[...].astype(jnp.float32)
        res = x_ref[0].astype(jnp.float32)
        g = gate_ref[0]
        if multiplicative:
            out = res + g * y
        else:
            out = res + g + y
        out_ref[0] = out.astype(out_ref.dtype)


def _mlp_pallas(xin, seg_start, seg_len, shift, scale, gate, w1, b1, w2, b2, *,
                multiplicative):
    """Applies the MLP branch to xin[:, seg_start:seg_start+seg_len] without a
    wrapper-side slice (the BlockSpec index_map offsets into the joined array)."""
    B, _, H = xin.shape
    MH = w1.shape[1]
    out_shape = jax.ShapeDtypeStruct((B, seg_len, H), xin.dtype)
    cost = _cost_estimate(4 * B * seg_len * H * MH, B * seg_len * MH,
                          [shift, scale, gate, w1, b1, w2, b2],
                          2 * B * seg_len * H * xin.dtype.itemsize)

    weight_bytes = (w1.size + w2.size) * w1.dtype.itemsize
    resident = weight_bytes <= int(0.35 * _VMEM_LIMIT)

    if resident:
        ts_cap = 1024
        while ts_cap > 16 and ts_cap * MH * 4 > _VMEM_LIMIT // 4:   # bound GELU intermediate
            ts_cap //= 2
        ts = _pick_seq_tile(seg_len, seg_start, ts_cap, 16)
        off = seg_start // ts
        in_specs = [
            pl.BlockSpec((1, ts, H), lambda b, si: (b, si + off, 0)),     # x tile of join
            pl.BlockSpec((1, 1, H), lambda b, si: (b, 0, 0)),             # shift
            pl.BlockSpec((1, 1, H), lambda b, si: (b, 0, 0)),             # scale
            pl.BlockSpec((1, 1, H), lambda b, si: (b, 0, 0)),             # gate
            pl.BlockSpec((H, MH), lambda b, si: (0, 0),
                         pipeline_mode=pl.Buffered(1)),                   # fc1 (resident)
            pl.BlockSpec((1, MH), lambda b, si: (0, 0),
                         pipeline_mode=pl.Buffered(1)),
            pl.BlockSpec((MH, H), lambda b, si: (0, 0),
                         pipeline_mode=pl.Buffered(1)),                   # fc2 (resident)
            pl.BlockSpec((1, H), lambda b, si: (0, 0),
                         pipeline_mode=pl.Buffered(1)),
        ]
        out_specs = pl.BlockSpec((1, ts, H), lambda b, si: (b, si, 0))
        kernel = functools.partial(_mlp_resident_kernel, multiplicative=multiplicative)
        return pl.pallas_call(
            kernel,
            grid=(B, seg_len // ts),
            in_specs=in_specs,
            out_specs=out_specs,
            out_shape=out_shape,
            compiler_params=pltpu.CompilerParams(
                dimension_semantics=("parallel", "parallel"),
                vmem_limit_bytes=_VMEM_LIMIT),
            cost_estimate=cost,
        )(xin, shift, scale, gate, w1, b1, w2, b2)

    # Streaming path: 4H hidden dim is the reduction axis; weights stream.
    ts = _pick_seq_tile(seg_len, seg_start, 1024, 16)
    tmh = _pick_tile(MH, 512, 128)
    off = seg_start // ts
    in_specs = [
        pl.BlockSpec((1, ts, H), lambda b, si, mi: (b, si + off, 0)),
        pl.BlockSpec((1, 1, H), lambda b, si, mi: (b, 0, 0)),
        pl.BlockSpec((1, 1, H), lambda b, si, mi: (b, 0, 0)),
        pl.BlockSpec((1, 1, H), lambda b, si, mi: (b, 0, 0)),
        pl.BlockSpec((H, tmh), lambda b, si, mi: (0, mi)),                # fc1 (streams)
        pl.BlockSpec((1, tmh), lambda b, si, mi: (0, mi)),
        pl.BlockSpec((tmh, H), lambda b, si, mi: (mi, 0)),                # fc2 (streams)
        pl.BlockSpec((1, H), lambda b, si, mi: (0, 0),
                     pipeline_mode=pl.Buffered(1)),
    ]
    out_specs = pl.BlockSpec((1, ts, H), lambda b, si, mi: (b, si, 0))
    kernel = functools.partial(_mlp_stream_kernel, multiplicative=multiplicative)
    return pl.pallas_call(
        kernel,
        grid=(B, seg_len // ts, MH // tmh),
        in_specs=in_specs,
        out_specs=out_specs,
        out_shape=out_shape,
        scratch_shapes=[pltpu.VMEM((ts, H), w1.dtype),    # modulated LN (weight dtype)
                        pltpu.VMEM((ts, H), jnp.float32)],  # fc2 accumulator
        compiler_params=pltpu.CompilerParams(
            dimension_semantics=("parallel", "parallel", "arbitrary"),
            vmem_limit_bytes=_VMEM_LIMIT),
        cost_estimate=cost,
    )(xin, shift, scale, gate, w1, b1, w2, b2)


# --------------------------------------------------------------------------
# One-time weight preparation (parameter-load time, NOT per forward step)
# --------------------------------------------------------------------------
def prepare_cond_dit_params(params, num_heads):
    """Head-grouped, lane-aligned QKV / proj weight blocks; attention scale
    folded into wq / bq.  Call once when loading parameters."""
    H = params["qkv_w"].shape[0]
    assert H % num_heads == 0, "hidden_size must be divisible by num_heads"
    hd = H // num_heads
    G = _pick_head_group(num_heads, hd)
    n_groups = num_heads // G
    scl = hd ** -0.5

    qkv_w, qkv_b = params["qkv_w"], params["qkv_b"]

    def grp_w(w, s=1.0):   # (H, H) columns head-major -> (n_groups, H, G*hd)
        return (w * s).reshape(H, n_groups, G * hd).transpose(1, 0, 2)

    def grp_b(b, s=1.0):   # (H,) head-major -> (n_groups, 1, G*hd)
        return (b * s).reshape(n_groups, 1, G * hd)

    prepared = dict(params)
    prepared["wq_g"] = grp_w(qkv_w[:, 0:H], scl)
    prepared["wk_g"] = grp_w(qkv_w[:, H:2 * H])
    prepared["wv_g"] = grp_w(qkv_w[:, 2 * H:3 * H])
    prepared["bq_g"] = grp_b(qkv_b[0, 0:H], scl)
    prepared["bk_g"] = grp_b(qkv_b[0, H:2 * H])
    prepared["bv_g"] = grp_b(qkv_b[0, 2 * H:3 * H])
    # proj_w rows are head-major: (H, H) -> (n_groups, G*hd, H)
    prepared["wo_g"] = params["proj_w"].reshape(n_groups, G * hd, H)
    for k in ("qkv_w", "qkv_b", "proj_w"):
        del prepared[k]
    return prepared


# --------------------------------------------------------------------------
# Full block wrapper
# --------------------------------------------------------------------------
def cond_dit_block(x, x_c, c, params, num_heads):
    B, N, H = x.shape
    Nc = x_c.shape[1]
    f32 = jnp.float32

    # adaLN stays in XLA: an M=1 GEMV per batch row; ada_w (9*H^2) is the
    # largest weight, so keeping it out of the kernels saves the dominant VMEM.
    ada = (jax.nn.silu(c.astype(f32)) @ params["ada_w"].astype(f32)
           + params["ada_b"].astype(f32))                            # (B, 9H)
    mods = [m.reshape(B, 1, H) for m in jnp.split(ada, 9, axis=-1)]
    (shift_msa, scale_msa, gate_msa,
     shift_mlp, scale_mlp, gate_mlp,
     shift_mlp_c, scale_mlp_c, gate_mlp_c) = mods

    # Concat once; the attention kernel writes its result back over this
    # buffer via input_output_aliases.
    join = jnp.concatenate([x, x_c], axis=1)                          # (B, S, H)

    # TODO(synk): RotaryAttention path (use_rotary_attn=True) not implemented;
    #             idx_h / idx_w are unused in this kernel.
    join = _attention_pallas(join, shift_msa, scale_msa, gate_msa,
                             params["wq_g"], params["wk_g"], params["wv_g"],
                             params["bq_g"], params["bk_g"], params["bv_g"],
                             params["wo_g"], params["proj_b"], num_heads)

    # No wrapper-side slices: each MLP kernel reads its segment of `join`
    # directly through BlockSpec sequence offsets.
    x_out = _mlp_pallas(join, 0, N, shift_mlp, scale_mlp, gate_mlp,
                        params["fc1_w"], params["fc1_b"],
                        params["fc2_w"], params["fc2_b"],
                        multiplicative=True)
    xc_out = _mlp_pallas(join, N, Nc, shift_mlp_c, scale_mlp_c, gate_mlp_c,
                         params["fc1c_w"], params["fc1c_b"],
                         params["fc2c_w"], params["fc2c_b"],
                         multiplicative=False)
    return x_out, xc_out


# --------------------------------------------------------------------------
# Pure-JAX reference mirroring the PyTorch forward
# --------------------------------------------------------------------------
def ref_forward(x, x_c, c, p, num_heads):
    B, N, H = x.shape
    hd = H // num_heads

    def ln(z):
        mu = z.mean(-1, keepdims=True)
        var = ((z - mu) ** 2).mean(-1, keepdims=True)
        return (z - mu) / jnp.sqrt(var + 1e-6)

    ada = jax.nn.silu(c) @ p["ada_w"] + p["ada_b"]
    (sm, scm, gm, sl_, scl, gl, slc, sclc, glc) = jnp.split(ada, 9, axis=-1)
    join = jnp.concatenate([x, x_c], axis=1)
    ai = ln(join) * (1 + scm[:, None, :]) + sm[:, None, :]
    qkv = ai @ p["qkv_w"] + p["qkv_b"]
    q, k, v = jnp.split(qkv, 3, axis=-1)
    q = q.reshape(B, -1, num_heads, hd).transpose(0, 2, 1, 3)
    k = k.reshape(B, -1, num_heads, hd).transpose(0, 2, 1, 3)
    v = v.reshape(B, -1, num_heads, hd).transpose(0, 2, 1, 3)
    logits = jnp.einsum("bhqd,bhkd->bhqk", q, k) * (hd ** -0.5)
    pr = jax.nn.softmax(logits, axis=-1)
    o = jnp.einsum("bhqk,bhkd->bhqd", pr, v).transpose(0, 2, 1, 3).reshape(B, -1, H)
    attn = o @ p["proj_w"] + p["proj_b"]
    join = join + gm[:, None, :] * attn
    xn, xcn = join[:, :N], join[:, N:]
    h1 = ln(xn) * (1 + scl[:, None, :]) + sl_[:, None, :]
    h1 = jax.nn.gelu(h1 @ p["fc1_w"] + p["fc1_b"], approximate=True)
    h1 = h1 @ p["fc2_w"] + p["fc2_b"]
    xo = xn + gl[:, None, :] * h1
    h2 = ln(xcn) * (1 + sclc[:, None, :]) + slc[:, None, :]
    h2 = jax.nn.gelu(h2 @ p["fc1c_w"] + p["fc1c_b"], approximate=True)
    h2 = h2 @ p["fc2c_w"] + p["fc2c_b"]
    xco = xcn + glc[:, None, :] + h2
    return xo, xco


if __name__ == "__main__":
    B, N, Nc, H, num_heads = 2, 8, 8, 32, 4
    mlp_ratio = 4.0
    MH = int(H * mlp_ratio)

    key = jax.random.PRNGKey(0)
    keys = jax.random.split(key, 20)

    def w(k, shape, scale=0.02):
        return (scale * jax.random.normal(k, shape)).astype(jnp.float32)

    params = dict(
        ada_w=w(keys[0], (H, 9 * H)), ada_b=w(keys[1], (1, 9 * H)),
        qkv_w=w(keys[2], (H, 3 * H)), qkv_b=w(keys[3], (1, 3 * H)),
        proj_w=w(keys[4], (H, H)),    proj_b=w(keys[5], (1, H)),
        fc1_w=w(keys[6], (H, MH)),    fc1_b=w(keys[7], (1, MH)),
        fc2_w=w(keys[8], (MH, H)),    fc2_b=w(keys[9], (1, H)),
        fc1c_w=w(keys[10], (H, MH)),  fc1c_b=w(keys[11], (1, MH)),
        fc2c_w=w(keys[12], (MH, H)),  fc2c_b=w(keys[13], (1, H)),
    )

    # One-time weight prep (head-grouped blocks, scale folded into wq/bq).
    prepared = prepare_cond_dit_params(params, num_heads)

    x = jax.random.normal(keys[14], (B, N, H), jnp.float32)
    x_c = jax.random.normal(keys[15], (B, Nc, H), jnp.float32)
    c = jax.random.normal(keys[16], (B, H), jnp.float32)
    # idx_h, idx_w only feed RotaryAttention (use_rotary_attn=False here).

    fwd = jax.jit(functools.partial(cond_dit_block, num_heads=num_heads))
    x_out, xc_out = fwd(x, x_c, c, prepared)
    jax.block_until_ready((x_out, xc_out))

    xr, xcr = ref_forward(x, x_c, c, params, num_heads)
    np.testing.assert_allclose(np.asarray(x_out), np.asarray(xr), rtol=2e-3, atol=2e-3)
    np.testing.assert_allclose(np.asarray(xc_out), np.asarray(xcr), rtol=2e-3, atol=2e-3)

    print("KERNEL_OK")
</pallas_src>

<mosaic_0001>
module attributes {stable_mosaic.version = 11 : i64} {
  func.func @_attn_kernel(%arg0: i32, %arg1: i32, %arg2: memref<1x16x32xf32, #tpu.memory_space<vmem>>, %arg3: memref<1x1x32xf32, #tpu.memory_space<vmem>>, %arg4: memref<1x1x32xf32, #tpu.memory_space<vmem>>, %arg5: memref<1x1x32xf32, #tpu.memory_space<vmem>>, %arg6: memref<1x32x32xf32, #tpu.memory_space<vmem>>, %arg7: memref<1x32x32xf32, #tpu.memory_space<vmem>>, %arg8: memref<1x32x32xf32, #tpu.memory_space<vmem>>, %arg9: memref<1x1x32xf32, #tpu.memory_space<vmem>>, %arg10: memref<1x1x32xf32, #tpu.memory_space<vmem>>, %arg11: memref<1x1x32xf32, #tpu.memory_space<vmem>>, %arg12: memref<1x32x32xf32, #tpu.memory_space<vmem>>, %arg13: memref<1x32xf32, #tpu.memory_space<vmem>>, %arg14: memref<1x16x32xf32, #tpu.memory_space<vmem>>, %arg15: memref<16x32xf32, #tpu.memory_space<vmem>>, %arg16: memref<16x32xf32, #tpu.memory_space<vmem>>) attributes {dimension_semantics = [#tpu.dimension_semantics<parallel>, #tpu.dimension_semantics<arbitrary>], iteration_bounds = array<i64: 2, 1>, scalar_prefetch = 0 : i64, scratch_operands = 2 : i64, tpu.core_type = #tpu.core_type<tc>, window_params = [{pipeline_mode = #tpu.pipeline_mode<synchronous>, transform_indices = @transform_0, window_bounds = array<i64: 1, 16, 32>}, {transform_indices = @transform_1, window_bounds = array<i64: 1, 1, 32>}, {transform_indices = @transform_2, window_bounds = array<i64: 1, 1, 32>}, {transform_indices = @transform_3, window_bounds = array<i64: 1, 1, 32>}, {transform_indices = @transform_4, window_bounds = array<i64: 1, 32, 32>}, {transform_indices = @transform_5, window_bounds = array<i64: 1, 32, 32>}, {transform_indices = @transform_6, window_bounds = array<i64: 1, 32, 32>}, {transform_indices = @transform_7, window_bounds = array<i64: 1, 1, 32>}, {transform_indices = @transform_8, window_bounds = array<i64: 1, 1, 32>}, {transform_indices = @transform_9, window_bounds = array<i64: 1, 1, 32>}, {transform_indices = @transform_10, window_bounds = array<i64: 1, 32, 32>}, {pipeline_mode = #tpu.pipeline_mode<synchronous>, transform_indices = @transform_11, window_bounds = array<i64: 1, 32>}, {transform_indices = @transform_12, window_bounds = array<i64: 1, 16, 32>}]} {
    %c0_i32 = arith.constant 0 : i32
    %0 = arith.cmpi eq, %arg1, %c0_i32 : i32
    %1 = arith.extui %0 : i1 to i32
    %c0_i32_0 = arith.constant 0 : i32
    %2 = arith.cmpi ne, %1, %c0_i32_0 : i32
    scf.if %2 {
      %c0_48 = arith.constant 0 : index
      %c0_49 = arith.constant 0 : index
      %c0_50 = arith.constant 0 : index
      %95 = vector.load %arg2[%c0_48, %c0_49, %c0_50] : memref<1x16x32xf32, #tpu.memory_space<vmem>>, vector<1x16x32xf32>
      %96 = vector.shape_cast %95 : vector<1x16x32xf32> to vector<16x32xf32>
      %cst_51 = arith.constant dense<0.000000e+00> : vector<16xf32>
      %97 = vector.multi_reduction <add>, %96, %cst_51 [1] : vector<16x32xf32> to vector<16xf32>
      %98 = vector.shape_cast %97 : vector<16xf32> to vector<16x1xf32>
      %cst_52 = arith.constant 3.200000e+01 : f32
      %99 = vector.broadcast %cst_52 : f32 to vector<16x1xf32>
      %100 = arith.divf %98, %99 : vector<16x1xf32>
      %101 = vector.broadcast %100 : vector<16x1xf32> to vector<16x32xf32>
      %102 = arith.subf %96, %101 : vector<16x32xf32>
      %103 = arith.mulf %102, %102 : vector<16x32xf32>
      %cst_53 = arith.constant dense<0.000000e+00> : vector<16xf32>
      %104 = vector.multi_reduction <add>, %103, %cst_53 [1] : vector<16x32xf32> to vector<16xf32>
      %105 = vector.shape_cast %104 : vector<16xf32> to vector<16x1xf32>
      %cst_54 = arith.constant 3.200000e+01 : f32
      %106 = vector.broadcast %cst_54 : f32 to vector<16x1xf32>
      %107 = arith.divf %105, %106 : vector<16x1xf32>
      %108 = vector.broadcast %100 : vector<16x1xf32> to vector<16x32xf32>
      %109 = arith.subf %96, %108 : vector<16x32xf32>
      %cst_55 = arith.constant 9.99999997E-7 : f32
      %110 = vector.broadcast %cst_55 : f32 to vector<16x1xf32>
      %111 = arith.addf %107, %110 : vector<16x1xf32>
      %112 = math.rsqrt %111 : vector<16x1xf32>
      %113 = vector.broadcast %112 : vector<16x1xf32> to vector<16x32xf32>
      %114 = arith.mulf %109, %113 : vector<16x32xf32>
      %c0_56 = arith.constant 0 : index
      %c0_57 = arith.constant 0 : index
      %c0_58 = arith.constant 0 : index
      %115 = vector.load %arg4[%c0_56, %c0_57, %c0_58] : memref<1x1x32xf32, #tpu.memory_space<vmem>>, vector<1x1x32xf32>
      %116 = vector.shape_cast %115 : vector<1x1x32xf32> to vector<1x32xf32>
      %cst_59 = arith.constant 1.000000e+00 : f32
      %117 = vector.broadcast %cst_59 : f32 to vector<1x32xf32>
      %118 = arith.addf %117, %116 : vector<1x32xf32>
      %119 = vector.broadcast %118 : vector<1x32xf32> to vector<16x32xf32>
      %120 = arith.mulf %114, %119 : vector<16x32xf32>
      %c0_60 = arith.constant 0 : index
      %c0_61 = arith.constant 0 : index
      %c0_62 = arith.constant 0 : index
      %121 = vector.load %arg3[%c0_60, %c0_61, %c0_62] : memref<1x1x32xf32, #tpu.memory_space<vmem>>, vector<1x1x32xf32>
      %122 = vector.shape_cast %121 : vector<1x1x32xf32> to vector<1x32xf32>
      %123 = vector.broadcast %122 : vector<1x32xf32> to vector<16x32xf32>
      %124 = arith.addf %120, %123 : vector<16x32xf32>
      %c0_63 = arith.constant 0 : index
      %c0_64 = arith.constant 0 : index
      %125 = vector.load %arg15[%c0_63, %c0_64] : memref<16x32xf32, #tpu.memory_space<vmem>>, vector<16x32xf32>
      tpu.vector_store %arg15[%c0_63, %c0_64], %124 {strides = array<i32>} : memref<16x32xf32, #tpu.memory_space<vmem>>, vector<16x32xf32>,
      %cst_65 = arith.constant 0.000000e+00 : f32
      %126 = vector.broadcast %cst_65 : f32 to vector<16x32xf32>
      %c0_66 = arith.constant 0 : index
      %c0_67 = arith.constant 0 : index
      %127 = vector.load %arg16[%c0_66, %c0_67] : memref<16x32xf32, #tpu.memory_space<vmem>>, vector<16x32xf32>
      tpu.vector_store %arg16[%c0_66, %c0_67], %126 {strides = array<i32>} : memref<16x32xf32, #tpu.memory_space<vmem>>, vector<16x32xf32>,
    } else {
    }
    %c0 = arith.constant 0 : index
    %c0_1 = arith.constant 0 : index
    %3 = vector.load %arg15[%c0, %c0_1] : memref<16x32xf32, #tpu.memory_space<vmem>>, vector<16x32xf32>
    %c0_2 = arith.constant 0 : index
    %c0_3 = arith.constant 0 : index
    %c0_4 = arith.constant 0 : index
    %4 = vector.load %arg6[%c0_2, %c0_3, %c0_4] : memref<1x32x32xf32, #tpu.memory_space<vmem>>, vector<1x32x32xf32>
    %5 = vector.shape_cast %4 : vector<1x32x32xf32> to vector<32x32xf32>
    %cst = arith.constant dense<0.000000e+00> : vector<16x32xf32>
    %6 = tpu.matmul %3, %5, %cst {dimension_numbers = #tpu.dot_dimension_numbers<[1], [0], [0], [1], [0, 0, 1, 1], [], []>} : vector<16x32xf32>, vector<32x32xf32>, vector<16x32xf32> -> vector<16x32xf32>
    %c0_5 = arith.constant 0 : index
    %c0_6 = arith.constant 0 : index
    %c0_7 = arith.constant 0 : index
    %7 = vector.load %arg9[%c0_5, %c0_6, %c0_7] : memref<1x1x32xf32, #tpu.memory_space<vmem>>, vector<1x1x32xf32>
    %8 = vector.shape_cast %7 : vector<1x1x32xf32> to vector<1x32xf32>
    %9 = vector.broadcast %8 : vector<1x32xf32> to vector<16x32xf32>
    %10 = arith.addf %6, %9 : vector<16x32xf32>
    %c0_8 = arith.constant 0 : index
    %c0_9 = arith.constant 0 : index
    %c0_10 = arith.constant 0 : index
    %11 = vector.load %arg7[%c0_8, %c0_9, %c0_10] : memref<1x32x32xf32, #tpu.memory_space<vmem>>, vector<1x32x32xf32>
    %12 = vector.shape_cast %11 : vector<1x32x32xf32> to vector<32x32xf32>
    %cst_11 = arith.constant dense<0.000000e+00> : vector<16x32xf32>
    %13 = tpu.matmul %3, %12, %cst_11 {dimension_numbers = #tpu.dot_dimension_numbers<[1], [0], [0], [1], [0, 0, 1, 1], [], []>} : vector<16x32xf32>, vector<32x32xf32>, vector<16x32xf32> -> vector<16x32xf32>
    %c0_12 = arith.constant 0 : index
    %c0_13 = arith.constant 0 : index
    %c0_14 = arith.constant 0 : index
    %14 = vector.load %arg10[%c0_12, %c0_13, %c0_14] : memref<1x1x32xf32, #tpu.memory_space<vmem>>, vector<1x1x32xf32>
    %15 = vector.shape_cast %14 : vector<1x1x32xf32> to vector<1x32xf32>
    %16 = vector.broadcast %15 : vector<1x32xf32> to vector<16x32xf32>
    %17 = arith.addf %13, %16 : vector<16x32xf32>
    %c0_15 = arith.constant 0 : index
    %c0_16 = arith.constant 0 : index
    %c0_17 = arith.constant 0 : index
    %18 = vector.load %arg8[%c0_15, %c0_16, %c0_17] : memref<1x32x32xf32, #tpu.memory_space<vmem>>, vector<1x32x32xf32>
    %19 = vector.shape_cast %18 : vector<1x32x32xf32> to vector<32x32xf32>
    %cst_18 = arith.constant dense<0.000000e+00> : vector<16x32xf32>
    %20 = tpu.matmul %3, %19, %cst_18 {dimension_numbers = #tpu.dot_dimension_numbers<[1], [0], [0], [1], [0, 0, 1, 1], [], []>} : vector<16x32xf32>, vector<32x32xf32>, vector<16x32xf32> -> vector<16x32xf32>
    %c0_19 = arith.constant 0 : index
    %c0_20 = arith.constant 0 : index
    %c0_21 = arith.constant 0 : index
    %21 = vector.load %arg11[%c0_19, %c0_20, %c0_21] : memref<1x1x32xf32, #tpu.memory_space<vmem>>, vector<1x1x32xf32>
    %22 = vector.shape_cast %21 : vector<1x1x32xf32> to vector<1x32xf32>
    %23 = vector.broadcast %22 : vector<1x32xf32> to vector<16x32xf32>
    %24 = arith.addf %20, %23 : vector<16x32xf32>
    %25 = vector.extract_strided_slice %10 {offsets = [0, 0], sizes = [16, 8], strides = [1, 1]} : vector<16x32xf32> to vector<16x8xf32>
    %26 = vector.extract_strided_slice %17 {offsets = [0, 0], sizes = [16, 8], strides = [1, 1]} : vector<16x32xf32> to vector<16x8xf32>
    %27 = vector.extract_strided_slice %24 {offsets = [0, 0], sizes = [16, 8], strides = [1, 1]} : vector<16x32xf32> to vector<16x8xf32>
    %cst_22 = arith.constant dense<0.000000e+00> : vector<16x16xf32>
    %28 = tpu.matmul %25, %26, %cst_22 {dimension_numbers = #tpu.dot_dimension_numbers<[1], [1], [0], [0], [0, 0, 1, 0], [], []>} : vector<16x8xf32>, vector<16x8xf32>, vector<16x16xf32> -> vector<16x16xf32>
    %cst_23 = arith.constant dense<0xFF800000> : vector<16xf32>
    %29 = vector.multi_reduction <maximumf>, %28, %cst_23 [1] : vector<16x16xf32> to vector<16xf32>
    %30 = vector.shape_cast %29 : vector<16xf32> to vector<16x1xf32>
    %31 = vector.broadcast %30 : vector<16x1xf32> to vector<16x16xf32>
    %32 = arith.subf %28, %31 : vector<16x16xf32>
    %33 = math.exp %32 : vector<16x16xf32>
    %cst_24 = arith.constant dense<0.000000e+00> : vector<16xf32>
    %34 = vector.multi_reduction <add>, %33, %cst_24 [1] : vector<16x16xf32> to vector<16xf32>
    %35 = vector.shape_cast %34 : vector<16xf32> to vector<16x1xf32>
    %36 = tpu.reciprocal %35 {approx = true} : vector<16x1xf32> -> vector<16x1xf32>
    %37 = vector.broadcast %36 : vector<16x1xf32> to vector<16x16xf32>
    %38 = arith.mulf %33, %37 : vector<16x16xf32>
    %cst_25 = arith.constant dense<0.000000e+00> : vector<16x8xf32>
    %39 = tpu.matmul %38, %27, %cst_25 {dimension_numbers = #tpu.dot_dimension_numbers<[1], [0], [0], [1], [0, 0, 1, 1], [], []>} : vector<16x16xf32>, vector<16x8xf32>, vector<16x8xf32> -> vector<16x8xf32>
    %40 = vector.extract_strided_slice %10 {offsets = [0, 8], sizes = [16, 8], strides = [1, 1]} : vector<16x32xf32> to vector<16x8xf32>
    %41 = vector.extract_strided_slice %17 {offsets = [0, 8], sizes = [16, 8], strides = [1, 1]} : vector<16x32xf32> to vector<16x8xf32>
    %42 = vector.extract_strided_slice %24 {offsets = [0, 8], sizes = [16, 8], strides = [1, 1]} : vector<16x32xf32> to vector<16x8xf32>
    %cst_26 = arith.constant dense<0.000000e+00> : vector<16x16xf32>
    %43 = tpu.matmul %40, %41, %cst_26 {dimension_numbers = #tpu.dot_dimension_numbers<[1], [1], [0], [0], [0, 0, 1, 0], [], []>} : vector<16x8xf32>, vector<16x8xf32>, vector<16x16xf32> -> vector<16x16xf32>
    %cst_27 = arith.constant dense<0xFF800000> : vector<16xf32>
    %44 = vector.multi_reduction <maximumf>, %43, %cst_27 [1] : vector<16x16xf32> to vector<16xf32>
    %45 = vector.shape_cast %44 : vector<16xf32> to vector<16x1xf32>
    %46 = vector.broadcast %45 : vector<16x1xf32> to vector<16x16xf32>
    %47 = arith.subf %43, %46 : vector<16x16xf32>
    %48 = math.exp %47 : vector<16x16xf32>
    %cst_28 = arith.constant dense<0.000000e+00> : vector<16xf32>
    %49 = vector.multi_reduction <add>, %48, %cst_28 [1] : vector<16x16xf32> to vector<16xf32>
    %50 = vector.shape_cast %49 : vector<16xf32> to vector<16x1xf32>
    %51 = tpu.reciprocal %50 {approx = true} : vector<16x1xf32> -> vector<16x1xf32>
    %52 = vector.broadcast %51 : vector<16x1xf32> to vector<16x16xf32>
    %53 = arith.mulf %48, %52 : vector<16x16xf32>
    %cst_29 = arith.constant dense<0.000000e+00> : vector<16x8xf32>
    %54 = tpu.matmul %53, %42, %cst_29 {dimension_numbers = #tpu.dot_dimension_numbers<[1], [0], [0], [1], [0, 0, 1, 1], [], []>} : vector<16x16xf32>, vector<16x8xf32>, vector<16x8xf32> -> vector<16x8xf32>
    %55 = vector.extract_strided_slice %10 {offsets = [0, 16], sizes = [16, 8], strides = [1, 1]} : vector<16x32xf32> to vector<16x8xf32>
    %56 = vector.extract_strided_slice %17 {offsets = [0, 16], sizes = [16, 8], strides = [1, 1]} : vector<16x32xf32> to vector<16x8xf32>
    %57 = vector.extract_strided_slice %24 {offsets = [0, 16], sizes = [16, 8], strides = [1, 1]} : vector<16x32xf32> to vector<16x8xf32>
    %cst_30 = arith.constant dense<0.000000e+00> : vector<16x16xf32>
    %58 = tpu.matmul %55, %56, %cst_30 {dimension_numbers = #tpu.dot_dimension_numbers<[1], [1], [0], [0], [0, 0, 1, 0], [], []>} : vector<16x8xf32>, vector<16x8xf32>, vector<16x16xf32> -> vector<16x16xf32>
    %cst_31 = arith.constant dense<0xFF800000> : vector<16xf32>
    %59 = vector.multi_reduction <maximumf>, %58, %cst_31 [1] : vector<16x16xf32> to vector<16xf32>
    %60 = vector.shape_cast %59 : vector<16xf32> to vector<16x1xf32>
    %61 = vector.broadcast %60 : vector<16x1xf32> to vector<16x16xf32>
    %62 = arith.subf %58, %61 : vector<16x16xf32>
    %63 = math.exp %62 : vector<16x16xf32>
    %cst_32 = arith.constant dense<0.000000e+00> : vector<16xf32>
    %64 = vector.multi_reduction <add>, %63, %cst_32 [1] : vector<16x16xf32> to vector<16xf32>
    %65 = vector.shape_cast %64 : vector<16xf32> to vector<16x1xf32>
    %66 = tpu.reciprocal %65 {approx = true} : vector<16x1xf32> -> vector<16x1xf32>
    %67 = vector.broadcast %66 : vector<16x1xf32> to vector<16x16xf32>
    %68 = arith.mulf %63, %67 : vector<16x16xf32>
    %cst_33 = arith.constant dense<0.000000e+00> : vector<16x8xf32>
    %69 = tpu.matmul %68, %57, %cst_33 {dimension_numbers = #tpu.dot_dimension_numbers<[1], [0], [0], [1], [0, 0, 1, 1], [], []>} : vector<16x16xf32>, vector<16x8xf32>, vector<16x8xf32> -> vector<16x8xf32>
    %70 = vector.extract_strided_slice %10 {offsets = [0, 24], sizes = [16, 8], strides = [1, 1]} : vector<16x32xf32> to vector<16x8xf32>
    %71 = vector.extract_strided_slice %17 {offsets = [0, 24], sizes = [16, 8], strides = [1, 1]} : vector<16x32xf32> to vector<16x8xf32>
    %72 = vector.extract_strided_slice %24 {offsets = [0, 24], sizes = [16, 8], strides = [1, 1]} : vector<16x32xf32> to vector<16x8xf32>
    %cst_34 = arith.constant dense<0.000000e+00> : vector<16x16xf32>
    %73 = tpu.matmul %70, %71, %cst_34 {dimension_numbers = #tpu.dot_dimension_numbers<[1], [1], [0], [0], [0, 0, 1, 0], [], []>} : vector<16x8xf32>, vector<16x8xf32>, vector<16x16xf32> -> vector<16x16xf32>
    %cst_35 = arith.constant dense<0xFF800000> : vector<16xf32>
    %74 = vector.multi_reduction <maximumf>, %73, %cst_35 [1] : vector<16x16xf32> to vector<16xf32>
    %75 = vector.shape_cast %74 : vector<16xf32> to vector<16x1xf32>
    %76 = vector.broadcast %75 : vector<16x1xf32> to vector<16x16xf32>
    %77 = arith.subf %73, %76 : vector<16x16xf32>
    %78 = math.exp %77 : vector<16x16xf32>
    %cst_36 = arith.constant dense<0.000000e+00> : vector<16xf32>
    %79 = vector.multi_reduction <add>, %78, %cst_36 [1] : vector<16x16xf32> to vector<16xf32>
    %80 = vector.shape_cast %79 : vector<16xf32> to vector<16x1xf32>
    %81 = tpu.reciprocal %80 {approx = true} : vector<16x1xf32> -> vector<16x1xf32>
    %82 = vector.broadcast %81 : vector<16x1xf32> to vector<16x16xf32>
    %83 = arith.mulf %78, %82 : vector<16x16xf32>
    %cst_37 = arith.constant dense<0.000000e+00> : vector<16x8xf32>
    %84 = tpu.matmul %83, %72, %cst_37 {dimension_numbers = #tpu.dot_dimension_numbers<[1], [0], [0], [1], [0, 0, 1, 1], [], []>} : vector<16x16xf32>, vector<16x8xf32>, vector<16x8xf32> -> vector<16x8xf32>
    %85 = tpu.concatenate %39, %54, %69, %84 in 1 : vector<16x8xf32>, vector<16x8xf32>, vector<16x8xf32>, vector<16x8xf32> -> vector<16x32xf32>
    %c0_38 = arith.constant 0 : index
    %c0_39 = arith.constant 0 : index
    %86 = vector.load %arg16[%c0_38, %c0_39] : memref<16x32xf32, #tpu.memory_space<vmem>>, vector<16x32xf32>
    %c0_40 = arith.constant 0 : index
    %c0_41 = arith.constant 0 : index
    %c0_42 = arith.constant 0 : index
    %87 = vector.load %arg12[%c0_40, %c0_41, %c0_42] : memref<1x32x32xf32, #tpu.memory_space<vmem>>, vector<1x32x32xf32>
    %88 = vector.shape_cast %87 : vector<1x32x32xf32> to vector<32x32xf32>
    %cst_43 = arith.constant dense<0.000000e+00> : vector<16x32xf32>
    %89 = tpu.matmul %85, %88, %cst_43 {dimension_numbers = #tpu.dot_dimension_numbers<[1], [0], [0], [1], [0, 0, 1, 1], [], []>} : vector<16x32xf32>, vector<32x32xf32>, vector<16x32xf32> -> vector<16x32xf32>
    %90 = arith.addf %86, %89 : vector<16x32xf32>
    %c0_44 = arith.constant 0 : index
    %c0_45 = arith.constant 0 : index
    %91 = vector.load %arg16[%c0_44, %c0_45] : memref<16x32xf32, #tpu.memory_space<vmem>>, vector<16x32xf32>
    tpu.vector_store %arg16[%c0_44, %c0_45], %90 {strides = array<i32>} : memref<16x32xf32, #tpu.memory_space<vmem>>, vector<16x32xf32>,
    %c0_i32_46 = arith.constant 0 : i32
    %92 = arith.cmpi eq, %arg1, %c0_i32_46 : i32
    %93 = arith.extui %92 : i1 to i32
    %c0_i32_47 = arith.constant 0 : i32
    %94 = arith.cmpi ne, %93, %c0_i32_47 : i32
    scf.if %94 {
      %c0_48 = arith.constant 0 : index
      %c0_49 = arith.constant 0 : index
      %c0_50 = arith.constant 0 : index
      %95 = vector.load %arg2[%c0_48, %c0_49, %c0_50] : memref<1x16x32xf32, #tpu.memory_space<vmem>>, vector<1x16x32xf32>
      %96 = vector.shape_cast %95 : vector<1x16x32xf32> to vector<16x32xf32>
      %c0_51 = arith.constant 0 : index
      %c0_52 = arith.constant 0 : index
      %97 = vector.load %arg16[%c0_51, %c0_52] : memref<16x32xf32, #tpu.memory_space<vmem>>, vector<16x32xf32>
      %c0_53 = arith.constant 0 : index
      %c0_54 = arith.constant 0 : index
      %98 = vector.load %arg13[%c0_53, %c0_54] : memref<1x32xf32, #tpu.memory_space<vmem>>, vector<1x32xf32>
      %99 = vector.broadcast %98 : vector<1x32xf32> to vector<16x32xf32>
      %100 = arith.addf %97, %99 : vector<16x32xf32>
      %c0_55 = arith.constant 0 : index
      %c0_56 = arith.constant 0 : index
      %c0_57 = arith.constant 0 : index
      %101 = vector.load %arg5[%c0_55, %c0_56, %c0_57] : memref<1x1x32xf32, #tpu.memory_space<vmem>>, vector<1x1x32xf32>
      %102 = vector.shape_cast %101 : vector<1x1x32xf32> to vector<1x32xf32>
      %103 = vector.broadcast %102 : vector<1x32xf32> to vector<16x32xf32>
      %104 = arith.mulf %103, %100 : vector<16x32xf32>
      %105 = arith.addf %96, %104 : vector<16x32xf32>
      %c0_58 = arith.constant 0 : index
      %c0_59 = arith.constant 0 : index
      %c0_60 = arith.constant 0 : index
      %106 = vector.load %arg14[%c0_58, %c0_59, %c0_60] : memref<1x16x32xf32, #tpu.memory_space<vmem>>, vector<1x16x32xf32>
      %107 = vector.shape_cast %106 : vector<1x16x32xf32> to vector<16x32xf32>
      %108 = vector.shape_cast %105 : vector<16x32xf32> to vector<1x16x32xf32>
      tpu.vector_store %arg14[%c0_58, %c0_59, %c0_60], %108 {strides = array<i32>} : memref<1x16x32xf32, #tpu.memory_space<vmem>>, vector<1x16x32xf32>,
    } else {
    }
    return
  }
  func.func @transform_0(%arg0: i32, %arg1: i32) -> (i32, i32, i32) {
    %c0_i32 = arith.constant 0 : i32
    %c0_i32_0 = arith.constant 0 : i32
    %c0_i32_1 = arith.constant 0 : i32
    return %arg0, %c0_i32, %c0_i32_0 : i32, i32, i32
  }
  func.func @transform_1(%arg0: i32, %arg1: i32) -> (i32, i32, i32) {
    %c0_i32 = arith.constant 0 : i32
    %c0_i32_0 = arith.constant 0 : i32
    %c0_i32_1 = arith.constant 0 : i32
    return %arg0, %c0_i32, %c0_i32_0 : i32, i32, i32
  }
  func.func @transform_2(%arg0: i32, %arg1: i32) -> (i32, i32, i32) {
    %c0_i32 = arith.constant 0 : i32
    %c0_i32_0 = arith.constant 0 : i32
    %c0_i32_1 = arith.constant 0 : i32
    return %arg0, %c0_i32, %c0_i32_0 : i32, i32, i32
  }
  func.func @transform_3(%arg0: i32, %arg1: i32) -> (i32, i32, i32) {
    %c0_i32 = arith.constant 0 : i32
    %c0_i32_0 = arith.constant 0 : i32
    %c0_i32_1 = arith.constant 0 : i32
    return %arg0, %c0_i32, %c0_i32_0 : i32, i32, i32
  }
  func.func @transform_4(%arg0: i32, %arg1: i32) -> (i32, i32, i32) {
    %c0_i32 = arith.constant 0 : i32
    %c0_i32_0 = arith.constant 0 : i32
    %c0_i32_1 = arith.constant 0 : i32
    return %arg1, %c0_i32, %c0_i32_0 : i32, i32, i32
  }
  func.func @transform_5(%arg0: i32, %arg1: i32) -> (i32, i32, i32) {
    %c0_i32 = arith.constant 0 : i32
    %c0_i32_0 = arith.constant 0 : i32
    %c0_i32_1 = arith.constant 0 : i32
    return %arg1, %c0_i32, %c0_i32_0 : i32, i32, i32
  }
  func.func @transform_6(%arg0: i32, %arg1: i32) -> (i32, i32, i32) {
    %c0_i32 = arith.constant 0 : i32
    %c0_i32_0 = arith.constant 0 : i32
    %c0_i32_1 = arith.constant 0 : i32
    return %arg1, %c0_i32, %c0_i32_0 : i32, i32, i32
  }
  func.func @transform_7(%arg0: i32, %arg1: i32) -> (i32, i32, i32) {
    %c0_i32 = arith.constant 0 : i32
    %c0_i32_0 = arith.constant 0 : i32
    %c0_i32_1 = arith.constant 0 : i32
    return %arg1, %c0_i32, %c0_i32_0 : i32, i32, i32
  }
  func.func @transform_8(%arg0: i32, %arg1: i32) -> (i32, i32, i32) {
    %c0_i32 = arith.constant 0 : i32
    %c0_i32_0 = arith.constant 0 : i32
    %c0_i32_1 = arith.constant 0 : i32
    return %arg1, %c0_i32, %c0_i32_0 : i32, i32, i32
  }
  func.func @transform_9(%arg0: i32, %arg1: i32) -> (i32, i32, i32) {
    %c0_i32 = arith.constant 0 : i32
    %c0_i32_0 = arith.constant 0 : i32
    %c0_i32_1 = arith.constant 0 : i32
    return %arg1, %c0_i32, %c0_i32_0 : i32, i32, i32
  }
  func.func @transform_10(%arg0: i32, %arg1: i32) -> (i32, i32, i32) {
    %c0_i32 = arith.constant 0 : i32
    %c0_i32_0 = arith.constant 0 : i32
    %c0_i32_1 = arith.constant 0 : i32
    return %arg1, %c0_i32, %c0_i32_0 : i32, i32, i32
  }
  func.func @transform_11(%arg0: i32, %arg1: i32) -> (i32, i32) {
    %c0_i32 = arith.constant 0 : i32
    %c0_i32_0 = arith.constant 0 : i32
    %c0_i32_1 = arith.constant 0 : i32
    return %c0_i32, %c0_i32_0 : i32, i32
  }
  func.func @transform_12(%arg0: i32, %arg1: i32) -> (i32, i32, i32) {
    %c0_i32 = arith.constant 0 : i32
    %c0_i32_0 = arith.constant 0 : i32
    %c0_i32_1 = arith.constant 0 : i32
    return %arg0, %c0_i32, %c0_i32_0 : i32, i32, i32
  }
}

module attributes {stable_mosaic.version = 11 : i64} {
  func.func @_mlp_resident_kernel(%arg0: i32, %arg1: i32, %arg2: memref<1x8x32xf32, #tpu.memory_space<vmem>>, %arg3: memref<1x1x32xf32, #tpu.memory_space<vmem>>, %arg4: memref<1x1x32xf32, #tpu.memory_space<vmem>>, %arg5: memref<1x1x32xf32, #tpu.memory_space<vmem>>, %arg6: memref<32x128xf32, #tpu.memory_space<vmem>>, %arg7: memref<1x128xf32, #tpu.memory_space<vmem>>, %arg8: memref<128x32xf32, #tpu.memory_space<vmem>>, %arg9: memref<1x32xf32, #tpu.memory_space<vmem>>, %arg10: memref<1x8x32xf32, #tpu.memory_space<vmem>>) attributes {dimension_semantics = [#tpu.dimension_semantics<parallel>, #tpu.dimension_semantics<parallel>], iteration_bounds = array<i64: 2, 1>, scalar_prefetch = 0 : i64, scratch_operands = 0 : i64, tpu.core_type = #tpu.core_type<tc>, window_params = [{transform_indices = @transform_0, window_bounds = array<i64: 1, 8, 32>}, {transform_indices = @transform_1, window_bounds = array<i64: 1, 1, 32>}, {transform_indices = @transform_2, window_bounds = array<i64: 1, 1, 32>}, {transform_indices = @transform_3, window_bounds = array<i64: 1, 1, 32>}, {pipeline_mode = #tpu.pipeline_mode<synchronous>, transform_indices = @transform_4, window_bounds = array<i64: 32, 128>}, {pipeline_mode = #tpu.pipeline_mode<synchronous>, transform_indices = @transform_5, window_bounds = array<i64: 1, 128>}, {pipeline_mode = #tpu.pipeline_mode<synchronous>, transform_indices = @transform_6, window_bounds = array<i64: 128, 32>}, {pipeline_mode = #tpu.pipeline_mode<synchronous>, transform_indices = @transform_7, window_bounds = array<i64: 1, 32>}, {transform_indices = @transform_8, window_bounds = array<i64: 1, 8, 32>}]} {
    %c0 = arith.constant 0 : index
    %c0_0 = arith.constant 0 : index
    %c0_1 = arith.constant 0 : index
    %0 = vector.load %arg2[%c0, %c0_0, %c0_1] : memref<1x8x32xf32, #tpu.memory_space<vmem>>, vector<1x8x32xf32>
    %1 = vector.shape_cast %0 : vector<1x8x32xf32> to vector<8x32xf32>
    %cst = arith.constant dense<0.000000e+00> : vector<8xf32>
    %2 = vector.multi_reduction <add>, %1, %cst [1] : vector<8x32xf32> to vector<8xf32>
    %3 = vector.shape_cast %2 : vector<8xf32> to vector<8x1xf32>
    %cst_2 = arith.constant 3.200000e+01 : f32
    %4 = vector.broadcast %cst_2 : f32 to vector<8x1xf32>
    %5 = arith.divf %3, %4 : vector<8x1xf32>
    %6 = vector.broadcast %5 : vector<8x1xf32> to vector<8x32xf32>
    %7 = arith.subf %1, %6 : vector<8x32xf32>
    %8 = arith.mulf %7, %7 : vector<8x32xf32>
    %cst_3 = arith.constant dense<0.000000e+00> : vector<8xf32>
    %9 = vector.multi_reduction <add>, %8, %cst_3 [1] : vector<8x32xf32> to vector<8xf32>
    %10 = vector.shape_cast %9 : vector<8xf32> to vector<8x1xf32>
    %cst_4 = arith.constant 3.200000e+01 : f32
    %11 = vector.broadcast %cst_4 : f32 to vector<8x1xf32>
    %12 = arith.divf %10, %11 : vector<8x1xf32>
    %13 = vector.broadcast %5 : vector<8x1xf32> to vector<8x32xf32>
    %14 = arith.subf %1, %13 : vector<8x32xf32>
    %cst_5 = arith.constant 9.99999997E-7 : f32
    %15 = vector.broadcast %cst_5 : f32 to vector<8x1xf32>
    %16 = arith.addf %12, %15 : vector<8x1xf32>
    %17 = math.rsqrt %16 : vector<8x1xf32>
    %18 = vector.broadcast %17 : vector<8x1xf32> to vector<8x32xf32>
    %19 = arith.mulf %14, %18 : vector<8x32xf32>
    %c0_6 = arith.constant 0 : index
    %c0_7 = arith.constant 0 : index
    %c0_8 = arith.constant 0 : index
    %20 = vector.load %arg4[%c0_6, %c0_7, %c0_8] : memref<1x1x32xf32, #tpu.memory_space<vmem>>, vector<1x1x32xf32>
    %21 = vector.shape_cast %20 : vector<1x1x32xf32> to vector<1x32xf32>
    %cst_9 = arith.constant 1.000000e+00 : f32
    %22 = vector.broadcast %cst_9 : f32 to vector<1x32xf32>
    %23 = arith.addf %22, %21 : vector<1x32xf32>
    %24 = vector.broadcast %23 : vector<1x32xf32> to vector<8x32xf32>
    %25 = arith.mulf %19, %24 : vector<8x32xf32>
    %c0_10 = arith.constant 0 : index
    %c0_11 = arith.constant 0 : index
    %c0_12 = arith.constant 0 : index
    %26 = vector.load %arg3[%c0_10, %c0_11, %c0_12] : memref<1x1x32xf32, #tpu.memory_space<vmem>>, vector<1x1x32xf32>
    %27 = vector.shape_cast %26 : vector<1x1x32xf32> to vector<1x32xf32>
    %28 = vector.broadcast %27 : vector<1x32xf32> to vector<8x32xf32>
    %29 = arith.addf %25, %28 : vector<8x32xf32>
    %c0_13 = arith.constant 0 : index
    %c0_14 = arith.constant 0 : index
    %30 = vector.load %arg6[%c0_13, %c0_14] : memref<32x128xf32, #tpu.memory_space<vmem>>, vector<32x128xf32>
    %cst_15 = arith.constant dense<0.000000e+00> : vector<8x128xf32>
    %31 = tpu.matmul %29, %30, %cst_15 {dimension_numbers = #tpu.dot_dimension_numbers<[1], [0], [0], [1], [0, 0, 1, 1], [], []>} : vector<8x32xf32>, vector<32x128xf32>, vector<8x128xf32> -> vector<8x128xf32>
    %c0_16 = arith.constant 0 : index
    %c0_17 = arith.constant 0 : index
    %32 = vector.load %arg7[%c0_16, %c0_17] : memref<1x128xf32, #tpu.memory_space<vmem>>, vector<1x128xf32>
    %33 = vector.broadcast %32 : vector<1x128xf32> to vector<8x128xf32>
    %34 = arith.addf %31, %33 : vector<8x128xf32>
    %35 = arith.mulf %34, %34 : vector<8x128xf32>
    %36 = arith.mulf %34, %35 : vector<8x128xf32>
    %cst_18 = arith.constant 4.471500e-02 : f32
    %37 = vector.broadcast %cst_18 : f32 to vector<8x128xf32>
    %38 = arith.mulf %37, %36 : vector<8x128xf32>
    %39 = arith.addf %34, %38 : vector<8x128xf32>
    %cst_19 = arith.constant 0.797884583 : f32
    %40 = vector.broadcast %cst_19 : f32 to vector<8x128xf32>
    %41 = arith.mulf %40, %39 : vector<8x128xf32>
    %42 = math.tanh %41 : vector<8x128xf32>
    %cst_20 = arith.constant 1.000000e+00 : f32
    %43 = vector.broadcast %cst_20 : f32 to vector<8x128xf32>
    %44 = arith.addf %43, %42 : vector<8x128xf32>
    %cst_21 = arith.constant 5.000000e-01 : f32
    %45 = vector.broadcast %cst_21 : f32 to vector<8x128xf32>
    %46 = arith.mulf %45, %44 : vector<8x128xf32>
    %47 = arith.mulf %34, %46 : vector<8x128xf32>
    %c0_22 = arith.constant 0 : index
    %c0_23 = arith.constant 0 : index
    %48 = vector.load %arg8[%c0_22, %c0_23] : memref<128x32xf32, #tpu.memory_space<vmem>>, vector<128x32xf32>
    %cst_24 = arith.constant dense<0.000000e+00> : vector<8x32xf32>
    %49 = tpu.matmul %47, %48, %cst_24 {dimension_numbers = #tpu.dot_dimension_numbers<[1], [0], [0], [1], [0, 0, 1, 1], [], []>} : vector<8x128xf32>, vector<128x32xf32>, vector<8x32xf32> -> vector<8x32xf32>
    %c0_25 = arith.constant 0 : index
    %c0_26 = arith.constant 0 : index
    %50 = vector.load %arg9[%c0_25, %c0_26] : memref<1x32xf32, #tpu.memory_space<vmem>>, vector<1x32xf32>
    %51 = vector.broadcast %50 : vector<1x32xf32> to vector<8x32xf32>
    %52 = arith.addf %49, %51 : vector<8x32xf32>
    %c0_27 = arith.constant 0 : index
    %c0_28 = arith.constant 0 : index
    %c0_29 = arith.constant 0 : index
    %53 = vector.load %arg5[%c0_27, %c0_28, %c0_29] : memref<1x1x32xf32, #tpu.memory_space<vmem>>, vector<1x1x32xf32>
    %54 = vector.shape_cast %53 : vector<1x1x32xf32> to vector<1x32xf32>
    %55 = vector.broadcast %54 : vector<1x32xf32> to vector<8x32xf32>
    %56 = arith.addf %1, %55 : vector<8x32xf32>
    %57 = arith.addf %56, %52 : vector<8x32xf32>
    %c0_30 = arith.constant 0 : index
    %c0_31 = arith.constant 0 : index
    %c0_32 = arith.constant 0 : index
    %58 = vector.load %arg10[%c0_30, %c0_31, %c0_32] : memref<1x8x32xf32, #tpu.memory_space<vmem>>, vector<1x8x32xf32>
    %59 = vector.shape_cast %58 : vector<1x8x32xf32> to vector<8x32xf32>
    %60 = vector.shape_cast %57 : vector<8x32xf32> to vector<1x8x32xf32>
    tpu.vector_store %arg10[%c0_30, %c0_31, %c0_32], %60 {strides = array<i32>} : memref<1x8x32xf32, #tpu.memory_space<vmem>>, vector<1x8x32xf32>,
    return
  }
  func.func @transform_0(%arg0: i32, %arg1: i32) -> (i32, i32, i32) {
    %c1_i32 = arith.constant 1 : i32
    %0 = arith.addi %arg1, %c1_i32 : i32
    %c0_i32 = arith.constant 0 : i32
    %c0_i32_0 = arith.constant 0 : i32
    return %arg0, %0, %c0_i32 : i32, i32, i32
  }
  func.func @transform_1(%arg0: i32, %arg1: i32) -> (i32, i32, i32) {
    %c0_i32 = arith.constant 0 : i32
    %c0_i32_0 = arith.constant 0 : i32
    %c0_i32_1 = arith.constant 0 : i32
    return %arg0, %c0_i32, %c0_i32_0 : i32, i32, i32
  }
  func.func @transform_2(%arg0: i32, %arg1: i32) -> (i32, i32, i32) {
    %c0_i32 = arith.constant 0 : i32
    %c0_i32_0 = arith.constant 0 : i32
    %c0_i32_1 = arith.constant 0 : i32
    return %arg0, %c0_i32, %c0_i32_0 : i32, i32, i32
  }
  func.func @transform_3(%arg0: i32, %arg1: i32) -> (i32, i32, i32) {
    %c0_i32 = arith.constant 0 : i32
    %c0_i32_0 = arith.constant 0 : i32
    %c0_i32_1 = arith.constant 0 : i32
    return %arg0, %c0_i32, %c0_i32_0 : i32, i32, i32
  }
  func.func @transform_4(%arg0: i32, %arg1: i32) -> (i32, i32) {
    %c0_i32 = arith.constant 0 : i32
    %c0_i32_0 = arith.constant 0 : i32
    %c0_i32_1 = arith.constant 0 : i32
    return %c0_i32, %c0_i32_0 : i32, i32
  }
  func.func @transform_5(%arg0: i32, %arg1: i32) -> (i32, i32) {
    %c0_i32 = arith.constant 0 : i32
    %c0_i32_0 = arith.constant 0 : i32
    %c0_i32_1 = arith.constant 0 : i32
    return %c0_i32, %c0_i32_0 : i32, i32
  }
  func.func @transform_6(%arg0: i32, %arg1: i32) -> (i32, i32) {
    %c0_i32 = arith.constant 0 : i32
    %c0_i32_0 = arith.constant 0 : i32
    %c0_i32_1 = arith.constant 0 : i32
    return %c0_i32, %c0_i32_0 : i32, i32
  }
  func.func @transform_7(%arg0: i32, %arg1: i32) -> (i32, i32) {
    %c0_i32 = arith.constant 0 : i32
    %c0_i32_0 = arith.constant 0 : i32
    %c0_i32_1 = arith.constant 0 : i32
    return %c0_i32, %c0_i32_0 : i32, i32
  }
  func.func @transform_8(%arg0: i32, %arg1: i32) -> (i32, i32, i32) {
    %c0_i32 = arith.constant 0 : i32
    %c0_i32_0 = arith.constant 0 : i32
    return %arg0, %arg1, %c0_i32 : i32, i32, i32
  }
}

module attributes {stable_mosaic.version = 11 : i64} {
  func.func @_mlp_resident_kernel(%arg0: i32, %arg1: i32, %arg2: memref<1x8x32xf32, #tpu.memory_space<vmem>>, %arg3: memref<1x1x32xf32, #tpu.memory_space<vmem>>, %arg4: memref<1x1x32xf32, #tpu.memory_space<vmem>>, %arg5: memref<1x1x32xf32, #tpu.memory_space<vmem>>, %arg6: memref<32x128xf32, #tpu.memory_space<vmem>>, %arg7: memref<1x128xf32, #tpu.memory_space<vmem>>, %arg8: memref<128x32xf32, #tpu.memory_space<vmem>>, %arg9: memref<1x32xf32, #tpu.memory_space<vmem>>, %arg10: memref<1x8x32xf32, #tpu.memory_space<vmem>>) attributes {dimension_semantics = [#tpu.dimension_semantics<parallel>, #tpu.dimension_semantics<parallel>], iteration_bounds = array<i64: 2, 1>, scalar_prefetch = 0 : i64, scratch_operands = 0 : i64, tpu.core_type = #tpu.core_type<tc>, window_params = [{transform_indices = @transform_0, window_bounds = array<i64: 1, 8, 32>}, {transform_indices = @transform_1, window_bounds = array<i64: 1, 1, 32>}, {transform_indices = @transform_2, window_bounds = array<i64: 1, 1, 32>}, {transform_indices = @transform_3, window_bounds = array<i64: 1, 1, 32>}, {pipeline_mode = #tpu.pipeline_mode<synchronous>, transform_indices = @transform_4, window_bounds = array<i64: 32, 128>}, {pipeline_mode = #tpu.pipeline_mode<synchronous>, transform_indices = @transform_5, window_bounds = array<i64: 1, 128>}, {pipeline_mode = #tpu.pipeline_mode<synchronous>, transform_indices = @transform_6, window_bounds = array<i64: 128, 32>}, {pipeline_mode = #tpu.pipeline_mode<synchronous>, transform_indices = @transform_7, window_bounds = array<i64: 1, 32>}, {transform_indices = @transform_8, window_bounds = array<i64: 1, 8, 32>}]} {
    %c0 = arith.constant 0 : index
    %c0_0 = arith.constant 0 : index
    %c0_1 = arith.constant 0 : index
    %0 = vector.load %arg2[%c0, %c0_0, %c0_1] : memref<1x8x32xf32, #tpu.memory_space<vmem>>, vector<1x8x32xf32>
    %1 = vector.shape_cast %0 : vector<1x8x32xf32> to vector<8x32xf32>
    %cst = arith.constant dense<0.000000e+00> : vector<8xf32>
    %2 = vector.multi_reduction <add>, %1, %cst [1] : vector<8x32xf32> to vector<8xf32>
    %3 = vector.shape_cast %2 : vector<8xf32> to vector<8x1xf32>
    %cst_2 = arith.constant 3.200000e+01 : f32
    %4 = vector.broadcast %cst_2 : f32 to vector<8x1xf32>
    %5 = arith.divf %3, %4 : vector<8x1xf32>
    %6 = vector.broadcast %5 : vector<8x1xf32> to vector<8x32xf32>
    %7 = arith.subf %1, %6 : vector<8x32xf32>
    %8 = arith.mulf %7, %7 : vector<8x32xf32>
    %cst_3 = arith.constant dense<0.000000e+00> : vector<8xf32>
    %9 = vector.multi_reduction <add>, %8, %cst_3 [1] : vector<8x32xf32> to vector<8xf32>
    %10 = vector.shape_cast %9 : vector<8xf32> to vector<8x1xf32>
    %cst_4 = arith.constant 3.200000e+01 : f32
    %11 = vector.broadcast %cst_4 : f32 to vector<8x1xf32>
    %12 = arith.divf %10, %11 : vector<8x1xf32>
    %13 = vector.broadcast %5 : vector<8x1xf32> to vector<8x32xf32>
    %14 = arith.subf %1, %13 : vector<8x32xf32>
    %cst_5 = arith.constant 9.99999997E-7 : f32
    %15 = vector.broadcast %cst_5 : f32 to vector<8x1xf32>
    %16 = arith.addf %12, %15 : vector<8x1xf32>
    %17 = math.rsqrt %16 : vector<8x1xf32>
    %18 = vector.broadcast %17 : vector<8x1xf32> to vector<8x32xf32>
    %19 = arith.mulf %14, %18 : vector<8x32xf32>
    %c0_6 = arith.constant 0 : index
    %c0_7 = arith.constant 0 : index
    %c0_8 = arith.constant 0 : index
    %20 = vector.load %arg4[%c0_6, %c0_7, %c0_8] : memref<1x1x32xf32, #tpu.memory_space<vmem>>, vector<1x1x32xf32>
    %21 = vector.shape_cast %20 : vector<1x1x32xf32> to vector<1x32xf32>
    %cst_9 = arith.constant 1.000000e+00 : f32
    %22 = vector.broadcast %cst_9 : f32 to vector<1x32xf32>
    %23 = arith.addf %22, %21 : vector<1x32xf32>
    %24 = vector.broadcast %23 : vector<1x32xf32> to vector<8x32xf32>
    %25 = arith.mulf %19, %24 : vector<8x32xf32>
    %c0_10 = arith.constant 0 : index
    %c0_11 = arith.constant 0 : index
    %c0_12 = arith.constant 0 : index
    %26 = vector.load %arg3[%c0_10, %c0_11, %c0_12] : memref<1x1x32xf32, #tpu.memory_space<vmem>>, vector<1x1x32xf32>
    %27 = vector.shape_cast %26 : vector<1x1x32xf32> to vector<1x32xf32>
    %28 = vector.broadcast %27 : vector<1x32xf32> to vector<8x32xf32>
    %29 = arith.addf %25, %28 : vector<8x32xf32>
    %c0_13 = arith.constant 0 : index
    %c0_14 = arith.constant 0 : index
    %30 = vector.load %arg6[%c0_13, %c0_14] : memref<32x128xf32, #tpu.memory_space<vmem>>, vector<32x128xf32>
    %cst_15 = arith.constant dense<0.000000e+00> : vector<8x128xf32>
    %31 = tpu.matmul %29, %30, %cst_15 {dimension_numbers = #tpu.dot_dimension_numbers<[1], [0], [0], [1], [0, 0, 1, 1], [], []>} : vector<8x32xf32>, vector<32x128xf32>, vector<8x128xf32> -> vector<8x128xf32>
    %c0_16 = arith.constant 0 : index
    %c0_17 = arith.constant 0 : index
    %32 = vector.load %arg7[%c0_16, %c0_17] : memref<1x128xf32, #tpu.memory_space<vmem>>, vector<1x128xf32>
    %33 = vector.broadcast %32 : vector<1x128xf32> to vector<8x128xf32>
    %34 = arith.addf %31, %33 : vector<8x128xf32>
    %35 = arith.mulf %34, %34 : vector<8x128xf32>
    %36 = arith.mulf %34, %35 : vector<8x128xf32>
    %cst_18 = arith.constant 4.471500e-02 : f32
    %37 = vector.broadcast %cst_18 : f32 to vector<8x128xf32>
    %38 = arith.mulf %37, %36 : vector<8x128xf32>
    %39 = arith.addf %34, %38 : vector<8x128xf32>
    %cst_19 = arith.constant 0.797884583 : f32
    %40 = vector.broadcast %cst_19 : f32 to vector<8x128xf32>
    %41 = arith.mulf %40, %39 : vector<8x128xf32>
    %42 = math.tanh %41 : vector<8x128xf32>
    %cst_20 = arith.constant 1.000000e+00 : f32
    %43 = vector.broadcast %cst_20 : f32 to vector<8x128xf32>
    %44 = arith.addf %43, %42 : vector<8x128xf32>
    %cst_21 = arith.constant 5.000000e-01 : f32
    %45 = vector.broadcast %cst_21 : f32 to vector<8x128xf32>
    %46 = arith.mulf %45, %44 : vector<8x128xf32>
    %47 = arith.mulf %34, %46 : vector<8x128xf32>
    %c0_22 = arith.constant 0 : index
    %c0_23 = arith.constant 0 : index
    %48 = vector.load %arg8[%c0_22, %c0_23] : memref<128x32xf32, #tpu.memory_space<vmem>>, vector<128x32xf32>
    %cst_24 = arith.constant dense<0.000000e+00> : vector<8x32xf32>
    %49 = tpu.matmul %47, %48, %cst_24 {dimension_numbers = #tpu.dot_dimension_numbers<[1], [0], [0], [1], [0, 0, 1, 1], [], []>} : vector<8x128xf32>, vector<128x32xf32>, vector<8x32xf32> -> vector<8x32xf32>
    %c0_25 = arith.constant 0 : index
    %c0_26 = arith.constant 0 : index
    %50 = vector.load %arg9[%c0_25, %c0_26] : memref<1x32xf32, #tpu.memory_space<vmem>>, vector<1x32xf32>
    %51 = vector.broadcast %50 : vector<1x32xf32> to vector<8x32xf32>
    %52 = arith.addf %49, %51 : vector<8x32xf32>
    %c0_27 = arith.constant 0 : index
    %c0_28 = arith.constant 0 : index
    %c0_29 = arith.constant 0 : index
    %53 = vector.load %arg5[%c0_27, %c0_28, %c0_29] : memref<1x1x32xf32, #tpu.memory_space<vmem>>, vector<1x1x32xf32>
    %54 = vector.shape_cast %53 : vector<1x1x32xf32> to vector<1x32xf32>
    %55 = vector.broadcast %54 : vector<1x32xf32> to vector<8x32xf32>
    %56 = arith.mulf %55, %52 : vector<8x32xf32>
    %57 = arith.addf %1, %56 : vector<8x32xf32>
    %c0_30 = arith.constant 0 : index
    %c0_31 = arith.constant 0 : index
    %c0_32 = arith.constant 0 : index
    %58 = vector.load %arg10[%c0_30, %c0_31, %c0_32] : memref<1x8x32xf32, #tpu.memory_space<vmem>>, vector<1x8x32xf32>
    %59 = vector.shape_cast %58 : vector<1x8x32xf32> to vector<8x32xf32>
    %60 = vector.shape_cast %57 : vector<8x32xf32> to vector<1x8x32xf32>
    tpu.vector_store %arg10[%c0_30, %c0_31, %c0_32], %60 {strides = array<i32>} : memref<1x8x32xf32, #tpu.memory_space<vmem>>, vector<1x8x32xf32>,
    return
  }
  func.func @transform_0(%arg0: i32, %arg1: i32) -> (i32, i32, i32) {
    %c0_i32 = arith.constant 0 : i32
    %0 = arith.addi %arg1, %c0_i32 : i32
    %c0_i32_0 = arith.constant 0 : i32
    %c0_i32_1 = arith.constant 0 : i32
    return %arg0, %0, %c0_i32_0 : i32, i32, i32
  }
  func.func @transform_1(%arg0: i32, %arg1: i32) -> (i32, i32, i32) {
    %c0_i32 = arith.constant 0 : i32
    %c0_i32_0 = arith.constant 0 : i32
    %c0_i32_1 = arith.constant 0 : i32
    return %arg0, %c0_i32, %c0_i32_0 : i32, i32, i32
  }
  func.func @transform_2(%arg0: i32, %arg1: i32) -> (i32, i32, i32) {
    %c0_i32 = arith.constant 0 : i32
    %c0_i32_0 = arith.constant 0 : i32
    %c0_i32_1 = arith.constant 0 : i32
    return %arg0, %c0_i32, %c0_i32_0 : i32, i32, i32
  }
  func.func @transform_3(%arg0: i32, %arg1: i32) -> (i32, i32, i32) {
    %c0_i32 = arith.constant 0 : i32
    %c0_i32_0 = arith.constant 0 : i32
    %c0_i32_1 = arith.constant 0 : i32
    return %arg0, %c0_i32, %c0_i32_0 : i32, i32, i32
  }
  func.func @transform_4(%arg0: i32, %arg1: i32) -> (i32, i32) {
    %c0_i32 = arith.constant 0 : i32
    %c0_i32_0 = arith.constant 0 : i32
    %c0_i32_1 = arith.constant 0 : i32
    return %c0_i32, %c0_i32_0 : i32, i32
  }
  func.func @transform_5(%arg0: i32, %arg1: i32) -> (i32, i32) {
    %c0_i32 = arith.constant 0 : i32
    %c0_i32_0 = arith.constant 0 : i32
    %c0_i32_1 = arith.constant 0 : i32
    return %c0_i32, %c0_i32_0 : i32, i32
  }
  func.func @transform_6(%arg0: i32, %arg1: i32) -> (i32, i32) {
    %c0_i32 = arith.constant 0 : i32
    %c0_i32_0 = arith.constant 0 : i32
    %c0_i32_1 = arith.constant 0 : i32
    return %c0_i32, %c0_i32_0 : i32, i32
  }
  func.func @transform_7(%arg0: i32, %arg1: i32) -> (i32, i32) {
    %c0_i32 = arith.constant 0 : i32
    %c0_i32_0 = arith.constant 0 : i32
    %c0_i32_1 = arith.constant 0 : i32
    return %c0_i32, %c0_i32_0 : i32, i32
  }
  func.func @transform_8(%arg0: i32, %arg1: i32) -> (i32, i32, i32) {
    %c0_i32 = arith.constant 0 : i32
    %c0_i32_0 = arith.constant 0 : i32
    return %arg0, %arg1, %c0_i32 : i32, i32, i32
  }
}

</mosaic_0001>

<bundles_post_ra>
// kernel: cond_dit_block.4
= control target key start
LH: loop header
LB: loop body
LE: loop exit
PB: predicated region body
PF: predicated region fallthrough
CT: control target
= control target key end

     0   :  { %s1995_s0 = inlined_call_operand.hbm [shape: f32[2,16,32], index: 0, kind: input, shape index: {}]   ;;  %s1996_s1 = inlined_call_operand.hbm [shape: f32[2,1,32], index: 1, kind: input, shape index: {}]   ;;  %s1997_s2 = inlined_call_operand.hbm [shape: f32[2,1,32], index: 2, kind: input, shape index: {}]   ;;  %s1998_s3 = inlined_call_operand.hbm [shape: f32[2,1,32], index: 3, kind: input, shape index: {}]   ;;  %s1999_s4 = inlined_call_operand.hbm [shape: f32[32,128], index: 4, kind: input, shape index: {}]   ;;  %s2000_s5 = inlined_call_operand.hbm [shape: f32[1,128], index: 5, kind: input, shape index: {}]   ;;  %s2001_s6 = inlined_call_operand.hbm [shape: f32[128,32], index: 6, kind: input, shape index: {}]   ;;  %s2002_s7 = inlined_call_operand.hbm [shape: f32[1,32], index: 7, kind: input, shape index: {}]   ;;  %s2003_s8 = inlined_call_operand.hbm [shape: f32[2,8,32], index: 8, kind: output, shape index: {}]  }
   0x1   :  { %2026 = sst [smem:[#allocation31_spill]] %s1996_s1 }
   0x2   :  { %2027 = sst [smem:[#allocation32_spill]] %s1999_s4 }
   0x3   :  { %2028 = sst [smem:[#allocation33_spill]] %s2000_s5 }
   0x4   :  { %2029 = sst [smem:[#allocation34_spill]] %s2003_s8 }
   0x5   :  { %13 = vsyncpa [#allocation3], 0 }
   0x6   :  { %15 = vsyncpa [#allocation3 + $0x1], 0 }
   0x7   :  { %16 = vsyncpa [#allocation6], 0 }
   0x8   :  { %18 = vsyncpa [#allocation6 + $0x1], 0 }
   0x9   :  { %19 = vsyncpa [#allocation9], 0 }
   0xa   :  { %21 = vsyncpa [#allocation9 + $0x1], 0 }
   0xb   :  { %22 = vsyncpa [#allocation12], 0 }
   0xc   :  { %23 = vsyncpa [#allocation15], 0 }
   0xd   :  { %24 = vsyncpa [#allocation4], 0 }
   0xe   :  { %26 = vsyncpa [#allocation4 + $0x1], 0  ;;  %s1563_s27 = smov 0   ;;  %s1565_s28 = smov 0  }
   0xf   :  { %s1567_s29 = smov 0   ;;  %s1569_s30 = smov 0  }
  0x10   :  { %s1571_s9 = smov 0   ;;  %s1573_s10 = smov 0  }
  0x11 LB: > { %2030 = sst [smem:[#allocation24_spill]] %s1482_s27  ;;  %s1594_s11 = sadd.s32 4294967295, %s1502_s10   ;;  %s1502_s10 = sphi %s1573_s10, %s32_s10   ;;  %s1498_s9 = sphi %s1571_s9, %s2080_s9   ;;  %s1494_s30 = sphi %s1569_s30, %s2079_s30   ;;  %s1490_s29 = sphi %s1567_s29, %s2075_s29   ;;  %s1486_s28 = sphi %s1565_s28, %s2078_s28   ;;  %s1482_s27 = sphi %s1563_s27, %s2077_s27  }
  0x12   : > { %2031 = sst [smem:[#allocation25_spill]] %s1490_s29  ;;  %s913_s12 = sadd.s32 4294967294, %s1502_s10  }
  0x13   : > { %2032 = sst [smem:[#allocation26_spill]] %s1494_s30  ;;  %p66_p0 = scmp.ne.s32.totalorder %s1486_s28, %s1482_s27 }
  0x14   : > { %p2004_p1 = scmp.eq.s32.totalorder %s1594_s11, 0  ;;  %p260_p3 = scmp.eq.s32.totalorder %s913_s12, 1 }
  0x15   : > { %p914_p5 = scmp.ge.s32.totalorder %s1502_s10, 1  ;;  %p267_p7 = scmp.lt.s32.totalorder %s1502_s10, 3 }
  0x16   : > { %p1603_p4 = por %p2004_p1, %p66_p0  ;;  %p1608_p6 = por %p260_p3, %p66_p0 }
  0x17   : > { %p1613_p8 = pnand %p914_p5, %p267_p7  ;;  %s1504_s16 = smov [#allocation10]  }
  0x18   : > { %s2033_s13 = scalar_select %p1603_p4, 1, 0 }
  0x19   : > { %s2034_s14 = scalar_select %p1608_p6, 1, 0 }
  0x1a   : > { %s2036_s15 = scalar_select %p1613_p8, 1, 0 }
  0x1b   : > { %2035 = sst [smem:[#allocation27_spill]] %s2034_s14  ;;  %s279_s17 = sshll.u32 %s1504_s16, 4  ;;  %s1617_s17 = int_to_ptr.vmem [resolvable:$true] %s279_s17 }
  0x1c   : > { %p1067_p9 = pneg %p1613_p8  ;;  %s1505_s19 = smov [#allocation11]  }
  0x1d   : > { %s293_s20 = sshll.u32 %s1505_s19, 4  ;;  %s2038_s4 = sld [smem:[#allocation32_spill]]  ;;  %s1628_s20 = int_to_ptr.vmem [resolvable:$true] %s293_s20 }
  0x1e   : > { %p1624_p11 = pnand %p1067_p9, %p2004_p1 }
  0x20   : > { %s2037_s18 = scalar_select %p1624_p11, 1, 0 }
  0x21   : > { %p1638_p13 = pneg %p1624_p11 }
  0x23   : > { %s1168_s23 = scalar_lea.hbm %s2038_s4, 512 }
  0x24   : > { %p1169_p12 = scmp.ne.s32.totalorder %s2038_s4, %s1168_s23  ;;  %p1175_p5 = scmp.lt.u32.totalorder %s1168_s23, %s2038_s4 }
  0x25   : > { %s2039_s26 = scalar_select %p1638_p13, 1, 0 }
  0x26   : > { %p1171_p0 = pnand %p1638_p13, %p1169_p12 }
  0x28   : > { %p1172_p3 = pneg %p1171_p0 }
  0x2a   : > { %p1177_p7 = pnand %p1175_p5, %p1172_p3 }
  0x2c   : > { %1180 = shalt.err (!%p1177_p7)
}
  0x2d   : > { %s1181_s19 = scalar_lea.vmem %s1617_s17, 512  ;;  %p1189_p2 = scmp.lt.s32.totalorder %s1617_s17, %s1617_s17 }
  0x2e   : > { %p1182_p9 = scmp.ne.s32.totalorder %s1617_s17, %s1181_s19  ;;  %p1190_p6 = scmp.lt.s32.totalorder %s1181_s19, %s1181_s19 }
  0x30   : > { %p1184_p10 = pnand %p1182_p9, %p1638_p13  ;;  %p1191_p12 = por %p1190_p6, %p1189_p2 }
  0x32   : > { %p1185_p1 = pneg %p1184_p10 }
  0x34   : > { %p1192_p0 = pnand %p1191_p12, %p1185_p1 }
  0x36   : > { %1195 = shalt.err (!%p1192_p0)
}
  0x37   : > { %s2008_s21 = smov 128   ;;  %s2009_s22 = smov 8  }
  0x38   : > { %1070 = dma.hbm_to_vmem [thread:$0]  (!%p1624_p11), %s2038_s4, 512, %s1617_s17, [#allocation9], %s2008_s21, %s2008_s21, %s2009_s22  }
  0x39   : > { %s2040_s5 = sld [smem:[#allocation33_spill]] }
  0x3f   : > { %s1196_s16 = scalar_lea.hbm %s2040_s5, 16 }
  0x40   : > { %p1197_p1 = scmp.ne.s32.totalorder %s2040_s5, %s1196_s16  ;;  %p1203_p10 = scmp.lt.u32.totalorder %s1196_s16, %s2040_s5 }
  0x42   : > { %p1199_p2 = pnand %p1197_p1, %p1638_p13 }
  0x44   : > { %p1200_p6 = pneg %p1199_p2 }
  0x46   : > { %p1205_p3 = pnand %p1203_p10, %p1200_p6 }
  0x48   : > { %1208 = shalt.err (!%p1205_p3)
}
  0x49   : > { %s1209_s17 = scalar_lea.vmem %s1628_s20, 16  ;;  %s1216_s14 = scalar_lea.vmem %s1628_s20, 32 }
  0x4a   : > { %p1210_p5 = scmp.ne.s32.totalorder %s1628_s20, %s1209_s17  ;;  %p1217_p12 = scmp.lt.s32.totalorder %s1628_s20, %s1628_s20 }
  0x4b   : > { %p1218_p0 = scmp.lt.s32.totalorder %s1216_s14, %s1209_s17 }
  0x4c   : > { %p1212_p7 = pnand %p1210_p5, %p1638_p13 }
  0x4d   : > { %p1219_p1 = por %p1218_p0, %p1217_p12 }
  0x4e   : > { %p1213_p9 = pneg %p1212_p7 }
  0x50   : > { %p1220_p2 = pnand %p1219_p1, %p1213_p9 }
  0x52   : > { %1223 = shalt.err (!%p1220_p2)
}
  0x53   : > { %1073 = dma.hbm_to_vmem [thread:$0]  (!%p1624_p11), %s2040_s5, 16, %s1628_s20, [#allocation12]  }
  0x54   : > { %s44_s23 = sadd.s32 1, %s1498_s9  ;;  %s53_s24 = sadd.s32 1, %s1490_s29 }
  0x55   : > { %p46_p6 = scmp.ge.s32.totalorder %s44_s23, 2  ;;  %p60_p10 = scmp.ne.s32.totalorder %s1490_s29, %s1486_s28 }
  0x56   : > { %p61_p3 = scmp.eq.s32.totalorder %s1502_s10, 0  ;;  %p1101_p5 = scmp.lt.s32.totalorder %s1502_s10, 2 }
  0x57   : > { %s2082_s23 = smov (%p46_p6, %s44_s23), 0  ;;  %p2042_p9 = scmp.eq.s32.totalorder %s1594_s11, 1 }
  0x58   : > { %2041 = sst [smem:[#allocation28_spill]] %s2082_s23  ;;  %p62_p7 = por %p61_p3, %p60_p10 }
  0x59   : > { %p1696_p12 = por %p2042_p9, %p60_p10  ;;  %s48_s12 = ssub.s32 %s1498_s9, %s2082_s23 }
  0x5a   : > { %s1703_s16 = sand.u32 1, %s1490_s29   ;;  %p51_p0 = scmp.eq.s32.totalorder %s48_s12, 0 }
  0x5b   : > { %s2043_s25 = scalar_select %p1696_p12, 1, 0 }
  0x5c   : > { %p1705_p1 = pnand %p1101_p5, %p62_p7  ;;  %s2013_s19 = sand.u32 1, %s1502_s10  }
  0x5d   : > { %2044 = sst [smem:[#allocation29_spill]] %s2043_s25  ;;  %s1714_s14 = sshll.u32 %s1498_s9, 4 }
  0x5e   : > { %s2045_s20 = scalar_select %p1705_p1, 1, 0 }
  0x5f   : > { %s1711_s17 = scalar_select %p51_p0, %s1490_s29, %s53_s24  }
  0x60   : > { %s351_s8 = scalar_lea.vmem [#allocation5], %s1703_s16  ;;  %s2047_s1 = sld [smem:[#allocation31_spill]] }
  0x61   : > { %2046 = sst [smem:[#allocation30_spill]] %s1711_s17  ;;  %s358_s27 = sshll.u32 %s351_s8, 4  ;;  %s1723_s27 = int_to_ptr.vmem [resolvable:$true] %s358_s27 }
  0x62   : > { %s1727_s12 = scalar_lea.sflag [#allocation6], %s2013_s19  ;;  %p1733_p6 = pneg %p1705_p1 }
  0x64   : > { %s2048_s5 = scalar_select %p1733_p6, 1, 0 }
  0x66   : > { %s1721_s4 = scalar_lea.hbm %s2047_s1, %s1714_s14  ;;  %s1229_s8 = scalar_lea.hbm %s2047_s1, 32 }
  0x67   : > { %s1224_s24 = scalar_lea.hbm %s1721_s4, 16  ;;  %p1230_p5 = scmp.lt.u32.totalorder %s1721_s4, %s2047_s1 }
  0x68   : > { %p1225_p2 = scmp.ne.s32.totalorder %s1721_s4, %s1224_s24  ;;  %p1231_p7 = scmp.lt.u32.totalorder %s1229_s8, %s1224_s24 }
  0x69   : > { %p1233_p0 = scmp.lt.u32.totalorder %s1224_s24, %s1721_s4 }
  0x6a   : > { %p1227_p10 = pnand %p1733_p6, %p1225_p2  ;;  %p1232_p9 = por %p1231_p7, %p1230_p5 }
  0x6c   : > { %p1228_p3 = pneg %p1227_p10  ;;  %p1234_p12 = por %p1233_p0, %p1232_p9 }
  0x6e   : > { %p1235_p4 = pnand %p1234_p12, %p1228_p3 }
  0x70   : > { %1238 = shalt.err (!%p1235_p4)
}
  0x71   : > { %s1239_s19 = scalar_lea.vmem %s1723_s27, 16  ;;  %s1508_s21 = smov [#allocation5]  }
  0x72   : > { %p1240_p2 = scmp.ne.s32.totalorder %s1723_s27, %s1239_s19  ;;  %s1244_s22 = sshll.u32 %s1508_s21, 4  ;;  %s1245_s22 = int_to_ptr.vmem [resolvable:$false] %s1244_s22 }
  0x73   : > { %s1246_s23 = scalar_lea.vmem %s1245_s22, 32  ;;  %p1247_p11 = scmp.lt.s32.totalorder %s1723_s27, %s1245_s22 }
  0x74   : > { %p1242_p10 = pnand %p1240_p2, %p1733_p6  ;;  %p1248_p13 = scmp.lt.s32.totalorder %s1246_s23, %s1239_s19 }
  0x76   : > { %p1243_p8 = pneg %p1242_p10  ;;  %p1249_p5 = por %p1248_p13, %p1247_p11 }
  0x78   : > { %p1250_p7 = pnand %p1249_p5, %p1243_p8 }
  0x7a   : > { %1253 = shalt.err (!%p1250_p7)
}
  0x7b   : > { %1086 = dma.hbm_to_vmem [thread:$0]  (!%p1705_p1), %s1721_s4, 16, %s1723_s27, %s1727_s12  }
  0x7c   : > { %s1509_s17 = smov [#allocation13]   ;;  %s1510_s8 = smov [#allocation14]  }
  0x7d   : > { %s303_s24 = sshll.u32 %s1509_s17, 4  ;;  %s317_s1 = sshll.u32 %s1510_s8, 4  ;;  %s304_s24 = int_to_ptr.vmem [resolvable:$true] %s303_s24  ;;  %s318_s1 = int_to_ptr.vmem [resolvable:$true] %s317_s1 }
  0x7e   : > { %s1254_s22 = scalar_lea.hbm %s2001_s6, 2048  ;;  %p2049_p8 = scmp.ne.s32.totalorder %s2039_s26, 0 }
  0x7f   : > { %p1255_p4 = scmp.ne.s32.totalorder %s2001_s6, %s1254_s22  ;;  %p1261_p12 = scmp.lt.u32.totalorder %s1254_s22, %s2001_s6 }
  0x81   : > { %p1257_p11 = pnand %p1255_p4, %p2049_p8 }
  0x83   : > { %p1258_p13 = pneg %p1257_p11 }
  0x85   : > { %p1263_p3 = pnand %p1261_p12, %p1258_p13 }
  0x87   : > { %1266 = shalt.err (!%p1263_p3)
}
  0x88   : > { %s1267_s4 = scalar_lea.vmem %s304_s24, 2048  ;;  %p1275_p10 = scmp.lt.s32.totalorder %s304_s24, %s304_s24 }
  0x89   : > { %p1268_p9 = scmp.ne.s32.totalorder %s304_s24, %s1267_s4  ;;  %p1276_p5 = scmp.lt.s32.totalorder %s1267_s4, %s1267_s4 }
  0x8b   : > { %p1270_p0 = pnand %p1268_p9, %p2049_p8  ;;  %p1277_p7 = por %p1276_p5, %p1275_p10 }
  0x8d   : > { %p1271_p2 = pneg %p1270_p0 }
  0x8f   : > { %p1278_p1 = pnand %p1277_p7, %p1271_p2 }
  0x91   : > { %1281 = shalt.err (!%p1278_p1)
}
  0x92   : > { %p2050_p4 = scmp.ne.s32.totalorder %s2037_s18, 0  ;;  %s2051_s29 = smov 8  }
  0x93   : > { %s2052_s27 = smov 128   ;;  %s1282_s21 = scalar_lea.hbm %s2002_s7, 16 }
  0x94   : > { %1076 = dma.hbm_to_vmem [thread:$0]  (!%p2050_p4), %s2001_s6, 2048, %s304_s24, [#allocation12], %s2052_s27, %s2052_s27, %s2051_s29  }
  0x95   : > { %p1283_p11 = scmp.ne.s32.totalorder %s2002_s7, %s1282_s21  ;;  %p1289_p12 = scmp.lt.u32.totalorder %s1282_s21, %s2002_s7 }
  0x97   : > { %p1285_p1 = pnand %p1283_p11, %p2049_p8 }
  0x99   : > { %p1286_p13 = pneg %p1285_p1 }
  0x9b   : > { %p1291_p3 = pnand %p1289_p12, %p1286_p13 }
  0x9d   : > { %1294 = shalt.err (!%p1291_p3)
}
  0x9e   : > { %s1295_s30 = scalar_lea.vmem %s318_s1, 16  ;;  %s1302_s24 = scalar_lea.vmem %s318_s1, 32 }
  0x9f   : > { %p1296_p9 = scmp.ne.s32.totalorder %s318_s1, %s1295_s30  ;;  %p1303_p10 = scmp.lt.s32.totalorder %s318_s1, %s318_s1 }
  0xa0   : > { %p1304_p5 = scmp.lt.s32.totalorder %s1302_s24, %s1295_s30 }
  0xa1   : > { %p1298_p0 = pnand %p1296_p9, %p2049_p8 }
  0xa2   : > { %p1305_p7 = por %p1304_p5, %p1303_p10 }
  0xa3   : > { %p1299_p2 = pneg %p1298_p0 }
  0xa5   : > { %p1306_p6 = pnand %p1305_p7, %p1299_p2 }
  0xa7   : > { %1309 = shalt.err (!%p1306_p6)
}
  0xa8   : > { %1079 = dma.hbm_to_vmem [thread:$0]  (!%p2050_p4), %s2002_s7, 16, %s318_s1, [#allocation15]  }
  0xa9   : > { %s920_s26 = sshll.u32 %s1703_s16, 3  ;;  %s942_s25 = sshll.u32 %s1498_s9, 8 }
  0xaa   : > { %s1801_s21 = scalar_lea.hbm %s1995_s0, %s942_s25  ;;  %s332_s18 = scalar_lea.vmem [#allocation2], %s920_s26 }
  0xab   : > { %s341_s22 = sshll.u32 %s332_s18, 4  ;;  %s1809_s4 = scalar_lea.hbm %s1997_s2, %s1714_s14  ;;  %s1803_s22 = int_to_ptr.vmem [resolvable:$true] %s341_s22 }
  0xac   : > { %s329_s1 = scalar_lea.sflag [#allocation3], %s1703_s16  ;;  %s1310_s30 = scalar_lea.hbm %s1801_s21, 128 }
  0xad   : > { %p1311_p6 = scmp.ne.s32.totalorder %s1801_s21, %s1310_s30  ;;  %p2053_p8 = scmp.ne.s32.totalorder %s2048_s5, 0 }
  0xae   : > { %s1315_s27 = scalar_lea.hbm %s1995_s0, 512  ;;  %p1316_p1 = scmp.lt.u32.totalorder %s1801_s21, %s1995_s0 }
  0xaf   : > { %p1313_p4 = pnand %p1311_p6, %p2053_p8  ;;  %p1317_p13 = scmp.lt.u32.totalorder %s1315_s27, %s1310_s30 }
  0xb0   : > { %p1319_p3 = scmp.lt.u32.totalorder %s1310_s30, %s1801_s21 }
  0xb1   : > { %p1314_p11 = pneg %p1313_p4  ;;  %p1318_p12 = por %p1317_p13, %p1316_p1 }
  0xb3   : > { %p1320_p9 = por %p1319_p3, %p1318_p12 }
  0xb5   : > { %p1321_p0 = pnand %p1320_p9, %p1314_p11 }
  0xb7   : > { %1324 = shalt.err (!%p1321_p0)
}
  0xb8   : > { %s1325_s17 = scalar_lea.vmem %s1803_s22, 128  ;;  %s1511_s8 = smov [#allocation2]  }
  0xb9   : > { %p1326_p2 = scmp.ne.s32.totalorder %s1803_s22, %s1325_s17  ;;  %s1330_s18 = sshll.u32 %s1511_s8, 4  ;;  %s1331_s18 = int_to_ptr.vmem [resolvable:$false] %s1330_s18 }
  0xba   : > { %s1332_s19 = scalar_lea.vmem %s1331_s18, 256  ;;  %p1333_p7 = scmp.lt.s32.totalorder %s1803_s22, %s1331_s18 }
  0xbb   : > { %p1328_p10 = pnand %p1326_p2, %p2053_p8  ;;  %p1334_p6 = scmp.lt.s32.totalorder %s1332_s19, %s1325_s17 }
  0xbd   : > { %p1329_p5 = pneg %p1328_p10  ;;  %p1335_p4 = por %p1334_p6, %p1333_p7 }
  0xbf   : > { %p1336_p1 = pnand %p1335_p4, %p1329_p5 }
  0xc1   : > { %1339 = shalt.err (!%p1336_p1)
}
  0xc2   : > { %p2054_p11 = scmp.ne.s32.totalorder %s2045_s20, 0  ;;  %s368_s23 = scalar_lea.vmem [#allocation7], %s1703_s16 }
  0xc3   : > { %s375_s30 = sshll.u32 %s368_s23, 4  ;;  %s1838_s27 = scalar_lea.hbm %s1998_s3, %s1714_s14  ;;  %s376_s30 = int_to_ptr.vmem [resolvable:$true] %s375_s30 }
  0xc4   : > { %1083 = dma.hbm_to_vmem [thread:$0]  (!%p2054_p11), %s1801_s21, 128, %s1803_s22, %s329_s1  }
  0xc5   : > { %s1340_s25 = scalar_lea.hbm %s1809_s4, 16  ;;  %s1345_s8 = scalar_lea.hbm %s1997_s2, 32 }
  0xc6   : > { %p1341_p13 = scmp.ne.s32.totalorder %s1809_s4, %s1340_s25  ;;  %p1346_p9 = scmp.lt.u32.totalorder %s1809_s4, %s1997_s2 }
  0xc7   : > { %p1347_p0 = scmp.lt.u32.totalorder %s1345_s8, %s1340_s25  ;;  %p1349_p10 = scmp.lt.u32.totalorder %s1340_s25, %s1809_s4 }
  0xc8   : > { %p1343_p12 = pnand %p1341_p13, %p2053_p8 }
  0xc9   : > { %p1348_p2 = por %p1347_p0, %p1346_p9 }
  0xca   : > { %p1344_p3 = pneg %p1343_p12 }
  0xcb   : > { %p1350_p5 = por %p1349_p10, %p1348_p2 }
  0xcd   : > { %p1351_p7 = pnand %p1350_p5, %p1344_p3 }
  0xcf   : > { %1354 = shalt.err (!%p1351_p7)
}
  0xd0   : > { %s1355_s14 = scalar_lea.vmem %s376_s30, 16  ;;  %s1512_s21 = smov [#allocation7]  }
  0xd1   : > { %p1356_p6 = scmp.ne.s32.totalorder %s376_s30, %s1355_s14  ;;  %s1360_s22 = sshll.u32 %s1512_s21, 4  ;;  %s1361_s22 = int_to_ptr.vmem [resolvable:$false] %s1360_s22 }
  0xd2   : > { %s1362_s1 = scalar_lea.vmem %s1361_s22, 32  ;;  %p1363_p13 = scmp.lt.s32.totalorder %s376_s30, %s1361_s22 }
  0xd3   : > { %p1358_p4 = pnand %p1356_p6, %p2053_p8  ;;  %p1364_p12 = scmp.lt.s32.totalorder %s1362_s1, %s1355_s14 }
  0xd5   : > { %p1359_p1 = pneg %p1358_p4  ;;  %p1365_p11 = por %p1364_p12, %p1363_p13 }
  0xd7   : > { %p1366_p0 = pnand %p1365_p11, %p1359_p1 }
  0xd9   : > { %1369 = shalt.err (!%p1366_p0)
}
  0xda   : > { %p2055_p9 = scmp.ne.s32.totalorder %s2045_s20, 0  ;;  %s385_s23 = scalar_lea.vmem [#allocation8], %s1703_s16 }
  0xdb   : > { %s392_s24 = sshll.u32 %s385_s23, 4  ;;  %s2056_s29 = sand.u32 1, %s1502_s10   ;;  %s393_s24 = int_to_ptr.vmem [resolvable:$true] %s392_s24 }
  0xdc   : > { %1089 = dma.hbm_to_vmem [thread:$0]  (!%p2055_p9), %s1809_s4, 16, %s376_s30, %s1727_s12  }
  0xdd   : > { %s383_s25 = scalar_lea.sflag [#allocation9], %s2056_s29  ;;  %s1370_s26 = scalar_lea.hbm %s1838_s27, 16 }
  0xde   : > { %p1371_p11 = scmp.ne.s32.totalorder %s1838_s27, %s1370_s26  ;;  %s1375_s18 = scalar_lea.hbm %s1998_s3, 32 }
  0xdf   : > { %p1376_p10 = scmp.lt.u32.totalorder %s1838_s27, %s1998_s3  ;;  %p1377_p5 = scmp.lt.u32.totalorder %s1375_s18, %s1370_s26 }
  0xe0   : > { %p1373_p3 = pnand %p1371_p11, %p2053_p8  ;;  %p1379_p6 = scmp.lt.u32.totalorder %s1370_s26, %s1838_s27 }
  0xe1   : > { %p1378_p7 = por %p1377_p5, %p1376_p10 }
  0xe2   : > { %p1374_p2 = pneg %p1373_p3 }
  0xe3   : > { %p1380_p4 = por %p1379_p6, %p1378_p7 }
  0xe5   : > { %p1381_p1 = pnand %p1380_p4, %p1374_p2 }
  0xe7   : > { %1384 = shalt.err (!%p1381_p1)
}
  0xe8   : > { %s1385_s16 = scalar_lea.vmem %s393_s24, 16  ;;  %s1513_s12 = smov [#allocation8]  }
  0xe9   : > { %p1386_p13 = scmp.ne.s32.totalorder %s393_s24, %s1385_s16  ;;  %s1390_s4 = sshll.u32 %s1513_s12, 4  ;;  %s1391_s4 = int_to_ptr.vmem [resolvable:$false] %s1390_s4 }
  0xea   : > { %s1392_s30 = scalar_lea.vmem %s1391_s4, 32  ;;  %p1393_p11 = scmp.lt.s32.totalorder %s393_s24, %s1391_s4 }
  0xeb   : > { %p1388_p12 = pnand %p1386_p13, %p2053_p8  ;;  %p1394_p3 = scmp.lt.s32.totalorder %s1392_s30, %s1385_s16 }
  0xed   : > { %p1389_p0 = pneg %p1388_p12  ;;  %p1395_p9 = por %p1394_p3, %p1393_p11 }
  0xef   : > { %p1396_p5 = pnand %p1395_p9, %p1389_p0 }
  0xf1   : > { %1399 = shalt.err (!%p1396_p5)
}
  0xf2   : > { %p2057_p10 = scmp.ne.s32.totalorder %s2045_s20, 0  ;;  %p2058_p2 = scmp.ne.s32.totalorder %s2036_s15, 0 }
  0xf3   : > { %s1881_s5 = sand.u32 (!%p2058_p2), 1, %s1486_s28   ;;  %p2059_p8 = scmp.ne.s32.totalorder (!%p2058_p2), %s2033_s13, 0 }
  0xf4   : > { %1092 = dma.hbm_to_vmem [thread:$0]  (!%p2057_p10), %s1838_s27, 16, %s393_s24, %s383_s25  }
  0xf5   : > { %401 = sbr.rel (%p2058_p2) target bundleno = 1057 (0x421), region = 52  ;;  %s927_s21 = sshll.u32 (!%p2058_p2), %s1881_s5, 3 }
  0xf6   : > { %s404_s22 = scalar_lea.sflag (!%p2058_p2), [#allocation3], %s1881_s5  ;;  %s407_s1 = scalar_lea.vmem (!%p2058_p2), [#allocation2], %s927_s21 }
  0xfc   : > { %1453 = dma.done.wait (%p2059_p8), %s404_s22, 128  }
  0xfd   : > { %1455 = vsyncadd (%p2059_p8), %s404_s22, 4294967168  ;;  %s412_s15 = sand.u32 1, %s1594_s11   ;;  %s415_s27 = scalar_lea.vmem [#allocation5], %s1881_s5 }
  0xfe   : > { %s413_s20 = scalar_lea.sflag [#allocation6], %s412_s15 }
  0xff   : > { %1457 = dma.done.wait (%p2059_p8), %s413_s20, 32  }
 0x100   : > { %1459 = vsyncadd (%p2059_p8), %s413_s20, 4294967264  ;;  %s423_s23 = scalar_lea.vmem [#allocation7], %s1881_s5  ;;  %s429_s24 = scalar_lea.sflag [#allocation9], %s412_s15 }
 0x101   : > { %s431_s29 = scalar_lea.vmem [#allocation8], %s1881_s5 }
 0x102   : > { %1461 = dma.done.wait (%p2059_p8), %s429_s24, 16  }
 0x103   : > { %1463 = vsyncadd (%p2059_p8), %s429_s24, 4294967280  ;;  %p2060_p9 = scmp.eq.s32.totalorder %s1594_s11, 0 }
 0x105   : > { %1465 = dma.done.wait (%p2060_p9), [#allocation9], 512   ;;  %p2061_p7 = pmov %p2060_p9 }
 0x107   : > { %1467 = vsyncadd (%p2061_p7), [#allocation9], 4294966784  ;;  %p2062_p6 = pmov %p2061_p7 }
 0x109   : > { %1469 = dma.done.wait (%p2062_p6), [#allocation12], 2064   ;;  %p2063_p4 = pmov %p2062_p6 }
 0x10b   : > { %1471 = vsyncadd (%p2063_p4), [#allocation12], 4294965232  ;;  %p2064_p1 = pmov %p2063_p4 }
 0x10d   : > { %1473 = dma.done.wait (%p2064_p1), [#allocation15], 16   ;;  %p2065_p13 = pmov %p2064_p1 }
 0x10e   : > { %vm493_vm0 = vcmask 261120   ;;  %v1915_v0 = vld [vmem:[%s407_s1] sm:$0xff]  ;;  %v525_v7 = vld [vmem:[#allocation10] sm:$0xff]  ;;  %v1514_v10 = vmov 0.0|0.0   ;;  %vm1515_vm1 = vmmov 0   ;;  %v1516_v13 = vmov 0.0  }
 0x10f   : > { %1475 = vsyncadd (%p2065_p13), [#allocation15], 4294967280  ;;  %v494_v1 = vsel %vm493_vm0, %v1915_v0, 0.0  ;;  %v526_v8 = vld [vmem:[#allocation10 + $0x8] sm:$0xff]  ;;  %v527_v9 = vld [vmem:[#allocation10 + $0x10] sm:$0xff]  ;;  %1011 = vmatprep.subr.bf16.mxu0 %v1514_v10  ;;  %973 = vmatprep.mubr.msk.f32.mxu0 %vm1515_vm1, %v1516_v13  ;;  %v511_v20 = vlaneseq  ;;  %s2066_s11 = sld [smem:[#allocation26_spill]] }
 0x110   : > { %495 = vadd.xlane.f32.xlu0 %v494_v1  ;;  %v1012_v11 = vpack.c.bf16 %v526_v8, %v525_v7  ;;  %v528_v12 = vld [vmem:[#allocation10 + $0x18] sm:$0xff]  ;;  %1017 = vmatprep.subr.bf16.mxu1 %v1514_v10  ;;  %v618_v15 = vld [vmem:[#allocation13] sm:$0xff]  ;;  %v619_v16 = vld [vmem:[#allocation13 + $0x8] sm:$0xff]  ;;  %s2067_s13 = sld [smem:[#allocation29_spill]]  ;;  %s491_s26 = scalar_lea.vmem [#allocation16], %s927_s21 }
 0x111   : > { %1008 = vmatprep.mubr.msk.f32.mxu1 %vm1515_vm1, %v1516_v13  ;;  %v1015_v14 = vpack.c.bf16 %v528_v12, %v527_v9  ;;  %v1018_v17 = vpack.c.bf16 %v619_v16, %v618_v15  ;;  %v512_v22 = vshrl.u32 %v511_v20, 7  ;;  %v508_v23 = vld [vmem:[%s423_s23] sm:$0x1]  ;;  %v620_v32 = vld [vmem:[#allocation13 + $0x10] sm:$0xff]  ;;  %v621_v33 = vld [vmem:[#allocation13 + $0x18] sm:$0xff]  ;;  %s736_s17 = sshll.u32 %s491_s26, 4  ;;  %s1947_s17 = int_to_ptr.vmem [resolvable:$true] %s736_s17 }
 0x112   : > { %1013 = vmatpush3.bf16.msra.mxu0 %v1012_v11  ;;  %v509_v24 = vadd.f32 1.0, %v508_v23  ;;  %v933_v29 = vld [vmem:[%s415_s27] ss:$0 sm:$0xff]  ;;  %v1021_v34 = vpack.c.bf16 %v621_v33, %v620_v32  ;;  %v622_v35 = vld [vmem:[#allocation13 + $0x20] sm:$0xff]  ;;  %v624_v38 = vld [vmem:[#allocation13 + $0x30] sm:$0xff]  ;;  %s2068_s19 = sld [smem:[#allocation34_spill]] }
 0x113   : > { %1014 = vmatprep.subr.bf16.mxu0 %v1514_v10  ;;  %1019 = vmatpush3.bf16.msra.mxu1 %v1018_v17  ;;  %v513_v25 = vsub.s32 0, %v512_v22  ;;  %v623_v36 = vld [vmem:[#allocation13 + $0x28] sm:$0xff]  ;;  %v625_v39 = vld [vmem:[#allocation13 + $0x38] sm:$0xff]  ;;  %v626_v41 = vld [vmem:[#allocation13 + $0x40] sm:$0xff]  ;;  %s722_s16 = scalar_lea.sflag [#allocation4], %s1881_s5  ;;  %s1400_s12 = scalar_lea.vmem %s1947_s17, 128 }
 0x114   : > { %1020 = vmatprep.subr.bf16.mxu1 %v1514_v10  ;;  %v1024_v37 = vpack.c.bf16 %v623_v36, %v622_v35  ;;  %v1027_v40 = vpack.c.bf16 %v625_v39, %v624_v38  ;;  %v627_v42 = vld [vmem:[#allocation13 + $0x48] sm:$0xff]  ;;  %v628_v44 = vld [vmem:[#allocation13 + $0x50] sm:$0xff]  ;;  %v629_v45 = vld [vmem:[#allocation13 + $0x58] sm:$0xff]  ;;  %p1401_p12 = scmp.ne.s32.totalorder %s1947_s17, %s1400_s12  ;;  %s1517_s4 = smov [#allocation16]  }
 0x115   : > { %v514_v26 = vrot.slane %v509_v24, %v513_v25  ;;  %v1030_v43 = vpack.c.bf16 %v627_v42, %v626_v41  ;;  %v1033_v46 = vpack.c.bf16 %v629_v45, %v628_v44  ;;  %v630_v47 = vld [vmem:[#allocation13 + $0x60] sm:$0xff]  ;;  %v631_v48 = vld [vmem:[#allocation13 + $0x68] sm:$0xff]  ;;  %v632_v50 = vld [vmem:[#allocation13 + $0x70] sm:$0xff]  ;;  %s939_s25 = sshll.u32 %s2066_s11, 7  ;;  %s1404_s30 = sshll.u32 %s1517_s4, 4  ;;  %s1405_s30 = int_to_ptr.vmem [resolvable:$false] %s1404_s30 }
 0x116   : > { %1016 = vmatpush3.bf16.msra.mxu0 %v1015_v14  ;;  %v1036_v49 = vpack.c.bf16 %v631_v48, %v630_v47  ;;  %v633_v51 = vld [vmem:[#allocation13 + $0x78] sm:$0xff]  ;;  %p2069_p0 = scmp.ne.s32.totalorder %s2067_s13, 0  ;;  %s1406_s21 = scalar_lea.vmem %s1405_s30, 256 }
 0x117   : > { %1022 = vmatpush3.bf16.msra.mxu1 %v1021_v34  ;;  %v1039_v52 = vpack.c.bf16 %v633_v51, %v632_v50  ;;  %v934_v53 = vld [vmem:[#allocation11] ss:$0 sm:$0xff]  ;;  %p1407_p5 = scmp.lt.s32.totalorder %s1947_s17, %s1405_s30  ;;  %p1408_p10 = scmp.lt.s32.totalorder %s1406_s21, %s1400_s12 }
 0x118   : > { %1023 = vmatprep.subr.bf16.mxu1 %v1514_v10  ;;  %s1945_s14 = scalar_lea.hbm %s2068_s19, %s939_s25  ;;  %p1402_p11 = pnand %p1401_p12, %p2069_p0 }
 0x119   : > { %p1409_p2 = por %p1408_p10, %p1407_p5 }
 0x11a   : > { %p1403_p3 = pneg %p1402_p11 }
 0x11b   : > { %1025 = vmatpush3.bf16.msra.mxu1 %v1024_v37 }
 0x11c   : > { %1026 = vmatprep.subr.bf16.mxu1 %v1514_v10  ;;  %p1410_p8 = pnand %p1409_p2, %p1403_p3 }
 0x11f   : > { %1028 = vmatpush3.bf16.msra.mxu1 %v1027_v40 }
 0x120   : > { %1029 = vmatprep.subr.bf16.mxu1 %v1514_v10 }
 0x123   : > { %1031 = vmatpush3.bf16.msra.mxu1 %v1030_v43 }
 0x124   : > { %1032 = vmatprep.subr.bf16.mxu1 %v1514_v10 }
 0x127   : > { %1034 = vmatpush3.bf16.msra.mxu1 %v1033_v46 }
 0x128   : > { %1035 = vmatprep.subr.bf16.mxu1 %v1514_v10 }
 0x12b   : > { %1037 = vmatpush3.bf16.msra.mxu1 %v1036_v49 }
 0x12c   : > { %1038 = vmatprep.subr.bf16.mxu1 %v1514_v10 }
 0x12f   : > { %1040 = vmatpush3.bf16.msra.mxu1 %v1039_v52 }
 0x19d   : > { %v496_v2 = vpop.xlane.xlu0 %495 }
 0x19e   : > { %v498_v3 = vmul.f32 0.03125, %v496_v2 }
 0x1a0   : > { %v499_v4 = vsub.f32 %v1915_v0, %v498_v3  ;;  %v936_v3 = vld [vmem:[#allocation14] ss:$0 sm:$0xff] }
 0x1a2   : > { %v500_v5 = vmul.f32 %v499_v4, %v499_v4 }
 0x1a4   : > { %v501_v6 = vsel %vm493_vm0, %v500_v5, 0.0  ;;  %v937_v5 = vld [vmem:[%s431_s29] ss:$0 sm:$0xff] }
 0x1a5   : > { %502 = vadd.xlane.f32.xlu0 %v501_v6 }
 0x232   : > { %v503_v18 = vpop.xlane.xlu0 %502 }
 0x233   : > { %v504_v19 = vmul.f32 0.03125, %v503_v18 }
 0x235   : > { %v505_v21 = vadd.f32 1e-06, %v504_v19 }
 0x237   : > { %1164 = vrsqrt.f32 %v505_v21 }
 0x241   : > { %v1165_v27 = vpop.eup %1164 }
 0x242   : > { %v507_v28 = vmul.f32 %v1165_v27, %v499_v4 }
 0x244   : > { %v516_v30 = vmul.f32 %v514_v26, %v507_v28 }
 0x246   : > { %v524_v31 = vadd.f32 %v933_v29, %v516_v30 }
 0x248   : > { %974 = vmatmul.mubr.msk.f32.vlgmr.msra.gmra.mrb[0].mxu0 %vm493_vm0, %v524_v31 }
 0x31b   : > { %v605_v54 = vpop.f32.mrb[0].mxu0 }
 0x31c   : > { %v606_v55 = vadd.f32 %v934_v53, %v605_v54  ;;  %v975_v56 = vpop.f32.mrb[1].mxu0 }
 0x31e   : > { %v609_v57 = vmul.f32 %v606_v55, %v606_v55 }
 0x320   : > { %v610_v58 = vmul.f32 %v609_v57, %v606_v55 }
 0x322   : > { %v611_v59 = vmul.f32 0.044715, %v610_v58 }
 0x324   : > { %v612_v60 = vadd.f32 %v611_v59, %v606_v55 }
 0x326   : > { %v613_v61 = vmul.f32 0.7978846, %v612_v60 }
 0x328   : > { %1166 = vtanh.f32 %v613_v61 }
 0x332   : > { %v1167_v62 = vpop.eup %1166 }
 0x333   : > { %v615_v63 = vadd.f32 1.0, %v1167_v62 }
 0x335   : > { %v616_v1 = vmul.f32 0.5, %v615_v63 }
 0x337   : > { %v617_v2 = vmul.f32 %v616_v1, %v606_v55 }
 0x339   : > { %1009 = vmatmul.mubr.f32.vlgmr.msra.gmra.mrb[0].mxu1 %v617_v2 }
 0x40c   : > { %v707_v4 = vpop.f32.mrb[0].mxu1 }
 0x40d   : > { %v708_v6 = vadd.f32 %v936_v3, %v707_v4  ;;  %v1010_v7 = vpop.f32.mrb[1].mxu1 }
 0x40f   : > { %v718_v8 = vmul.f32 %v937_v5, %v708_v6 }
 0x411   : > { %v719_v9 = vadd.f32 %v718_v8, %v1915_v0 }
 0x413   : > { %720 = vst.msk [vmem:[%s491_s26] sm:$0xff] %vm493_vm0, %v719_v9 }
 0x414   : > { %1413 = shalt.err (!%p1410_p8)
}
 0x415   : > { %s1414_s5 = scalar_lea.hbm %s1945_s14, 128  ;;  %s1418_s15 = scalar_lea.hbm %s2068_s19, 256 }
 0x416   : > { %p1415_p9 = scmp.ne.s32.totalorder %s1945_s14, %s1414_s5  ;;  %p1419_p4 = scmp.lt.u32.totalorder %s1945_s14, %s2068_s19 }
 0x417   : > { %p1420_p1 = scmp.lt.u32.totalorder %s1418_s15, %s1414_s5  ;;  %p1422_p12 = scmp.lt.u32.totalorder %s1414_s5, %s1945_s14 }
 0x418   : > { %p1416_p7 = pnand %p1415_p9, %p2069_p0 }
 0x419   : > { %p1421_p13 = por %p1420_p1, %p1419_p4 }
 0x41a   : > { %p1417_p6 = pneg %p1416_p7 }
 0x41b   : > { %p1423_p11 = por %p1422_p12, %p1421_p13 }
 0x41d   : > { %p1424_p3 = pnand %p1423_p11, %p1417_p6 }
 0x41f   : > { %1427 = shalt.err (!%p1424_p3)
}
 0x420   : > { %1065 = dma.vmem_to_hbm [thread:$0]  (%p2069_p0), %s1947_s17, 128, %s1945_s14, %s722_s16  }
 0x421 PF: > { %s2070_s23 = sld [smem:[#allocation24_spill]]  ;;  %s2071_s24 = sld [smem:[#allocation27_spill]] }
 0x422   : > { %p2073_p10 = scmp.ge.s32.totalorder %s1502_s10, 2 }
 0x427   : > { %s748_s29 = sand.u32 1, %s2070_s23   ;;  %p2072_p5 = scmp.ne.s32.totalorder %s2071_s24, 0 }
 0x428   : > { %s749_s11 = scalar_lea.sflag [#allocation4], %s748_s29 }
 0x429   : > { %p1094_p2 = pnand %p2073_p10, %p2072_p5 }
 0x42b   : > { %1477 = dma.done.wait (!%p1094_p2), %s749_s11, 128  }
 0x42c   : > { %1479 = vsyncadd (!%p1094_p2), %s749_s11, 4294967168  ;;  %s32_s10 = sadd.s32 1, %s1502_s10   ;;  %s2074_s25 = sld [smem:[#allocation25_spill]] }
 0x42d   : > { %p29_p8 = scmp.ge.s32.totalorder %s32_s10, 4   ;;  %s2075_s29 = sld [smem:[#allocation30_spill]] }
 0x42e   : > { %s2076_s13 = sld [smem:[#allocation28_spill]]  ;;  %s2077_s27 = smov %s1486_s28 }
 0x42f   : > { %s2079_s30 = smov %s1498_s9  ;;  %31 = sbr.rel (!%p29_p8) target bundleno = 17 (0x11), region = 150 }
 0x432   : > { %s2078_s28 = smov %s2074_s25 }
 0x434   : > { %s2080_s9 = smov %s2076_s13 }
 0x436   :  { %754 = vsyncpa [#allocation3], 1 }
 0x437   :  { %756 = vsyncpa [#allocation3 + $0x1], 1 }
 0x438   :  { %757 = vsyncpa [#allocation6], 1 }
 0x439   :  { %759 = vsyncpa [#allocation6 + $0x1], 1 }
 0x43a   :  { %760 = vsyncpa [#allocation9], 1 }
 0x43b   :  { %762 = vsyncpa [#allocation9 + $0x1], 1 }
 0x43c   :  { %763 = vsyncpa [#allocation12], 1 }
 0x43d   :  { %764 = vsyncpa [#allocation15], 1 }
 0x43e   :  { %765 = vsyncpa [#allocation4], 1 }
 0x43f   :  { %767 = vsyncpa [#allocation4 + $0x1], 1 }

// kernel: cond_dit_block.5
= control target key start
LH: loop header
LB: loop body
LE: loop exit
PB: predicated region body
PF: predicated region fallthrough
CT: control target
= control target key end

     0   :  { %s1994_s0 = inlined_call_operand.hbm [shape: f32[2,16,32], index: 0, kind: input, shape index: {}]   ;;  %s1995_s1 = inlined_call_operand.hbm [shape: f32[2,1,32], index: 1, kind: input, shape index: {}]   ;;  %s1996_s2 = inlined_call_operand.hbm [shape: f32[2,1,32], index: 2, kind: input, shape index: {}]   ;;  %s1997_s3 = inlined_call_operand.hbm [shape: f32[2,1,32], index: 3, kind: input, shape index: {}]   ;;  %s1998_s4 = inlined_call_operand.hbm [shape: f32[32,128], index: 4, kind: input, shape index: {}]   ;;  %s1999_s5 = inlined_call_operand.hbm [shape: f32[1,128], index: 5, kind: input, shape index: {}]   ;;  %s2000_s6 = inlined_call_operand.hbm [shape: f32[128,32], index: 6, kind: input, shape index: {}]   ;;  %s2001_s7 = inlined_call_operand.hbm [shape: f32[1,32], index: 7, kind: input, shape index: {}]   ;;  %s2002_s8 = inlined_call_operand.hbm [shape: f32[2,8,32], index: 8, kind: output, shape index: {}]  }
   0x1   :  { %2025 = sst [smem:[#allocation31_spill]] %s1995_s1 }
   0x2   :  { %2026 = sst [smem:[#allocation32_spill]] %s1998_s4 }
   0x3   :  { %2027 = sst [smem:[#allocation33_spill]] %s1999_s5 }
   0x4   :  { %2028 = sst [smem:[#allocation34_spill]] %s2002_s8 }
   0x5   :  { %13 = vsyncpa [#allocation3], 0 }
   0x6   :  { %15 = vsyncpa [#allocation3 + $0x1], 0 }
   0x7   :  { %16 = vsyncpa [#allocation6], 0 }
   0x8   :  { %18 = vsyncpa [#allocation6 + $0x1], 0 }
   0x9   :  { %19 = vsyncpa [#allocation9], 0 }
   0xa   :  { %21 = vsyncpa [#allocation9 + $0x1], 0 }
   0xb   :  { %22 = vsyncpa [#allocation12], 0 }
   0xc   :  { %23 = vsyncpa [#allocation15], 0 }
   0xd   :  { %24 = vsyncpa [#allocation4], 0 }
   0xe   :  { %26 = vsyncpa [#allocation4 + $0x1], 0  ;;  %s1569_s27 = smov 0   ;;  %s1571_s28 = smov 0  }
   0xf   :  { %s1573_s29 = smov 0   ;;  %s1575_s30 = smov 0  }
  0x10   :  { %s1577_s9 = smov 0   ;;  %s1579_s10 = smov 0  }
  0x11 LB: > { %2029 = sst [smem:[#allocation24_spill]] %s1488_s27  ;;  %s1600_s11 = sadd.s32 4294967295, %s1508_s10   ;;  %s1508_s10 = sphi %s1579_s10, %s32_s10   ;;  %s1504_s9 = sphi %s1577_s9, %s2079_s9   ;;  %s1500_s30 = sphi %s1575_s30, %s2078_s30   ;;  %s1496_s29 = sphi %s1573_s29, %s2074_s29   ;;  %s1492_s28 = sphi %s1571_s28, %s2077_s28   ;;  %s1488_s27 = sphi %s1569_s27, %s2076_s27  }
  0x12   : > { %2030 = sst [smem:[#allocation25_spill]] %s1496_s29  ;;  %s918_s12 = sadd.s32 4294967294, %s1508_s10  }
  0x13   : > { %2031 = sst [smem:[#allocation26_spill]] %s1500_s30  ;;  %p68_p0 = scmp.ne.s32.totalorder %s1492_s28, %s1488_s27 }
  0x14   : > { %p2003_p1 = scmp.eq.s32.totalorder %s1600_s11, 0  ;;  %p262_p3 = scmp.eq.s32.totalorder %s918_s12, 1 }
  0x15   : > { %p919_p5 = scmp.ge.s32.totalorder %s1508_s10, 1  ;;  %p269_p7 = scmp.lt.s32.totalorder %s1508_s10, 3 }
  0x16   : > { %p1609_p4 = por %p2003_p1, %p68_p0  ;;  %p1614_p6 = por %p262_p3, %p68_p0 }
  0x17   : > { %p1619_p8 = pnand %p919_p5, %p269_p7  ;;  %s1510_s16 = smov [#allocation10]  }
  0x18   : > { %s2032_s13 = scalar_select %p1609_p4, 1, 0 }
  0x19   : > { %s2033_s14 = scalar_select %p1614_p6, 1, 0 }
  0x1a   : > { %s2035_s15 = scalar_select %p1619_p8, 1, 0 }
  0x1b   : > { %2034 = sst [smem:[#allocation27_spill]] %s2033_s14  ;;  %s281_s17 = sshll.u32 %s1510_s16, 4  ;;  %s1623_s17 = int_to_ptr.vmem [resolvable:$true] %s281_s17 }
  0x1c   : > { %p1072_p9 = pneg %p1619_p8  ;;  %s1511_s19 = smov [#allocation11]  }
  0x1d   : > { %s295_s20 = sshll.u32 %s1511_s19, 4  ;;  %s2037_s4 = sld [smem:[#allocation32_spill]]  ;;  %s1634_s20 = int_to_ptr.vmem [resolvable:$true] %s295_s20 }
  0x1e   : > { %p1630_p11 = pnand %p1072_p9, %p2003_p1 }
  0x20   : > { %s2036_s18 = scalar_select %p1630_p11, 1, 0 }
  0x21   : > { %p1644_p13 = pneg %p1630_p11 }
  0x23   : > { %s1173_s23 = scalar_lea.hbm %s2037_s4, 512 }
  0x24   : > { %p1174_p12 = scmp.ne.s32.totalorder %s2037_s4, %s1173_s23  ;;  %p1180_p5 = scmp.lt.u32.totalorder %s1173_s23, %s2037_s4 }
  0x25   : > { %s2038_s26 = scalar_select %p1644_p13, 1, 0 }
  0x26   : > { %p1176_p0 = pnand %p1644_p13, %p1174_p12 }
  0x28   : > { %p1177_p3 = pneg %p1176_p0 }
  0x2a   : > { %p1182_p7 = pnand %p1180_p5, %p1177_p3 }
  0x2c   : > { %1185 = shalt.err (!%p1182_p7)
}
  0x2d   : > { %s1186_s19 = scalar_lea.vmem %s1623_s17, 512  ;;  %p1194_p2 = scmp.lt.s32.totalorder %s1623_s17, %s1623_s17 }
  0x2e   : > { %p1187_p9 = scmp.ne.s32.totalorder %s1623_s17, %s1186_s19  ;;  %p1195_p6 = scmp.lt.s32.totalorder %s1186_s19, %s1186_s19 }
  0x30   : > { %p1189_p10 = pnand %p1187_p9, %p1644_p13  ;;  %p1196_p12 = por %p1195_p6, %p1194_p2 }
  0x32   : > { %p1190_p1 = pneg %p1189_p10 }
  0x34   : > { %p1197_p0 = pnand %p1196_p12, %p1190_p1 }
  0x36   : > { %1200 = shalt.err (!%p1197_p0)
}
  0x37   : > { %s2007_s21 = smov 128   ;;  %s2008_s22 = smov 8  }
  0x38   : > { %1075 = dma.hbm_to_vmem [thread:$0]  (!%p1630_p11), %s2037_s4, 512, %s1623_s17, [#allocation9], %s2007_s21, %s2007_s21, %s2008_s22  }
  0x39   : > { %s2039_s5 = sld [smem:[#allocation33_spill]] }
  0x3f   : > { %s1201_s16 = scalar_lea.hbm %s2039_s5, 16 }
  0x40   : > { %p1202_p1 = scmp.ne.s32.totalorder %s2039_s5, %s1201_s16  ;;  %p1208_p10 = scmp.lt.u32.totalorder %s1201_s16, %s2039_s5 }
  0x42   : > { %p1204_p2 = pnand %p1202_p1, %p1644_p13 }
  0x44   : > { %p1205_p6 = pneg %p1204_p2 }
  0x46   : > { %p1210_p3 = pnand %p1208_p10, %p1205_p6 }
  0x48   : > { %1213 = shalt.err (!%p1210_p3)
}
  0x49   : > { %s1214_s17 = scalar_lea.vmem %s1634_s20, 16  ;;  %s1221_s14 = scalar_lea.vmem %s1634_s20, 32 }
  0x4a   : > { %p1215_p5 = scmp.ne.s32.totalorder %s1634_s20, %s1214_s17  ;;  %p1222_p12 = scmp.lt.s32.totalorder %s1634_s20, %s1634_s20 }
  0x4b   : > { %p1223_p0 = scmp.lt.s32.totalorder %s1221_s14, %s1214_s17 }
  0x4c   : > { %p1217_p7 = pnand %p1215_p5, %p1644_p13 }
  0x4d   : > { %p1224_p1 = por %p1223_p0, %p1222_p12 }
  0x4e   : > { %p1218_p9 = pneg %p1217_p7 }
  0x50   : > { %p1225_p2 = pnand %p1224_p1, %p1218_p9 }
  0x52   : > { %1228 = shalt.err (!%p1225_p2)
}
  0x53   : > { %1078 = dma.hbm_to_vmem [thread:$0]  (!%p1630_p11), %s2039_s5, 16, %s1634_s20, [#allocation12]  }
  0x54   : > { %s44_s23 = sadd.s32 1, %s1504_s9  ;;  %s55_s24 = sadd.s32 1, %s1496_s29 }
  0x55   : > { %p46_p6 = scmp.ge.s32.totalorder %s44_s23, 2  ;;  %p62_p10 = scmp.ne.s32.totalorder %s1496_s29, %s1492_s28 }
  0x56   : > { %p63_p3 = scmp.eq.s32.totalorder %s1508_s10, 0  ;;  %p1106_p5 = scmp.lt.s32.totalorder %s1508_s10, 2 }
  0x57   : > { %s2081_s23 = smov (%p46_p6, %s44_s23), 0  ;;  %p2041_p9 = scmp.eq.s32.totalorder %s1600_s11, 1 }
  0x58   : > { %2040 = sst [smem:[#allocation28_spill]] %s2081_s23  ;;  %p64_p7 = por %p63_p3, %p62_p10 }
  0x59   : > { %p1702_p12 = por %p2041_p9, %p62_p10  ;;  %s50_s12 = ssub.s32 %s1504_s9, %s2081_s23 }
  0x5a   : > { %s1709_s16 = sand.u32 1, %s1496_s29   ;;  %p53_p0 = scmp.eq.s32.totalorder %s50_s12, 0 }
  0x5b   : > { %s2042_s25 = scalar_select %p1702_p12, 1, 0 }
  0x5c   : > { %p1711_p1 = pnand %p1106_p5, %p64_p7  ;;  %s2012_s19 = sand.u32 1, %s1508_s10  }
  0x5d   : > { %2043 = sst [smem:[#allocation29_spill]] %s2042_s25  ;;  %s1720_s14 = sshll.u32 %s1504_s9, 4 }
  0x5e   : > { %s2044_s20 = scalar_select %p1711_p1, 1, 0 }
  0x5f   : > { %s1717_s17 = scalar_select %p53_p0, %s1496_s29, %s55_s24  }
  0x60   : > { %s354_s8 = scalar_lea.vmem [#allocation5], %s1709_s16  ;;  %s2046_s1 = sld [smem:[#allocation31_spill]] }
  0x61   : > { %2045 = sst [smem:[#allocation30_spill]] %s1717_s17  ;;  %s361_s27 = sshll.u32 %s354_s8, 4  ;;  %s1729_s27 = int_to_ptr.vmem [resolvable:$true] %s361_s27 }
  0x62   : > { %s1733_s12 = scalar_lea.sflag [#allocation6], %s2012_s19  ;;  %p1739_p6 = pneg %p1711_p1 }
  0x64   : > { %s2047_s5 = scalar_select %p1739_p6, 1, 0 }
  0x66   : > { %s1727_s4 = scalar_lea.hbm %s2046_s1, %s1720_s14  ;;  %s1234_s8 = scalar_lea.hbm %s2046_s1, 32 }
  0x67   : > { %s1229_s24 = scalar_lea.hbm %s1727_s4, 16  ;;  %p1235_p5 = scmp.lt.u32.totalorder %s1727_s4, %s2046_s1 }
  0x68   : > { %p1230_p2 = scmp.ne.s32.totalorder %s1727_s4, %s1229_s24  ;;  %p1236_p7 = scmp.lt.u32.totalorder %s1234_s8, %s1229_s24 }
  0x69   : > { %p1238_p0 = scmp.lt.u32.totalorder %s1229_s24, %s1727_s4 }
  0x6a   : > { %p1232_p10 = pnand %p1739_p6, %p1230_p2  ;;  %p1237_p9 = por %p1236_p7, %p1235_p5 }
  0x6c   : > { %p1233_p3 = pneg %p1232_p10  ;;  %p1239_p12 = por %p1238_p0, %p1237_p9 }
  0x6e   : > { %p1240_p4 = pnand %p1239_p12, %p1233_p3 }
  0x70   : > { %1243 = shalt.err (!%p1240_p4)
}
  0x71   : > { %s1244_s19 = scalar_lea.vmem %s1729_s27, 16  ;;  %s1514_s21 = smov [#allocation5]  }
  0x72   : > { %p1245_p2 = scmp.ne.s32.totalorder %s1729_s27, %s1244_s19  ;;  %s1249_s22 = sshll.u32 %s1514_s21, 4  ;;  %s1250_s22 = int_to_ptr.vmem [resolvable:$false] %s1249_s22 }
  0x73   : > { %s1251_s23 = scalar_lea.vmem %s1250_s22, 32  ;;  %p1252_p11 = scmp.lt.s32.totalorder %s1729_s27, %s1250_s22 }
  0x74   : > { %p1247_p10 = pnand %p1245_p2, %p1739_p6  ;;  %p1253_p13 = scmp.lt.s32.totalorder %s1251_s23, %s1244_s19 }
  0x76   : > { %p1248_p8 = pneg %p1247_p10  ;;  %p1254_p5 = por %p1253_p13, %p1252_p11 }
  0x78   : > { %p1255_p7 = pnand %p1254_p5, %p1248_p8 }
  0x7a   : > { %1258 = shalt.err (!%p1255_p7)
}
  0x7b   : > { %1091 = dma.hbm_to_vmem [thread:$0]  (!%p1711_p1), %s1727_s4, 16, %s1729_s27, %s1733_s12  }
  0x7c   : > { %s1515_s17 = smov [#allocation13]   ;;  %s1516_s8 = smov [#allocation14]  }
  0x7d   : > { %s305_s24 = sshll.u32 %s1515_s17, 4  ;;  %s319_s1 = sshll.u32 %s1516_s8, 4  ;;  %s306_s24 = int_to_ptr.vmem [resolvable:$true] %s305_s24  ;;  %s320_s1 = int_to_ptr.vmem [resolvable:$true] %s319_s1 }
  0x7e   : > { %s1259_s22 = scalar_lea.hbm %s2000_s6, 2048  ;;  %p2048_p8 = scmp.ne.s32.totalorder %s2038_s26, 0 }
  0x7f   : > { %p1260_p4 = scmp.ne.s32.totalorder %s2000_s6, %s1259_s22  ;;  %p1266_p12 = scmp.lt.u32.totalorder %s1259_s22, %s2000_s6 }
  0x81   : > { %p1262_p11 = pnand %p1260_p4, %p2048_p8 }
  0x83   : > { %p1263_p13 = pneg %p1262_p11 }
  0x85   : > { %p1268_p3 = pnand %p1266_p12, %p1263_p13 }
  0x87   : > { %1271 = shalt.err (!%p1268_p3)
}
  0x88   : > { %s1272_s4 = scalar_lea.vmem %s306_s24, 2048  ;;  %p1280_p10 = scmp.lt.s32.totalorder %s306_s24, %s306_s24 }
  0x89   : > { %p1273_p9 = scmp.ne.s32.totalorder %s306_s24, %s1272_s4  ;;  %p1281_p5 = scmp.lt.s32.totalorder %s1272_s4, %s1272_s4 }
  0x8b   : > { %p1275_p0 = pnand %p1273_p9, %p2048_p8  ;;  %p1282_p7 = por %p1281_p5, %p1280_p10 }
  0x8d   : > { %p1276_p2 = pneg %p1275_p0 }
  0x8f   : > { %p1283_p1 = pnand %p1282_p7, %p1276_p2 }
  0x91   : > { %1286 = shalt.err (!%p1283_p1)
}
  0x92   : > { %p2049_p4 = scmp.ne.s32.totalorder %s2036_s18, 0  ;;  %s2050_s29 = smov 8  }
  0x93   : > { %s2051_s27 = smov 128   ;;  %s1287_s21 = scalar_lea.hbm %s2001_s7, 16 }
  0x94   : > { %1081 = dma.hbm_to_vmem [thread:$0]  (!%p2049_p4), %s2000_s6, 2048, %s306_s24, [#allocation12], %s2051_s27, %s2051_s27, %s2050_s29  }
  0x95   : > { %p1288_p11 = scmp.ne.s32.totalorder %s2001_s7, %s1287_s21  ;;  %p1294_p12 = scmp.lt.u32.totalorder %s1287_s21, %s2001_s7 }
  0x97   : > { %p1290_p1 = pnand %p1288_p11, %p2048_p8 }
  0x99   : > { %p1291_p13 = pneg %p1290_p1 }
  0x9b   : > { %p1296_p3 = pnand %p1294_p12, %p1291_p13 }
  0x9d   : > { %1299 = shalt.err (!%p1296_p3)
}
  0x9e   : > { %s1300_s30 = scalar_lea.vmem %s320_s1, 16  ;;  %s1307_s24 = scalar_lea.vmem %s320_s1, 32 }
  0x9f   : > { %p1301_p9 = scmp.ne.s32.totalorder %s320_s1, %s1300_s30  ;;  %p1308_p10 = scmp.lt.s32.totalorder %s320_s1, %s320_s1 }
  0xa0   : > { %p1309_p5 = scmp.lt.s32.totalorder %s1307_s24, %s1300_s30 }
  0xa1   : > { %p1303_p0 = pnand %p1301_p9, %p2048_p8 }
  0xa2   : > { %p1310_p7 = por %p1309_p5, %p1308_p10 }
  0xa3   : > { %p1304_p2 = pneg %p1303_p0 }
  0xa5   : > { %p1311_p6 = pnand %p1310_p7, %p1304_p2 }
  0xa7   : > { %1314 = shalt.err (!%p1311_p6)
}
  0xa8   : > { %1084 = dma.hbm_to_vmem [thread:$0]  (!%p2049_p4), %s2001_s7, 16, %s320_s1, [#allocation15]  }
  0xa9   : > { %s925_s25 = sshll.u32 %s1709_s16, 3  ;;  %s947_s26 = sshll.u32 %s1504_s9, 8 }
  0xaa   : > { %s778_s21 = scalar_lea.hbm %s1994_s0, %s947_s26  ;;  %s334_s18 = scalar_lea.vmem [#allocation2], %s925_s25 }
  0xab   : > { %s1807_s22 = scalar_lea.hbm %s778_s21, 128  ;;  %s344_s19 = sshll.u32 %s334_s18, 4  ;;  %s345_s19 = int_to_ptr.vmem [resolvable:$true] %s344_s19 }
  0xac   : > { %s331_s23 = scalar_lea.sflag [#allocation3], %s1709_s16  ;;  %s1345_s4 = scalar_lea.hbm %s778_s21, 256 }
  0xad   : > { %p1316_p6 = scmp.ne.s32.totalorder %s1807_s22, %s1345_s4  ;;  %p2052_p8 = scmp.ne.s32.totalorder %s2047_s5, 0 }
  0xae   : > { %s1320_s24 = scalar_lea.hbm %s1994_s0, 512  ;;  %p1321_p1 = scmp.lt.u32.totalorder %s1807_s22, %s1994_s0 }
  0xaf   : > { %p1318_p11 = pnand %p1316_p6, %p2052_p8  ;;  %p1322_p13 = scmp.lt.u32.totalorder %s1320_s24, %s1345_s4 }
  0xb0   : > { %p1324_p3 = scmp.lt.u32.totalorder %s1345_s4, %s1807_s22 }
  0xb1   : > { %p1319_p4 = pneg %p1318_p11  ;;  %p1323_p12 = por %p1322_p13, %p1321_p1 }
  0xb3   : > { %p1325_p9 = por %p1324_p3, %p1323_p12 }
  0xb5   : > { %p1326_p0 = pnand %p1325_p9, %p1319_p4 }
  0xb7   : > { %1329 = shalt.err (!%p1326_p0)
}
  0xb8   : > { %s1330_s25 = scalar_lea.vmem %s345_s19, 128  ;;  %s1517_s26 = smov [#allocation2]  }
  0xb9   : > { %p1331_p2 = scmp.ne.s32.totalorder %s345_s19, %s1330_s25  ;;  %s1335_s17 = sshll.u32 %s1517_s26, 4  ;;  %s1336_s17 = int_to_ptr.vmem [resolvable:$false] %s1335_s17 }
  0xba   : > { %s1337_s8 = scalar_lea.vmem %s1336_s17, 256  ;;  %p1338_p7 = scmp.lt.s32.totalorder %s345_s19, %s1336_s17 }
  0xbb   : > { %p1333_p10 = pnand %p1331_p2, %p2052_p8  ;;  %p1339_p6 = scmp.lt.s32.totalorder %s1337_s8, %s1330_s25 }
  0xbd   : > { %p1334_p5 = pneg %p1333_p10  ;;  %p1340_p11 = por %p1339_p6, %p1338_p7 }
  0xbf   : > { %p1341_p1 = pnand %p1340_p11, %p1334_p5 }
  0xc1   : > { %1344 = shalt.err (!%p1341_p1)
}
  0xc2   : > { %p2053_p13 = scmp.ne.s32.totalorder %s2044_s20, 0  ;;  %s1830_s4 = scalar_lea.hbm %s1996_s2, %s1720_s14 }
  0xc3   : > { %s371_s1 = scalar_lea.vmem [#allocation7], %s1709_s16  ;;  %s1346_s24 = scalar_lea.hbm %s1830_s4, 16 }
  0xc4   : > { %1088 = dma.hbm_to_vmem [thread:$0]  (!%p2053_p13), %s1807_s22, 128, %s345_s19, %s331_s23  }
  0xc5   : > { %s378_s30 = sshll.u32 %s371_s1, 4  ;;  %p1347_p4 = scmp.ne.s32.totalorder %s1830_s4, %s1346_s24  ;;  %s379_s30 = int_to_ptr.vmem [resolvable:$true] %s378_s30 }
  0xc6   : > { %s1351_s22 = scalar_lea.hbm %s1996_s2, 32  ;;  %p1352_p9 = scmp.lt.u32.totalorder %s1830_s4, %s1996_s2 }
  0xc7   : > { %p1349_p12 = pnand %p1347_p4, %p2052_p8  ;;  %p1353_p0 = scmp.lt.u32.totalorder %s1351_s22, %s1346_s24 }
  0xc8   : > { %p1355_p10 = scmp.lt.u32.totalorder %s1346_s24, %s1830_s4 }
  0xc9   : > { %p1350_p3 = pneg %p1349_p12  ;;  %p1354_p2 = por %p1353_p0, %p1352_p9 }
  0xcb   : > { %p1356_p5 = por %p1355_p10, %p1354_p2 }
  0xcd   : > { %p1357_p7 = pnand %p1356_p5, %p1350_p3 }
  0xcf   : > { %1360 = shalt.err (!%p1357_p7)
}
  0xd0   : > { %s1361_s25 = scalar_lea.vmem %s379_s30, 16  ;;  %s1518_s26 = smov [#allocation7]  }
  0xd1   : > { %p1362_p6 = scmp.ne.s32.totalorder %s379_s30, %s1361_s25  ;;  %s1366_s17 = sshll.u32 %s1518_s26, 4  ;;  %s1367_s17 = int_to_ptr.vmem [resolvable:$false] %s1366_s17 }
  0xd2   : > { %s1368_s8 = scalar_lea.vmem %s1367_s17, 32  ;;  %p1369_p4 = scmp.lt.s32.totalorder %s379_s30, %s1367_s17 }
  0xd3   : > { %p1364_p11 = pnand %p1362_p6, %p2052_p8  ;;  %p1370_p12 = scmp.lt.s32.totalorder %s1368_s8, %s1361_s25 }
  0xd5   : > { %p1365_p1 = pneg %p1364_p11  ;;  %p1371_p13 = por %p1370_p12, %p1369_p4 }
  0xd7   : > { %p1372_p0 = pnand %p1371_p13, %p1365_p1 }
  0xd9   : > { %1375 = shalt.err (!%p1372_p0)
}
  0xda   : > { %p2054_p9 = scmp.ne.s32.totalorder %s2044_s20, 0  ;;  %s1855_s1 = scalar_lea.hbm %s1997_s3, %s1720_s14 }
  0xdb   : > { %s388_s24 = scalar_lea.vmem [#allocation8], %s1709_s16  ;;  %s2055_s27 = sand.u32 1, %s1508_s10  }
  0xdc   : > { %1094 = dma.hbm_to_vmem [thread:$0]  (!%p2054_p9), %s1830_s4, 16, %s379_s30, %s1733_s12  }
  0xdd   : > { %s395_s29 = sshll.u32 %s388_s24, 4  ;;  %s386_s22 = scalar_lea.sflag [#allocation9], %s2055_s27  ;;  %s396_s29 = int_to_ptr.vmem [resolvable:$true] %s395_s29 }
  0xde   : > { %s1376_s19 = scalar_lea.hbm %s1855_s1, 16  ;;  %s1381_s30 = scalar_lea.hbm %s1997_s3, 32 }
  0xdf   : > { %p1377_p13 = scmp.ne.s32.totalorder %s1855_s1, %s1376_s19  ;;  %p1382_p10 = scmp.lt.u32.totalorder %s1855_s1, %s1997_s3 }
  0xe0   : > { %p1383_p5 = scmp.lt.u32.totalorder %s1381_s30, %s1376_s19  ;;  %p1385_p6 = scmp.lt.u32.totalorder %s1376_s19, %s1855_s1 }
  0xe1   : > { %p1379_p3 = pnand %p1377_p13, %p2052_p8 }
  0xe2   : > { %p1384_p7 = por %p1383_p5, %p1382_p10 }
  0xe3   : > { %p1380_p2 = pneg %p1379_p3 }
  0xe4   : > { %p1386_p11 = por %p1385_p6, %p1384_p7 }
  0xe6   : > { %p1387_p1 = pnand %p1386_p11, %p1380_p2 }
  0xe8   : > { %1390 = shalt.err (!%p1387_p1)
}
  0xe9   : > { %s1391_s16 = scalar_lea.vmem %s396_s29, 16  ;;  %s1519_s25 = smov [#allocation8]  }
  0xea   : > { %p1392_p4 = scmp.ne.s32.totalorder %s396_s29, %s1391_s16  ;;  %s1396_s26 = sshll.u32 %s1519_s25, 4  ;;  %s1397_s26 = int_to_ptr.vmem [resolvable:$false] %s1396_s26 }
  0xeb   : > { %s1398_s17 = scalar_lea.vmem %s1397_s26, 32  ;;  %p1399_p13 = scmp.lt.s32.totalorder %s396_s29, %s1397_s26 }
  0xec   : > { %p1394_p12 = pnand %p1392_p4, %p2052_p8  ;;  %p1400_p3 = scmp.lt.s32.totalorder %s1398_s17, %s1391_s16 }
  0xee   : > { %p1395_p0 = pneg %p1394_p12  ;;  %p1401_p9 = por %p1400_p3, %p1399_p13 }
  0xf0   : > { %p1402_p5 = pnand %p1401_p9, %p1395_p0 }
  0xf2   : > { %1405 = shalt.err (!%p1402_p5)
}
  0xf3   : > { %p2056_p10 = scmp.ne.s32.totalorder %s2044_s20, 0  ;;  %p2057_p2 = scmp.ne.s32.totalorder %s2035_s15, 0 }
  0xf4   : > { %s1880_s5 = sand.u32 (!%p2057_p2), 1, %s1492_s28   ;;  %p2058_p8 = scmp.ne.s32.totalorder (!%p2057_p2), %s2032_s13, 0 }
  0xf5   : > { %1097 = dma.hbm_to_vmem [thread:$0]  (!%p2056_p10), %s1855_s1, 16, %s396_s29, %s386_s22  }
  0xf6   : > { %404 = sbr.rel (%p2057_p2) target bundleno = 1055 (0x41f), region = 52  ;;  %s932_s8 = sshll.u32 (!%p2057_p2), %s1880_s5, 3 }
  0xf7   : > { %s407_s21 = scalar_lea.sflag (!%p2057_p2), [#allocation3], %s1880_s5  ;;  %s410_s18 = scalar_lea.vmem (!%p2057_p2), [#allocation2], %s932_s8 }
  0xfd   : > { %1459 = dma.done.wait (%p2058_p8), %s407_s21, 128  }
  0xfe   : > { %1461 = vsyncadd (%p2058_p8), %s407_s21, 4294967168  ;;  %s415_s15 = sand.u32 1, %s1600_s11   ;;  %s418_s1 = scalar_lea.vmem [#allocation5], %s1880_s5 }
  0xff   : > { %s416_s20 = scalar_lea.sflag [#allocation6], %s415_s15 }
 0x100   : > { %1463 = dma.done.wait (%p2058_p8), %s416_s20, 32  }
 0x101   : > { %1465 = vsyncadd (%p2058_p8), %s416_s20, 4294967264  ;;  %s426_s24 = scalar_lea.vmem [#allocation7], %s1880_s5  ;;  %s432_s29 = scalar_lea.sflag [#allocation9], %s415_s15 }
 0x102   : > { %s434_s27 = scalar_lea.vmem [#allocation8], %s1880_s5 }
 0x103   : > { %1467 = dma.done.wait (%p2058_p8), %s432_s29, 16  }
 0x104   : > { %1469 = vsyncadd (%p2058_p8), %s432_s29, 4294967280  ;;  %p2059_p9 = scmp.eq.s32.totalorder %s1600_s11, 0 }
 0x106   : > { %1471 = dma.done.wait (%p2059_p9), [#allocation9], 512   ;;  %p2060_p7 = pmov %p2059_p9 }
 0x108   : > { %1473 = vsyncadd (%p2060_p7), [#allocation9], 4294966784  ;;  %p2061_p6 = pmov %p2060_p7 }
 0x10a   : > { %1475 = dma.done.wait (%p2061_p6), [#allocation12], 2064   ;;  %p2062_p11 = pmov %p2061_p6 }
 0x10b   : > { %p2063_p1 = pmov %p2061_p6 }
 0x10c   : > { %1477 = vsyncadd (%p2062_p11), [#allocation12], 4294965232 }
 0x10d   : > { %1479 = dma.done.wait (%p2063_p1), [#allocation15], 16   ;;  %p2064_p4 = pmov %p2063_p1 }
 0x10e   : > { %vm497_vm0 = vcmask 261120   ;;  %v1914_v0 = vld [vmem:[%s410_s18] sm:$0xff]  ;;  %v529_v7 = vld [vmem:[#allocation10] sm:$0xff]  ;;  %v1520_v10 = vmov 0.0|0.0   ;;  %vm1521_vm1 = vmmov 0   ;;  %v1522_v13 = vmov 0.0  }
 0x10f   : > { %1481 = vsyncadd (%p2064_p4), [#allocation15], 4294967280  ;;  %v498_v1 = vsel %vm497_vm0, %v1914_v0, 0.0  ;;  %v530_v8 = vld [vmem:[#allocation10 + $0x8] sm:$0xff]  ;;  %v531_v9 = vld [vmem:[#allocation10 + $0x10] sm:$0xff]  ;;  %1016 = vmatprep.subr.bf16.mxu0 %v1520_v10  ;;  %978 = vmatprep.mubr.msk.f32.mxu0 %vm1521_vm1, %v1522_v13  ;;  %v515_v20 = vlaneseq  ;;  %s2065_s11 = sld [smem:[#allocation26_spill]] }
 0x110   : > { %499 = vadd.xlane.f32.xlu0 %v498_v1  ;;  %v1017_v11 = vpack.c.bf16 %v530_v8, %v529_v7  ;;  %v532_v12 = vld [vmem:[#allocation10 + $0x18] sm:$0xff]  ;;  %1022 = vmatprep.subr.bf16.mxu1 %v1520_v10  ;;  %v622_v15 = vld [vmem:[#allocation13] sm:$0xff]  ;;  %v623_v16 = vld [vmem:[#allocation13 + $0x8] sm:$0xff]  ;;  %s2066_s13 = sld [smem:[#allocation29_spill]]  ;;  %s494_s19 = scalar_lea.vmem [#allocation16], %s932_s8 }
 0x111   : > { %1013 = vmatprep.mubr.msk.f32.mxu1 %vm1521_vm1, %v1522_v13  ;;  %v1020_v14 = vpack.c.bf16 %v532_v12, %v531_v9  ;;  %v1023_v17 = vpack.c.bf16 %v623_v16, %v622_v15  ;;  %v516_v22 = vshrl.u32 %v515_v20, 7  ;;  %v512_v23 = vld [vmem:[%s426_s24] sm:$0x1]  ;;  %v624_v32 = vld [vmem:[#allocation13 + $0x10] sm:$0xff]  ;;  %v625_v33 = vld [vmem:[#allocation13 + $0x18] sm:$0xff]  ;;  %s740_s12 = sshll.u32 %s494_s19, 4  ;;  %s1946_s12 = int_to_ptr.vmem [resolvable:$true] %s740_s12 }
 0x112   : > { %1018 = vmatpush3.bf16.msra.mxu0 %v1017_v11  ;;  %v513_v24 = vadd.f32 1.0, %v512_v23  ;;  %v938_v29 = vld [vmem:[%s418_s1] ss:$0 sm:$0xff]  ;;  %v1026_v34 = vpack.c.bf16 %v625_v33, %v624_v32  ;;  %v626_v35 = vld [vmem:[#allocation13 + $0x20] sm:$0xff]  ;;  %v628_v38 = vld [vmem:[#allocation13 + $0x30] sm:$0xff]  ;;  %s2067_s14 = sld [smem:[#allocation34_spill]] }
 0x113   : > { %1019 = vmatprep.subr.bf16.mxu0 %v1520_v10  ;;  %1024 = vmatpush3.bf16.msra.mxu1 %v1023_v17  ;;  %v517_v25 = vsub.s32 0, %v516_v22  ;;  %v627_v36 = vld [vmem:[#allocation13 + $0x28] sm:$0xff]  ;;  %v629_v39 = vld [vmem:[#allocation13 + $0x38] sm:$0xff]  ;;  %v630_v41 = vld [vmem:[#allocation13 + $0x40] sm:$0xff]  ;;  %s726_s16 = scalar_lea.sflag [#allocation4], %s1880_s5  ;;  %s1406_s25 = scalar_lea.vmem %s1946_s12, 128 }
 0x114   : > { %1025 = vmatprep.subr.bf16.mxu1 %v1520_v10  ;;  %v1029_v37 = vpack.c.bf16 %v627_v36, %v626_v35  ;;  %v1032_v40 = vpack.c.bf16 %v629_v39, %v628_v38  ;;  %v631_v42 = vld [vmem:[#allocation13 + $0x48] sm:$0xff]  ;;  %v632_v44 = vld [vmem:[#allocation13 + $0x50] sm:$0xff]  ;;  %v633_v45 = vld [vmem:[#allocation13 + $0x58] sm:$0xff]  ;;  %p1407_p12 = scmp.ne.s32.totalorder %s1946_s12, %s1406_s25  ;;  %s1523_s26 = smov [#allocation16]  }
 0x115   : > { %v518_v26 = vrot.slane %v513_v24, %v517_v25  ;;  %v1035_v43 = vpack.c.bf16 %v631_v42, %v630_v41  ;;  %v1038_v46 = vpack.c.bf16 %v633_v45, %v632_v44  ;;  %v634_v47 = vld [vmem:[#allocation13 + $0x60] sm:$0xff]  ;;  %v635_v48 = vld [vmem:[#allocation13 + $0x68] sm:$0xff]  ;;  %v636_v50 = vld [vmem:[#allocation13 + $0x70] sm:$0xff]  ;;  %s944_s22 = sshll.u32 %s2065_s11, 7  ;;  %s1410_s17 = sshll.u32 %s1523_s26, 4  ;;  %s1411_s17 = int_to_ptr.vmem [resolvable:$false] %s1410_s17 }
 0x116   : > { %1021 = vmatpush3.bf16.msra.mxu0 %v1020_v14  ;;  %v1041_v49 = vpack.c.bf16 %v635_v48, %v634_v47  ;;  %v637_v51 = vld [vmem:[#allocation13 + $0x78] sm:$0xff]  ;;  %p2068_p0 = scmp.ne.s32.totalorder %s2066_s13, 0  ;;  %s1412_s8 = scalar_lea.vmem %s1411_s17, 256 }
 0x117   : > { %1027 = vmatpush3.bf16.msra.mxu1 %v1026_v34  ;;  %v1044_v52 = vpack.c.bf16 %v637_v51, %v636_v50  ;;  %v939_v53 = vld [vmem:[#allocation11] ss:$0 sm:$0xff]  ;;  %p1413_p5 = scmp.lt.s32.totalorder %s1946_s12, %s1411_s17  ;;  %p1414_p10 = scmp.lt.s32.totalorder %s1412_s8, %s1406_s25 }
 0x118   : > { %1028 = vmatprep.subr.bf16.mxu1 %v1520_v10  ;;  %s1944_s23 = scalar_lea.hbm %s2067_s14, %s944_s22  ;;  %p1408_p13 = pnand %p1407_p12, %p2068_p0 }
 0x119   : > { %p1415_p2 = por %p1414_p10, %p1413_p5 }
 0x11a   : > { %p1409_p3 = pneg %p1408_p13 }
 0x11b   : > { %1030 = vmatpush3.bf16.msra.mxu1 %v1029_v37 }
 0x11c   : > { %1031 = vmatprep.subr.bf16.mxu1 %v1520_v10  ;;  %p1416_p8 = pnand %p1415_p2, %p1409_p3 }
 0x11f   : > { %1033 = vmatpush3.bf16.msra.mxu1 %v1032_v40 }
 0x120   : > { %1034 = vmatprep.subr.bf16.mxu1 %v1520_v10 }
 0x123   : > { %1036 = vmatpush3.bf16.msra.mxu1 %v1035_v43 }
 0x124   : > { %1037 = vmatprep.subr.bf16.mxu1 %v1520_v10 }
 0x127   : > { %1039 = vmatpush3.bf16.msra.mxu1 %v1038_v46 }
 0x128   : > { %1040 = vmatprep.subr.bf16.mxu1 %v1520_v10 }
 0x12b   : > { %1042 = vmatpush3.bf16.msra.mxu1 %v1041_v49 }
 0x12c   : > { %1043 = vmatprep.subr.bf16.mxu1 %v1520_v10 }
 0x12f   : > { %1045 = vmatpush3.bf16.msra.mxu1 %v1044_v52 }
 0x19d   : > { %v500_v2 = vpop.xlane.xlu0 %499 }
 0x19e   : > { %v502_v3 = vmul.f32 0.03125, %v500_v2 }
 0x1a0   : > { %v503_v4 = vsub.f32 %v1914_v0, %v502_v3  ;;  %v942_v3 = vld [vmem:[%s434_s27] ss:$0 sm:$0xff] }
 0x1a2   : > { %v504_v5 = vmul.f32 %v503_v4, %v503_v4 }
 0x1a4   : > { %v505_v6 = vsel %vm497_vm0, %v504_v5, 0.0  ;;  %v722_v5 = vadd.f32 %v942_v3, %v1914_v0 }
 0x1a5   : > { %506 = vadd.xlane.f32.xlu0 %v505_v6 }
 0x232   : > { %v507_v18 = vpop.xlane.xlu0 %506 }
 0x233   : > { %v508_v19 = vmul.f32 0.03125, %v507_v18 }
 0x235   : > { %v509_v21 = vadd.f32 1e-06, %v508_v19 }
 0x237   : > { %1169 = vrsqrt.f32 %v509_v21 }
 0x241   : > { %v1170_v27 = vpop.eup %1169 }
 0x242   : > { %v511_v28 = vmul.f32 %v1170_v27, %v503_v4  ;;  %v941_v4 = vld [vmem:[#allocation14] ss:$0 sm:$0xff] }
 0x244   : > { %v520_v30 = vmul.f32 %v518_v26, %v511_v28 }
 0x246   : > { %v528_v31 = vadd.f32 %v938_v29, %v520_v30 }
 0x248   : > { %979 = vmatmul.mubr.msk.f32.vlgmr.msra.gmra.mrb[0].mxu0 %vm497_vm0, %v528_v31 }
 0x31b   : > { %v609_v54 = vpop.f32.mrb[0].mxu0 }
 0x31c   : > { %v610_v55 = vadd.f32 %v939_v53, %v609_v54  ;;  %v980_v56 = vpop.f32.mrb[1].mxu0 }
 0x31e   : > { %v613_v57 = vmul.f32 %v610_v55, %v610_v55 }
 0x320   : > { %v614_v58 = vmul.f32 %v613_v57, %v610_v55 }
 0x322   : > { %v615_v59 = vmul.f32 0.044715, %v614_v58 }
 0x324   : > { %v616_v60 = vadd.f32 %v615_v59, %v610_v55 }
 0x326   : > { %v617_v61 = vmul.f32 0.7978846, %v616_v60 }
 0x328   : > { %1171 = vtanh.f32 %v617_v61 }
 0x332   : > { %v1172_v62 = vpop.eup %1171 }
 0x333   : > { %v619_v63 = vadd.f32 1.0, %v1172_v62 }
 0x335   : > { %v620_v1 = vmul.f32 0.5, %v619_v63 }
 0x337   : > { %v621_v2 = vmul.f32 %v620_v1, %v610_v55 }
 0x339   : > { %1014 = vmatmul.mubr.f32.vlgmr.msra.gmra.mrb[0].mxu1 %v621_v2 }
 0x40c   : > { %v711_v6 = vpop.f32.mrb[0].mxu1 }
 0x40d   : > { %v712_v7 = vadd.f32 %v941_v4, %v711_v6  ;;  %v1015_v8 = vpop.f32.mrb[1].mxu1 }
 0x40f   : > { %v723_v9 = vadd.f32 %v722_v5, %v712_v7 }
 0x411   : > { %724 = vst.msk [vmem:[%s494_s19] sm:$0xff] %vm497_vm0, %v723_v9 }
 0x412   : > { %1419 = shalt.err (!%p1416_p8)
}
 0x413   : > { %s1420_s5 = scalar_lea.hbm %s1944_s23, 128  ;;  %s1424_s15 = scalar_lea.hbm %s2067_s14, 256 }
 0x414   : > { %p1421_p9 = scmp.ne.s32.totalorder %s1944_s23, %s1420_s5  ;;  %p1425_p11 = scmp.lt.u32.totalorder %s1944_s23, %s2067_s14 }
 0x415   : > { %p1426_p1 = scmp.lt.u32.totalorder %s1424_s15, %s1420_s5  ;;  %p1428_p12 = scmp.lt.u32.totalorder %s1420_s5, %s1944_s23 }
 0x416   : > { %p1422_p7 = pnand %p1421_p9, %p2068_p0 }
 0x417   : > { %p1427_p4 = por %p1426_p1, %p1425_p11 }
 0x418   : > { %p1423_p6 = pneg %p1422_p7 }
 0x419   : > { %p1429_p13 = por %p1428_p12, %p1427_p4 }
 0x41b   : > { %p1430_p3 = pnand %p1429_p13, %p1423_p6 }
 0x41d   : > { %1433 = shalt.err (!%p1430_p3)
}
 0x41e   : > { %1070 = dma.vmem_to_hbm [thread:$0]  (%p2068_p0), %s1946_s12, 128, %s1944_s23, %s726_s16  }
 0x41f PF: > { %s2069_s24 = sld [smem:[#allocation24_spill]]  ;;  %s2070_s29 = sld [smem:[#allocation27_spill]] }
 0x420   : > { %p2072_p10 = scmp.ge.s32.totalorder %s1508_s10, 2 }
 0x425   : > { %s752_s27 = sand.u32 1, %s2069_s24   ;;  %p2071_p5 = scmp.ne.s32.totalorder %s2070_s29, 0 }
 0x426   : > { %s753_s11 = scalar_lea.sflag [#allocation4], %s752_s27 }
 0x427   : > { %p1099_p2 = pnand %p2072_p10, %p2071_p5 }
 0x429   : > { %1483 = dma.done.wait (!%p1099_p2), %s753_s11, 128  }
 0x42a   : > { %1485 = vsyncadd (!%p1099_p2), %s753_s11, 4294967168  ;;  %s32_s10 = sadd.s32 1, %s1508_s10   ;;  %s2073_s22 = sld [smem:[#allocation25_spill]] }
 0x42b   : > { %p29_p8 = scmp.ge.s32.totalorder %s32_s10, 4   ;;  %s2074_s29 = sld [smem:[#allocation30_spill]] }
 0x42c   : > { %s2075_s13 = sld [smem:[#allocation28_spill]]  ;;  %s2076_s27 = smov %s1492_s28 }
 0x42d   : > { %s2078_s30 = smov %s1504_s9  ;;  %31 = sbr.rel (!%p29_p8) target bundleno = 17 (0x11), region = 150 }
 0x430   : > { %s2077_s28 = smov %s2073_s22 }
 0x432   : > { %s2079_s9 = smov %s2075_s13 }
 0x434   :  { %758 = vsyncpa [#allocation3], 1 }
 0x435   :  { %760 = vsyncpa [#allocation3 + $0x1], 1 }
 0x436   :  { %761 = vsyncpa [#allocation6], 1 }
 0x437   :  { %763 = vsyncpa [#allocation6 + $0x1], 1 }
 0x438   :  { %764 = vsyncpa [#allocation9], 1 }
 0x439   :  { %766 = vsyncpa [#allocation9 + $0x1], 1 }
 0x43a   :  { %767 = vsyncpa [#allocation12], 1 }
 0x43b   :  { %768 = vsyncpa [#allocation15], 1 }
 0x43c   :  { %769 = vsyncpa [#allocation4], 1 }
 0x43d   :  { %771 = vsyncpa [#allocation4 + $0x1], 1 }

// kernel: cond_dit_block.3
= control target key start
LH: loop header
LB: loop body
LE: loop exit
PB: predicated region body
PF: predicated region fallthrough
CT: control target
= control target key end

     0   :  { %s3923_s0 = inlined_call_operand.hbm [shape: f32[2,16,32], index: 0, kind: input, shape index: {}, may-alias: {0,12}]   ;;  %s3924_s1 = inlined_call_operand.hbm [shape: f32[2,1,32], index: 1, kind: input, shape index: {}]   ;;  %s3925_s2 = inlined_call_operand.hbm [shape: f32[2,1,32], index: 2, kind: input, shape index: {}]   ;;  %s3926_s3 = inlined_call_operand.hbm [shape: f32[2,1,32], index: 3, kind: input, shape index: {}]   ;;  %s3927_s4 = inlined_call_operand.hbm [shape: f32[1,32,32], index: 4, kind: input, shape index: {}]   ;;  %s3928_s5 = inlined_call_operand.hbm [shape: f32[1,32,32], index: 5, kind: input, shape index: {}]   ;;  %s3929_s6 = inlined_call_operand.hbm [shape: f32[1,32,32], index: 6, kind: input, shape index: {}]   ;;  %s3930_s7 = inlined_call_operand.hbm [shape: f32[1,1,32], index: 7, kind: input, shape index: {}]   ;;  %s3931_s8 = inlined_call_operand.hbm [shape: f32[1,1,32], index: 8, kind: input, shape index: {}]   ;;  %s3932_s9 = inlined_call_operand.hbm [shape: f32[1,1,32], index: 9, kind: input, shape index: {}]   ;;  %s3933_s10 = inlined_call_operand.hbm [shape: f32[1,32,32], index: 10, kind: input, shape index: {}]   ;;  %s3934_s11 = inlined_call_operand.hbm [shape: f32[1,32], index: 11, kind: input, shape index: {}]   ;;  %s3935_s12 = inlined_call_operand.hbm [shape: f32[2,16,32], index: 12, kind: output, shape index: {}, may-alias: {0,12}]  }
   0x1   :  { %3972 = sst [smem:[#allocation41_spill]] %s3923_s0 }
   0x2   :  { %3973 = sst [smem:[#allocation42_spill]] %s3924_s1 }
   0x3   :  { %3974 = sst [smem:[#allocation43_spill]] %s3925_s2 }
   0x4   :  { %3975 = sst [smem:[#allocation44_spill]] %s3926_s3 }
   0x5   :  { %3976 = sst [smem:[#allocation45_spill]] %s3927_s4 }
   0x6   :  { %3977 = sst [smem:[#allocation46_spill]] %s3928_s5 }
   0x7   :  { %3978 = sst [smem:[#allocation47_spill]] %s3929_s6 }
   0x8   :  { %3979 = sst [smem:[#allocation48_spill]] %s3930_s7 }
   0x9   :  { %3980 = sst [smem:[#allocation49_spill]] %s3931_s8 }
   0xa   :  { %3981 = sst [smem:[#allocation50_spill]] %s3932_s9 }
   0xb   :  { %3982 = sst [smem:[#allocation51_spill]] %s3933_s10 }
   0xc   :  { %3983 = sst [smem:[#allocation52_spill]] %s3934_s11 }
   0xd   :  { %3984 = sst [smem:[#allocation53_spill]] %s3935_s12 }
   0xe   :  { %17 = vsyncpa [#allocation5], 0 }
   0xf   :  { %18 = vsyncpa [#allocation8], 0 }
  0x10   :  { %20 = vsyncpa [#allocation8 + $0x1], 0 }
  0x11   :  { %21 = vsyncpa [#allocation11], 0 }
  0x12   :  { %23 = vsyncpa [#allocation11 + $0x1], 0 }
  0x13   :  { %24 = vsyncpa [#allocation14], 0 }
  0x14   :  { %25 = vsyncpa [#allocation17], 0 }
  0x15   :  { %26 = vsyncpa [#allocation20], 0 }
  0x16   :  { %27 = vsyncpa [#allocation23], 0 }
  0x17   :  { %28 = vsyncpa [#allocation6], 0 }
  0x18   :  { %30 = vsyncpa [#allocation6 + $0x1], 0  ;;  %s3268_s21 = smov 0   ;;  %s3270_s22 = smov 0  }
  0x19   :  { %s3272_s23 = smov 0   ;;  %s3274_s24 = smov 0  }
  0x1a   :  { %s3276_s25 = smov 0   ;;  %s3278_s26 = smov 0  }
  0x1b LB: > { %3985 = sst [smem:[#allocation34_spill]] %s3158_s21  ;;  %s3299_s27 = sadd.s32 4294967295, %s3178_s26   ;;  %s3178_s26 = sphi %s3278_s26, %s36_s26   ;;  %s3174_s25 = sphi %s3276_s25, %s4050_s25   ;;  %s3170_s24 = sphi %s3274_s24, %s4049_s24   ;;  %s3166_s23 = sphi %s3272_s23, %s4048_s23   ;;  %s3162_s22 = sphi %s3270_s22, %s4052_s22   ;;  %s3158_s21 = sphi %s3268_s21, %s4051_s21  }
  0x1c   : > { %3986 = sst [smem:[#allocation35_spill]] %s3166_s23  ;;  %p2191_p0 = scmp.ge.s32.totalorder %s3178_s26, 1 }
  0x1d   : > { %3987 = sst [smem:[#allocation36_spill]] %s3174_s25  ;;  %p3943_p1 = scmp.eq.s32.totalorder %s3299_s27, 0 }
  0x1e   : > { %p386_p2 = scmp.lt.s32.totalorder %s3178_s26, 3  ;;  %s3180_s29 = smov [#allocation12]  }
  0x1f   : > { %s417_s30 = sshll.u32 %s3180_s29, 4  ;;  %s3181_s13 = smov [#allocation13]   ;;  %s3308_s30 = int_to_ptr.vmem [resolvable:$true] %s417_s30 }
  0x20   : > { %p3304_p3 = pnand %p2191_p0, %p386_p2  ;;  %s433_s14 = sshll.u32 %s3181_s13, 4  ;;  %s3322_s14 = int_to_ptr.vmem [resolvable:$true] %s433_s14 }
  0x21   : > { %s3182_s16 = smov [#allocation16]   ;;  %s3990_s4 = sld [smem:[#allocation45_spill]] }
  0x22   : > { %s3988_s28 = scalar_select %p3304_p3, 1, 0 }
  0x23   : > { %p3938_p5 = pneg %p3304_p3  ;;  %s465_s17 = sshll.u32 %s3182_s16, 4  ;;  %s3324_s17 = int_to_ptr.vmem [resolvable:$true] %s465_s17 }
  0x25   : > { %p3318_p6 = pnand %p3938_p5, %p3943_p1 }
  0x27   : > { %s3989_s15 = scalar_select %p3318_p6, 1, 0 }
  0x28   : > { %s2724_s20 = scalar_lea.hbm %s3990_s4, 512  ;;  %p3334_p8 = pneg %p3318_p6 }
  0x29   : > { %p2725_p7 = scmp.ne.s32.totalorder %s3990_s4, %s2724_s20  ;;  %p2731_p11 = scmp.lt.u32.totalorder %s2724_s20, %s3990_s4 }
  0x2a   : > { %s3991_s12 = scalar_select %p3334_p8, 1, 0 }
  0x2b   : > { %p2727_p9 = pnand %p3334_p8, %p2725_p7 }
  0x2d   : > { %p2728_p10 = pneg %p2727_p9 }
  0x2f   : > { %p2733_p12 = pnand %p2731_p11, %p2728_p10 }
  0x31   : > { %2736 = shalt.err (!%p2733_p12)
}
  0x32   : > { %s2737_s18 = scalar_lea.vmem %s3308_s30, 512  ;;  %p2745_p4 = scmp.lt.s32.totalorder %s3308_s30, %s3308_s30 }
  0x33   : > { %p2738_p13 = scmp.ne.s32.totalorder %s3308_s30, %s2737_s18  ;;  %p2746_p5 = scmp.lt.s32.totalorder %s2737_s18, %s2737_s18 }
  0x35   : > { %p2740_p0 = pnand %p2738_p13, %p3334_p8  ;;  %p2747_p7 = por %p2746_p5, %p2745_p4 }
  0x37   : > { %p2741_p2 = pneg %p2740_p0 }
  0x39   : > { %p2748_p9 = pnand %p2747_p7, %p2741_p2 }
  0x3b   : > { %2751 = shalt.err (!%p2748_p9)
}
  0x3c   : > { %s3946_s19 = smov 128   ;;  %s3948_s3 = smov 8  }
  0x3d   : > { %2537 = dma.hbm_to_vmem [thread:$0]  (!%p3318_p6), %s3990_s4, 512, %s3308_s30, [#allocation11], %s3946_s19, %s3946_s19, %s3948_s3  }
  0x3e   : > { %s3992_s5 = sld [smem:[#allocation46_spill]] }
  0x44   : > { %s2752_s18 = scalar_lea.hbm %s3992_s5, 512 }
  0x45   : > { %p2753_p4 = scmp.ne.s32.totalorder %s3992_s5, %s2752_s18  ;;  %p2759_p11 = scmp.lt.u32.totalorder %s2752_s18, %s3992_s5 }
  0x47   : > { %p2755_p5 = pnand %p2753_p4, %p3334_p8 }
  0x49   : > { %p2756_p10 = pneg %p2755_p5 }
  0x4b   : > { %p2761_p12 = pnand %p2759_p11, %p2756_p10 }
  0x4d   : > { %2764 = shalt.err (!%p2761_p12)
}
  0x4e   : > { %s2765_s30 = scalar_lea.vmem %s3322_s14, 512  ;;  %p2773_p7 = scmp.lt.s32.totalorder %s3322_s14, %s3322_s14 }
  0x4f   : > { %p2766_p13 = scmp.ne.s32.totalorder %s3322_s14, %s2765_s30  ;;  %p2774_p9 = scmp.lt.s32.totalorder %s2765_s30, %s2765_s30 }
  0x51   : > { %p2768_p0 = pnand %p2766_p13, %p3334_p8  ;;  %p2775_p4 = por %p2774_p9, %p2773_p7 }
  0x53   : > { %p2769_p2 = pneg %p2768_p0 }
  0x55   : > { %p2776_p5 = pnand %p2775_p4, %p2769_p2 }
  0x57   : > { %2779 = shalt.err (!%p2776_p5)
}
  0x58   : > { %2540 = dma.hbm_to_vmem [thread:$0]  (!%p3318_p6), %s3992_s5, 512, %s3322_s14, [#allocation14], %s3946_s19, %s3946_s19, %s3948_s3  }
  0x59   : > { %s3993_s7 = sld [smem:[#allocation48_spill]] }
  0x5f   : > { %s2780_s20 = scalar_lea.hbm %s3993_s7, 16 }
  0x60   : > { %p2781_p10 = scmp.ne.s32.totalorder %s3993_s7, %s2780_s20  ;;  %p2787_p13 = scmp.lt.u32.totalorder %s2780_s20, %s3993_s7 }
  0x62   : > { %p2783_p11 = pnand %p2781_p10, %p3334_p8 }
  0x64   : > { %p2784_p12 = pneg %p2783_p11 }
  0x66   : > { %p2789_p0 = pnand %p2787_p13, %p2784_p12 }
  0x68   : > { %2792 = shalt.err (!%p2789_p0)
}
  0x69   : > { %s2793_s14 = scalar_lea.vmem %s3324_s17, 16  ;;  %s2800_s30 = scalar_lea.vmem %s3324_s17, 32 }
  0x6a   : > { %p2794_p2 = scmp.ne.s32.totalorder %s3324_s17, %s2793_s14  ;;  %p2801_p4 = scmp.lt.s32.totalorder %s3324_s17, %s3324_s17 }
  0x6b   : > { %p2802_p5 = scmp.lt.s32.totalorder %s2800_s30, %s2793_s14 }
  0x6c   : > { %p2796_p7 = pnand %p2794_p2, %p3334_p8 }
  0x6d   : > { %p2803_p10 = por %p2802_p5, %p2801_p4 }
  0x6e   : > { %p2797_p9 = pneg %p2796_p7 }
  0x70   : > { %p2804_p11 = pnand %p2803_p10, %p2797_p9 }
  0x72   : > { %2807 = shalt.err (!%p2804_p11)
}
  0x73   : > { %2546 = dma.hbm_to_vmem [thread:$0]  (!%p3318_p6), %s3993_s7, 16, %s3324_s17, [#allocation17]  }
  0x74   : > { %s3185_s10 = smov [#allocation19]   ;;  %s3994_s9 = sld [smem:[#allocation50_spill]] }
  0x75   : > { %s491_s11 = sshll.u32 %s3185_s10, 4  ;;  %s492_s11 = int_to_ptr.vmem [resolvable:$true] %s491_s11 }
  0x7a   : > { %s2808_s13 = scalar_lea.hbm %s3994_s9, 16 }
  0x7b   : > { %p2809_p12 = scmp.ne.s32.totalorder %s3994_s9, %s2808_s13  ;;  %p2815_p2 = scmp.lt.u32.totalorder %s2808_s13, %s3994_s9 }
  0x7d   : > { %p2811_p13 = pnand %p2809_p12, %p3334_p8 }
  0x7f   : > { %p2812_p0 = pneg %p2811_p13 }
  0x81   : > { %p2817_p7 = pnand %p2815_p2, %p2812_p0 }
  0x83   : > { %2820 = shalt.err (!%p2817_p7)
}
  0x84   : > { %s2821_s17 = scalar_lea.vmem %s492_s11, 16  ;;  %s2828_s2 = scalar_lea.vmem %s492_s11, 32 }
  0x85   : > { %p2822_p9 = scmp.ne.s32.totalorder %s492_s11, %s2821_s17  ;;  %p2829_p10 = scmp.lt.s32.totalorder %s492_s11, %s492_s11 }
  0x86   : > { %p2830_p11 = scmp.lt.s32.totalorder %s2828_s2, %s2821_s17 }
  0x87   : > { %p2824_p4 = pnand %p2822_p9, %p3334_p8 }
  0x88   : > { %p2831_p1 = por %p2830_p11, %p2829_p10 }
  0x89   : > { %p2825_p5 = pneg %p2824_p4 }
  0x8b   : > { %p2832_p3 = pnand %p2831_p1, %p2825_p5 }
  0x8d   : > { %2835 = shalt.err (!%p2832_p3)
}
  0x8e   : > { %2552 = dma.hbm_to_vmem [thread:$0]  (!%p3318_p6), %s3994_s9, 16, %s492_s11, [#allocation20]  }
  0x8f   : > { %s2190_s20 = sadd.s32 4294967294, %s3178_s26   ;;  %s48_s29 = sadd.s32 1, %s3174_s25 }
  0x90   : > { %p50_p1 = scmp.ge.s32.totalorder %s48_s29, 2  ;;  %s55_s13 = sadd.s32 1, %s3166_s23 }
  0x91   : > { %p3950_p3 = scmp.ne.s32.totalorder %s3162_s22, %s3158_s21  ;;  %p88_p12 = scmp.ne.s32.totalorder %s3166_s23, %s3162_s22 }
  0x92   : > { %s4054_s29 = smov (%p50_p1, %s48_s29), 0  ;;  %p89_p13 = scmp.eq.s32.totalorder %s3178_s26, 0 }
  0x93   : > { %3995 = sst [smem:[#allocation37_spill]] %s4054_s29  ;;  %p373_p0 = scmp.eq.s32.totalorder %s3299_s27, 1 }
  0x94   : > { %s52_s16 = ssub.s32 %s3174_s25, %s4054_s29  ;;  %p379_p2 = scmp.eq.s32.totalorder %s2190_s20, 1 }
  0x95   : > { %p53_p7 = scmp.eq.s32.totalorder %s52_s16, 0  ;;  %p90_p9 = por %p89_p13, %p88_p12 }
  0x96   : > { %p3439_p4 = por %p373_p0, %p88_p12  ;;  %p3446_p5 = por %p379_p2, %p3950_p3 }
  0x97   : > { %s3451_s14 = scalar_select %p53_p7, %s3166_s23, %s55_s13  }
  0x98   : > { %s3996_s11 = scalar_select %p3439_p4, 1, 0 }
  0x99   : > { %s3998_s18 = scalar_select %p3446_p5, 1, 0 }
  0x9a   : > { %3997 = sst [smem:[#allocation38_spill]] %s3996_s11  ;;  %p2581_p10 = scmp.lt.s32.totalorder %s3178_s26, 2 }
  0x9b   : > { %3999 = sst [smem:[#allocation39_spill]] %s3998_s18  ;;  %s3951_s30 = sand.u32 1, %s3178_s26  }
  0x9c   : > { %4000 = sst [smem:[#allocation40_spill]] %s3451_s14  ;;  %s3456_s17 = sand.u32 1, %s3166_s23  }
  0x9d   : > { %s3459_s2 = sshll.u32 %s3174_s25, 4  ;;  %s4001_s1 = sld [smem:[#allocation42_spill]] }
  0x9e   : > { %s532_s16 = scalar_lea.vmem [#allocation7], %s3456_s17  ;;  %p3470_p11 = pnand %p2581_p10, %p90_p9 }
  0x9f   : > { %s539_s13 = sshll.u32 %s532_s16, 4  ;;  %s3476_s3 = scalar_lea.sflag [#allocation8], %s3951_s30  ;;  %s3468_s13 = int_to_ptr.vmem [resolvable:$true] %s539_s13 }
  0xa0   : > { %s4002_s19 = scalar_select %p3470_p11, 1, 0 }
  0xa1   : > { %p3482_p12 = pneg %p3470_p11 }
  0xa3   : > { %s3465_s20 = scalar_lea.hbm %s4001_s1, %s3459_s2  ;;  %s2841_s5 = scalar_lea.hbm %s4001_s1, 32 }
  0xa4   : > { %s2836_s4 = scalar_lea.hbm %s3465_s20, 16  ;;  %p2842_p2 = scmp.lt.u32.totalorder %s3465_s20, %s4001_s1 }
  0xa5   : > { %p2837_p1 = scmp.ne.s32.totalorder %s3465_s20, %s2836_s4  ;;  %p2843_p7 = scmp.lt.u32.totalorder %s2841_s5, %s2836_s4 }
  0xa6   : > { %s4003_s8 = scalar_select %p3482_p12, 1, 0 }
  0xa7   : > { %p2839_p13 = pnand %p3482_p12, %p2837_p1  ;;  %p2844_p9 = por %p2843_p7, %p2842_p2 }
  0xa8   : > { %p2845_p10 = scmp.lt.u32.totalorder %s2836_s4, %s3465_s20 }
  0xa9   : > { %p2840_p0 = pneg %p2839_p13 }
  0xaa   : > { %p2846_p3 = por %p2845_p10, %p2844_p9 }
  0xac   : > { %p2847_p5 = pnand %p2846_p3, %p2840_p0 }
  0xae   : > { %2850 = shalt.err (!%p2847_p5)
}
  0xaf   : > { %s2851_s30 = scalar_lea.vmem %s3468_s13, 16  ;;  %s3186_s10 = smov [#allocation7]  }
  0xb0   : > { %p2852_p1 = scmp.ne.s32.totalorder %s3468_s13, %s2851_s30  ;;  %s2856_s16 = sshll.u32 %s3186_s10, 4  ;;  %s2857_s16 = int_to_ptr.vmem [resolvable:$false] %s2856_s16 }
  0xb1   : > { %s2858_s7 = scalar_lea.vmem %s2857_s16, 32  ;;  %p2859_p6 = scmp.lt.s32.totalorder %s3468_s13, %s2857_s16 }
  0xb2   : > { %p2854_p13 = pnand %p2852_p1, %p3482_p12  ;;  %p2860_p8 = scmp.lt.s32.totalorder %s2858_s7, %s2851_s30 }
  0xb4   : > { %p2855_p4 = pneg %p2854_p13  ;;  %p2861_p2 = por %p2860_p8, %p2859_p6 }
  0xb6   : > { %p2862_p7 = pnand %p2861_p2, %p2855_p4 }
  0xb8   : > { %2865 = shalt.err (!%p2862_p7)
}
  0xb9   : > { %2562 = dma.hbm_to_vmem [thread:$0]  (!%p3470_p11), %s3465_s20, 16, %s3468_s13, %s3476_s3  }
  0xba   : > { %p4004_p3 = scmp.ne.s32.totalorder %s3162_s22, %s3158_s21  ;;  %p4005_p5 = scmp.eq.s32.totalorder %s3299_s27, 0 }
  0xbb   : > { %s3957_s5 = sshll.u32 %s3170_s24, 8  ;;  %s4007_s0 = sld [smem:[#allocation41_spill]] }
  0xbc   : > { %p3511_p0 = por %p4005_p5, %p4004_p3  ;;  %s3187_s16 = smov [#allocation4]  }
  0xbd   : > { %s401_s20 = sshll.u32 %s3187_s16, 4  ;;  %p4008_p6 = scmp.ne.s32.totalorder %s3988_s28, 0  ;;  %s402_s20 = int_to_ptr.vmem [resolvable:$true] %s401_s20 }
  0xbe   : > { %s4006_s4 = scalar_select %p3511_p0, 1, 0 }
  0xbf   : > { %p4009_p8 = pneg %p4008_p6  ;;  %s3188_s7 = smov [#allocation15]  }
  0xc0   : > { %s449_s9 = sshll.u32 %s3188_s7, 4  ;;  %s450_s9 = int_to_ptr.vmem [resolvable:$true] %s449_s9 }
  0xc1   : > { %s3521_s10 = scalar_lea.hbm %s4007_s0, %s3957_s5  ;;  %p3528_p4 = pnand %p4009_p8, %p3511_p0 }
  0xc2   : > { %s2866_s30 = scalar_lea.hbm %s3521_s10, 256  ;;  %s2871_s1 = scalar_lea.hbm %s4007_s0, 512 }
  0xc3   : > { %p2867_p9 = scmp.ne.s32.totalorder %s3521_s10, %s2866_s30  ;;  %p2868_p10 = pneg %p3528_p4 }
  0xc4   : > { %p2872_p2 = scmp.lt.u32.totalorder %s3521_s10, %s4007_s0  ;;  %p2873_p7 = scmp.lt.u32.totalorder %s2871_s1, %s2866_s30 }
  0xc5   : > { %p2869_p1 = pnand %p2868_p10, %p2867_p9  ;;  %p2875_p5 = scmp.lt.u32.totalorder %s2866_s30, %s3521_s10 }
  0xc6   : > { %p2874_p3 = por %p2873_p7, %p2872_p2 }
  0xc7   : > { %p2870_p13 = pneg %p2869_p1 }
  0xc8   : > { %p2876_p8 = por %p2875_p5, %p2874_p3 }
  0xca   : > { %p2877_p0 = pnand %p2876_p8, %p2870_p13 }
  0xcc   : > { %2880 = shalt.err (!%p2877_p0)
}
  0xcd   : > { %s2881_s7 = scalar_lea.vmem %s402_s20, 256  ;;  %p2889_p11 = scmp.lt.s32.totalorder %s402_s20, %s402_s20 }
  0xce   : > { %p2882_p6 = scmp.ne.s32.totalorder %s402_s20, %s2881_s7  ;;  %p2890_p12 = scmp.lt.s32.totalorder %s2881_s7, %s2881_s7 }
  0xd0   : > { %p2884_p9 = pnand %p2882_p6, %p2868_p10  ;;  %p2891_p2 = por %p2890_p12, %p2889_p11 }
  0xd2   : > { %p2885_p1 = pneg %p2884_p9 }
  0xd4   : > { %p2892_p7 = pnand %p2891_p2, %p2885_p1 }
  0xd6   : > { %2895 = shalt.err (!%p2892_p7)
}
  0xd7   : > { %s4011_s1 = smov 8   ;;  %s4012_s25 = smov 128  }
  0xd8   : > { %2534 = dma.hbm_to_vmem [thread:$0]  (!%p3528_p4), %s3521_s10, 256, %s402_s20, [#allocation5], %s4012_s25, %s4012_s25, %s4011_s1  }
  0xd9   : > { %s4013_s6 = sld [smem:[#allocation47_spill]]  ;;  %p4014_p11 = scmp.ne.s32.totalorder %s3991_s12, 0 }
  0xdf   : > { %s2896_s30 = scalar_lea.hbm %s4013_s6, 512 }
  0xe0   : > { %p2897_p0 = scmp.ne.s32.totalorder %s4013_s6, %s2896_s30  ;;  %p2903_p10 = scmp.lt.u32.totalorder %s2896_s30, %s4013_s6 }
  0xe2   : > { %p2899_p12 = pnand %p2897_p0, %p4014_p11 }
  0xe4   : > { %p2900_p6 = pneg %p2899_p12 }
  0xe6   : > { %p2905_p13 = pnand %p2903_p10, %p2900_p6 }
  0xe8   : > { %2908 = shalt.err (!%p2905_p13)
}
  0xe9   : > { %s2909_s14 = scalar_lea.vmem %s450_s9, 512  ;;  %p2917_p8 = scmp.lt.s32.totalorder %s450_s9, %s450_s9 }
  0xea   : > { %p2910_p4 = scmp.ne.s32.totalorder %s450_s9, %s2909_s14  ;;  %p2918_p9 = scmp.lt.s32.totalorder %s2909_s14, %s2909_s14 }
  0xec   : > { %p2912_p3 = pnand %p2910_p4, %p4014_p11  ;;  %p2919_p1 = por %p2918_p9, %p2917_p8 }
  0xee   : > { %p2913_p5 = pneg %p2912_p3 }
  0xf0   : > { %p2920_p2 = pnand %p2919_p1, %p2913_p5 }
  0xf2   : > { %2923 = shalt.err (!%p2920_p2)
}
  0xf3   : > { %p4015_p7 = scmp.ne.s32.totalorder %s3989_s15, 0  ;;  %s3189_s20 = smov [#allocation18]  }
  0xf4   : > { %s478_s29 = sshll.u32 %s3189_s20, 4  ;;  %s3190_s5 = smov [#allocation21]   ;;  %s479_s29 = int_to_ptr.vmem [resolvable:$true] %s478_s29 }
  0xf5   : > { %2543 = dma.hbm_to_vmem [thread:$0]  (!%p4015_p7), %s4013_s6, 512, %s450_s9, [#allocation14], %s4012_s25, %s4012_s25, %s4011_s1  }
  0xf6   : > { %s504_s30 = sshll.u32 %s3190_s5, 4  ;;  %s4016_s7 = sld [smem:[#allocation49_spill]]  ;;  %s505_s30 = int_to_ptr.vmem [resolvable:$true] %s504_s30 }
  0xfc   : > { %s2924_s13 = scalar_lea.hbm %s4016_s7, 16 }
  0xfd   : > { %p2925_p0 = scmp.ne.s32.totalorder %s4016_s7, %s2924_s13  ;;  %p2931_p10 = scmp.lt.u32.totalorder %s2924_s13, %s4016_s7 }
  0xff   : > { %p2927_p12 = pnand %p2925_p0, %p4014_p11 }
 0x101   : > { %p2928_p6 = pneg %p2927_p12 }
 0x103   : > { %p2933_p13 = pnand %p2931_p10, %p2928_p6 }
 0x105   : > { %2936 = shalt.err (!%p2933_p13)
}
 0x106   : > { %s2937_s9 = scalar_lea.vmem %s479_s29, 16  ;;  %s2944_s10 = scalar_lea.vmem %s479_s29, 32 }
 0x107   : > { %p2938_p4 = scmp.ne.s32.totalorder %s479_s29, %s2937_s9  ;;  %p2945_p8 = scmp.lt.s32.totalorder %s479_s29, %s479_s29 }
 0x108   : > { %p2946_p9 = scmp.lt.s32.totalorder %s2944_s10, %s2937_s9 }
 0x109   : > { %p2940_p3 = pnand %p2938_p4, %p4014_p11 }
 0x10a   : > { %p2947_p1 = por %p2946_p9, %p2945_p8 }
 0x10b   : > { %p2941_p5 = pneg %p2940_p3 }
 0x10d   : > { %p2948_p2 = pnand %p2947_p1, %p2941_p5 }
 0x10f   : > { %2951 = shalt.err (!%p2948_p2)
}
 0x110   : > { %2549 = dma.hbm_to_vmem [thread:$0]  (!%p4015_p7), %s4016_s7, 16, %s479_s29, [#allocation17]  }
 0x111   : > { %s4017_s5 = sld [smem:[#allocation51_spill]] }
 0x117   : > { %s2952_s16 = scalar_lea.hbm %s4017_s5, 512 }
 0x118   : > { %p2953_p0 = scmp.ne.s32.totalorder %s4017_s5, %s2952_s16  ;;  %p2959_p10 = scmp.lt.u32.totalorder %s2952_s16, %s4017_s5 }
 0x11a   : > { %p2955_p12 = pnand %p2953_p0, %p4014_p11 }
 0x11c   : > { %p2956_p6 = pneg %p2955_p12 }
 0x11e   : > { %p2961_p13 = pnand %p2959_p10, %p2956_p6 }
 0x120   : > { %2964 = shalt.err (!%p2961_p13)
}
 0x121   : > { %s2965_s10 = scalar_lea.vmem %s505_s30, 512  ;;  %p2973_p8 = scmp.lt.s32.totalorder %s505_s30, %s505_s30 }
 0x122   : > { %p2966_p4 = scmp.ne.s32.totalorder %s505_s30, %s2965_s10  ;;  %p2974_p9 = scmp.lt.s32.totalorder %s2965_s10, %s2965_s10 }
 0x124   : > { %p2968_p3 = pnand %p2966_p4, %p4014_p11  ;;  %p2975_p1 = por %p2974_p9, %p2973_p8 }
 0x126   : > { %p2969_p5 = pneg %p2968_p3 }
 0x128   : > { %p2976_p2 = pnand %p2975_p1, %p2969_p5 }
 0x12a   : > { %2979 = shalt.err (!%p2976_p2)
}
 0x12b   : > { %2555 = dma.hbm_to_vmem [thread:$0]  (!%p4015_p7), %s4017_s5, 512, %s505_s30, [#allocation20], %s4012_s25, %s4012_s25, %s4011_s1  }
 0x12c   : > { %s3191_s18 = smov [#allocation22]   ;;  %s4018_s14 = sld [smem:[#allocation43_spill]] }
 0x12d   : > { %s518_s21 = sshll.u32 %s3191_s18, 4  ;;  %s4019_s10 = sld [smem:[#allocation52_spill]]  ;;  %s519_s21 = int_to_ptr.vmem [resolvable:$true] %s518_s21 }
 0x132   : > { %s3620_s13 = scalar_lea.hbm %s4018_s14, %s3459_s2 }
 0x133   : > { %s2980_s6 = scalar_lea.hbm %s4019_s10, 16 }
 0x134   : > { %p2981_p0 = scmp.ne.s32.totalorder %s4019_s10, %s2980_s6  ;;  %p2987_p10 = scmp.lt.u32.totalorder %s2980_s6, %s4019_s10 }
 0x136   : > { %p2983_p12 = pnand %p2981_p0, %p4014_p11 }
 0x138   : > { %p2984_p6 = pneg %p2983_p12 }
 0x13a   : > { %p2989_p13 = pnand %p2987_p10, %p2984_p6 }
 0x13c   : > { %2992 = shalt.err (!%p2989_p13)
}
 0x13d   : > { %s2993_s30 = scalar_lea.vmem %s519_s21, 16  ;;  %s3000_s29 = scalar_lea.vmem %s519_s21, 32 }
 0x13e   : > { %p2994_p4 = scmp.ne.s32.totalorder %s519_s21, %s2993_s30  ;;  %p3001_p8 = scmp.lt.s32.totalorder %s519_s21, %s519_s21 }
 0x13f   : > { %p3002_p9 = scmp.lt.s32.totalorder %s3000_s29, %s2993_s30 }
 0x140   : > { %p2996_p3 = pnand %p2994_p4, %p4014_p11 }
 0x141   : > { %p3003_p1 = por %p3002_p9, %p3001_p8 }
 0x142   : > { %p2997_p5 = pneg %p2996_p3 }
 0x144   : > { %p3004_p2 = pnand %p3003_p1, %p2997_p5 }
 0x146   : > { %3007 = shalt.err (!%p3004_p2)
}
 0x147   : > { %2558 = dma.hbm_to_vmem [thread:$0]  (!%p4015_p7), %s4019_s10, 16, %s519_s21, [#allocation23]  }
 0x148   : > { %s549_s6 = scalar_lea.vmem [#allocation9], %s3456_s17  ;;  %s4020_s20 = sld [smem:[#allocation44_spill]] }
 0x149   : > { %s556_s12 = sshll.u32 %s549_s6, 4  ;;  %s3008_s15 = scalar_lea.hbm %s3620_s13, 16  ;;  %s557_s12 = int_to_ptr.vmem [resolvable:$true] %s556_s12 }
 0x14a   : > { %p3009_p11 = scmp.ne.s32.totalorder %s3620_s13, %s3008_s15  ;;  %p4021_p0 = scmp.ne.s32.totalorder %s4003_s8, 0 }
 0x14b   : > { %s3013_s1 = scalar_lea.hbm %s4018_s14, 32  ;;  %p3014_p7 = scmp.lt.u32.totalorder %s3620_s13, %s4018_s14 }
 0x14c   : > { %p3011_p12 = pnand %p3009_p11, %p4021_p0  ;;  %p3015_p10 = scmp.lt.u32.totalorder %s3013_s1, %s3008_s15 }
 0x14d   : > { %p3017_p4 = scmp.lt.u32.totalorder %s3008_s15, %s3620_s13 }
 0x14e   : > { %s3645_s16 = scalar_lea.hbm %s4020_s20, %s3459_s2  ;;  %p3012_p6 = pneg %p3011_p12 }
 0x14f   : > { %p3016_p13 = por %p3015_p10, %p3014_p7 }
 0x151   : > { %p3018_p3 = por %p3017_p4, %p3016_p13 }
 0x153   : > { %p3019_p5 = pnand %p3018_p3, %p3012_p6 }
 0x155   : > { %3022 = shalt.err (!%p3019_p5)
}
 0x156   : > { %s3023_s2 = scalar_lea.vmem %s557_s12, 16  ;;  %s3192_s21 = smov [#allocation9]  }
 0x157   : > { %p3024_p8 = scmp.ne.s32.totalorder %s557_s12, %s3023_s2  ;;  %s3028_s29 = sshll.u32 %s3192_s21, 4  ;;  %s3029_s29 = int_to_ptr.vmem [resolvable:$false] %s3028_s29 }
 0x158   : > { %s3030_s11 = scalar_lea.vmem %s3029_s29, 32  ;;  %p3031_p2 = scmp.lt.s32.totalorder %s557_s12, %s3029_s29 }
 0x159   : > { %p3026_p9 = pnand %p3024_p8, %p4021_p0  ;;  %p3032_p11 = scmp.lt.s32.totalorder %s3030_s11, %s3023_s2 }
 0x15b   : > { %p3027_p1 = pneg %p3026_p9  ;;  %p3033_p12 = por %p3032_p11, %p3031_p2 }
 0x15d   : > { %p3034_p7 = pnand %p3033_p12, %p3027_p1 }
 0x15f   : > { %3037 = shalt.err (!%p3034_p7)
}
 0x160   : > { %p4022_p10 = scmp.ne.s32.totalorder %s4002_s19, 0  ;;  %s566_s7 = scalar_lea.vmem [#allocation10], %s3456_s17 }
 0x161   : > { %s573_s6 = sshll.u32 %s566_s7, 4  ;;  %s4023_s23 = sand.u32 1, %s3178_s26   ;;  %s574_s6 = int_to_ptr.vmem [resolvable:$true] %s573_s6 }
 0x162   : > { %2565 = dma.hbm_to_vmem [thread:$0]  (!%p4022_p10), %s3620_s13, 16, %s557_s12, %s3476_s3  }
 0x163   : > { %s564_s18 = scalar_lea.sflag [#allocation11], %s4023_s23  ;;  %s3038_s15 = scalar_lea.hbm %s3645_s16, 16 }
 0x164   : > { %p3039_p6 = scmp.ne.s32.totalorder %s3645_s16, %s3038_s15  ;;  %s3043_s1 = scalar_lea.hbm %s4020_s20, 32 }
 0x165   : > { %p3044_p3 = scmp.lt.u32.totalorder %s3645_s16, %s4020_s20  ;;  %p3045_p5 = scmp.lt.u32.totalorder %s3043_s1, %s3038_s15 }
 0x166   : > { %p3041_p13 = pnand %p3039_p6, %p4021_p0  ;;  %p3047_p9 = scmp.lt.u32.totalorder %s3038_s15, %s3645_s16 }
 0x167   : > { %p3046_p8 = por %p3045_p5, %p3044_p3 }
 0x168   : > { %p3042_p4 = pneg %p3041_p13 }
 0x169   : > { %p3048_p1 = por %p3047_p9, %p3046_p8 }
 0x16b   : > { %p3049_p2 = pnand %p3048_p1, %p3042_p4 }
 0x16d   : > { %3052 = shalt.err (!%p3049_p2)
}
 0x16e   : > { %s3053_s3 = scalar_lea.vmem %s574_s6, 16  ;;  %s3193_s17 = smov [#allocation10]  }
 0x16f   : > { %p3054_p11 = scmp.ne.s32.totalorder %s574_s6, %s3053_s3  ;;  %s3058_s13 = sshll.u32 %s3193_s17, 4  ;;  %s3059_s13 = int_to_ptr.vmem [resolvable:$false] %s3058_s13 }
 0x170   : > { %s3060_s12 = scalar_lea.vmem %s3059_s13, 32  ;;  %p3061_p6 = scmp.lt.s32.totalorder %s574_s6, %s3059_s13 }
 0x171   : > { %p3056_p12 = pnand %p3054_p11, %p4021_p0  ;;  %p3062_p13 = scmp.lt.s32.totalorder %s3060_s12, %s3053_s3 }
 0x173   : > { %p3057_p7 = pneg %p3056_p12  ;;  %p3063_p10 = por %p3062_p13, %p3061_p6 }
 0x175   : > { %p3064_p3 = pnand %p3063_p10, %p3057_p7 }
 0x177   : > { %3067 = shalt.err (!%p3064_p3)
}
 0x178   : > { %p4024_p5 = scmp.ne.s32.totalorder %s4002_s19, 0  ;;  %p4025_p4 = scmp.ne.s32.totalorder %s3988_s28, 0 }
 0x179   : > { %p4026_p8 = scmp.ne.s32.totalorder (!%p4025_p4), %s4006_s4, 0 }
 0x17a   : > { %2568 = dma.hbm_to_vmem [thread:$0]  (!%p4024_p5), %s3645_s16, 16, %s574_s6, %s564_s18  }
 0x17b   : > { %582 = sbr.rel (%p4025_p4) target bundleno = 3678 (0xe5e), region = 68 }
 0x182   : > { %3121 = dma.done.wait (%p4026_p8), [#allocation5], 256  }
 0x183   : > { %3123 = vsyncadd (%p4026_p8), [#allocation5], 4294967040  ;;  %s588_s8 = sand.u32 1, %s3299_s27   ;;  %s3693_s2 = sand.u32 1, %s3162_s22  }
 0x184   : > { %s589_s21 = scalar_lea.sflag [#allocation8], %s588_s8  ;;  %s591_s19 = scalar_lea.vmem [#allocation7], %s3693_s2 }
 0x185   : > { %3125 = dma.done.wait (%p4026_p8), %s589_s21, 32  }
 0x186   : > { %3127 = vsyncadd (%p4026_p8), %s589_s21, 4294967264  ;;  %s599_s28 = scalar_lea.vmem [#allocation9], %s3693_s2  ;;  %s605_s16 = scalar_lea.sflag [#allocation11], %s588_s8 }
 0x187   : > { %s607_s29 = scalar_lea.vmem [#allocation10], %s3693_s2 }
 0x188   : > { %3129 = dma.done.wait (%p4026_p8), %s605_s16, 16  }
 0x189   : > { %3131 = vsyncadd (%p4026_p8), %s605_s16, 4294967280  ;;  %p4027_p0 = scmp.eq.s32.totalorder %s3299_s27, 0 }
 0x18b   : > { %3133 = dma.done.wait (%p4027_p0), [#allocation11], 512   ;;  %p4028_p10 = pmov %p4027_p0 }
 0x18c   : > { %p4029_p9 = pmov %p4027_p0 }
 0x18d   : > { %3135 = vsyncadd (%p4028_p10), [#allocation11], 4294966784 }
 0x18e   : > { %3137 = dma.done.wait (%p4029_p9), [#allocation14], 1024   ;;  %p4030_p1 = pmov %p4027_p0 }
 0x18f   : > { %p4031_p2 = pmov %p4027_p0 }
 0x190   : > { %3139 = vsyncadd (%p4030_p1), [#allocation14], 4294966272 }
 0x191   : > { %3141 = dma.done.wait (%p4031_p2), [#allocation17], 32   ;;  %p4032_p11 = pmov %p4027_p0 }
 0x192   : > { %p4033_p12 = pmov %p4027_p0 }
 0x193   : > { %3143 = vsyncadd (%p4032_p11), [#allocation17], 4294967264 }
 0x194   : > { %3145 = dma.done.wait (%p4033_p12), [#allocation20], 528   ;;  %p4034_p7 = pmov %p4027_p0 }
 0x195   : > { %p4035_p6 = pmov %p4027_p0 }
 0x196   : > { %3147 = vsyncadd (%p4034_p7), [#allocation20], 4294966768 }
 0x197   : > { %3149 = dma.done.wait (%p4035_p6), [#allocation23], 16   ;;  %p4036_p13 = pmov %p4027_p0 }
 0x198   : > { %vm693_vm0 = vcmask 261120   ;;  %v3726_v0 = vld [vmem:[#allocation4] sm:$0xff]  ;;  %v3728_v1 = vld [vmem:[#allocation4 + $0x8] sm:$0xff]  ;;  %v746_v14 = vld [vmem:[#allocation12] sm:$0xff]  ;;  %v724_v31 = vlaneseq  ;;  %vm1011_vm1 = vcmask 64512   ;;  %vm1099_vm3 = vcmask 130048  }
 0x199   : > { %3151 = vsyncadd (%p4036_p13), [#allocation23], 4294967280  ;;  %v694_v2 = vsel %vm693_vm0, %v3726_v0, 0.0  ;;  %v697_v3 = vsel %vm693_vm0, %v3728_v1, 0.0  ;;  %v747_v15 = vld [vmem:[#allocation12 + $0x8] sm:$0xff]  ;;  %v839_v17 = vld [vmem:[#allocation13] sm:$0xff] }
 0x19a   : > { %695 = vadd.xlane.f32.xlu0 %v694_v2  ;;  %v2417_v16 = vpack.c.bf16 %v747_v15, %v746_v14  ;;  %v840_v18 = vld [vmem:[#allocation13 + $0x8] sm:$0xff]  ;;  %v748_v20 = vld [vmem:[#allocation12 + $0x10] sm:$0xff]  ;;  %v749_v21 = vld [vmem:[#allocation12 + $0x18] sm:$0xff]  ;;  %v725_v35 = vshrl.u32 %v724_v31, 7  ;;  %s3194_s27 = smov 120   ;;  %s3195_s4 = smov 112  }
 0x19b   : > { %v2425_v19 = vpack.c.bf16 %v840_v18, %v839_v17  ;;  %v2421_v22 = vpack.c.bf16 %v749_v21, %v748_v20  ;;  %v841_v23 = vld [vmem:[#allocation13 + $0x10] sm:$0xff]  ;;  %v842_v24 = vld [vmem:[#allocation13 + $0x18] sm:$0xff]  ;;  %v925_v26 = vld [vmem:[#allocation15] sm:$0xff]  ;;  %s3196_s11 = smov 104   ;;  %s3197_s7 = smov 8   ;;  %vm1833_vm4 = vcmask 195584  }
 0x19c   : > { %2418 = vmatprep.subr.bf16.mxu0 %v2417_v16  ;;  %v2429_v25 = vpack.c.bf16 %v842_v24, %v841_v23  ;;  %v926_v27 = vld [vmem:[#allocation15 + $0x8] sm:$0xff]  ;;  %v726_v39 = vsub.s32 0, %v725_v35  ;;  %v927_v51 = vld [vmem:[#allocation15 + $0x10] sm:$0xff]  ;;  %v928_v52 = vld [vmem:[#allocation15 + $0x18] sm:$0xff]  ;;  %s3198_s6 = smov 16   ;;  %s3200_s23 = smov 24  }
 0x19d   : > { %2420 = vmatpush3.bf16.msra.mxu0 %v2417_v16  ;;  %2426 = vmatprep.subr.bf16.mxu1 %v2425_v19  ;;  %v2433_v28 = vpack.c.bf16 %v926_v27, %v925_v26  ;;  %v721_v36 = vld [vmem:[%s599_s28] sm:$0x1]  ;;  %v2437_v53 = vpack.c.bf16 %v928_v52, %v927_v51  ;;  %v2220_v55 = vld [vmem:[#allocation18] ss:$0 sm:$0xff]  ;;  %v2217_v56 = vld [vmem:[#allocation16] ss:$0 sm:$0xff] }
 0x19e   : > { %698 = vadd.xlane.f32.xlu0 %v697_v3  ;;  %2428 = vmatpush3.bf16.msra.mxu1 %v2425_v19  ;;  %v722_v38 = vadd.f32 1.0, %v721_v36  ;;  %v2216_v43 = vld [vmem:[%s591_s19] ss:$0 sm:$0xff]  ;;  %vm3754_vm2 = vmpackc.low %vm1011_vm1, %vm1011_vm1  ;;  %s2215_s18 = sshll.u32 %s3693_s2, 4  ;;  %s4039_s15 = sld [smem:[#allocation38_spill]] }
 0x19f   : > { %2422 = vmatprep.subr.bf16.mxu0 %v2421_v22  ;;  %2430 = vmatprep.subr.bf16.mxu1 %v2429_v25  ;;  %s686_s0 = scalar_lea.vmem [#allocation24], %s2215_s18  ;;  %s4040_s1 = sshll.u32 %s3170_s24, 8 }
 0x1a0   : > { %v727_v40 = vrot.slane %v722_v38, %v726_v39  ;;  %s1970_s9 = sshll.u32 %s686_s0, 4  ;;  %s4041_s3 = sld [smem:[#allocation53_spill]]  ;;  %s3871_s9 = int_to_ptr.vmem [resolvable:$true] %s1970_s9 }
 0x1a1   : > { %2424 = vmatpush3.bf16.msra.mxu0 %v2421_v22  ;;  %s1957_s13 = scalar_lea.sflag [#allocation6], %s3693_s2  ;;  %s3068_s12 = scalar_lea.vmem %s3871_s9, 256 }
 0x1a2   : > { %2432 = vmatpush3.bf16.msra.mxu1 %v2429_v25  ;;  %2434 = vmatprep.subr.bf16.mxu0 %v2433_v28  ;;  %p3069_p3 = scmp.ne.s32.totalorder %s3871_s9, %s3068_s12  ;;  %s3201_s24 = smov [#allocation24]  }
 0x1a3   : > { %s3072_s8 = sshll.u32 %s3201_s24, 4  ;;  %s3073_s8 = int_to_ptr.vmem [resolvable:$false] %s3072_s8 }
 0x1a4   : > { %p4042_p5 = scmp.ne.s32.totalorder %s4039_s15, 0  ;;  %s3074_s21 = scalar_lea.vmem %s3073_s8, 512 }
 0x1a5   : > { %p3075_p0 = scmp.lt.s32.totalorder %s3871_s9, %s3073_s8  ;;  %p3076_p10 = scmp.lt.s32.totalorder %s3074_s21, %s3068_s12 }
 0x1a6   : > { %s3868_s17 = scalar_lea.hbm %s4041_s3, %s4040_s1  ;;  %p3070_p4 = pnand %p3069_p3, %p4042_p5 }
 0x1a7   : > { %p3077_p9 = por %p3076_p10, %p3075_p0 }
 0x1a8   : > { %p3071_p8 = pneg %p3070_p4 }
 0x1aa   : > { %p3078_p1 = pnand %p3077_p9, %p3071_p8 }
 0x227   : > { %v696_v4 = vpop.xlane.xlu0 %695 }
 0x228   : > { %v701_v5 = vmul.f32 0.03125, %v696_v4 }
 0x22a   : > { %v703_v6 = vsub.f32 %v3726_v0, %v701_v5  ;;  %v2223_v5 = vld [vmem:[#allocation19] ss:$0 sm:$0xff] }
 0x22b   : > { %v699_v7 = vpop.xlane.xlu0 %698 }
 0x22c   : > { %v702_v8 = vmul.f32 0.03125, %v699_v7  ;;  %v705_v9 = vmul.f32 %v703_v6, %v703_v6 }
 0x22e   : > { %v704_v10 = vsub.f32 %v3728_v1, %v702_v8  ;;  %v707_v11 = vsel %vm693_vm0, %v705_v9, 0.0 }
 0x22f   : > { %708 = vadd.xlane.f32.xlu1 %v707_v11 }
 0x230   : > { %v706_v12 = vmul.f32 %v704_v10, %v704_v10 }
 0x232   : > { %v710_v13 = vsel %vm693_vm0, %v706_v12, 0.0 }
 0x233   : > { %711 = vadd.xlane.f32.xlu1 %v710_v13 }
 0x2bc   : > { %v709_v29 = vpop.xlane.xlu1 %708 }
 0x2bd   : > { %v713_v30 = vmul.f32 0.03125, %v709_v29 }
 0x2bf   : > { %v715_v32 = vadd.f32 1e-06, %v713_v30 }
 0x2c0   : > { %v712_v33 = vpop.xlane.xlu1 %711 }
 0x2c1   : > { %2688 = vrsqrt.f32 %v715_v32  ;;  %v714_v34 = vmul.f32 0.03125, %v712_v33 }
 0x2c3   : > { %v716_v37 = vadd.f32 1e-06, %v714_v34 }
 0x2c5   : > { %2690 = vrsqrt.f32 %v716_v37 }
 0x2cb   : > { %v2689_v41 = vpop.eup %2688 }
 0x2cc   : > { %v719_v42 = vmul.f32 %v2689_v41, %v703_v6 }
 0x2ce   : > { %v729_v44 = vmul.f32 %v727_v40, %v719_v42 }
 0x2cf   : > { %v2691_v45 = vpop.eup %2690 }
 0x2d0   : > { %v738_v46 = vadd.f32 %v2216_v43, %v729_v44  ;;  %v720_v47 = vmul.f32 %v2691_v45, %v704_v10 }
 0x2d2   : > { %740 = vst.msk [vmem:[#allocation2] sm:$0xff] %vm693_vm0, %v738_v46  ;;  %v730_v48 = vmul.f32 %v727_v40, %v720_v47 }
 0x2d4   : > { %v739_v49 = vadd.f32 %v2216_v43, %v730_v48 }
 0x2d6   : > { %741 = vst.msk [vmem:[#allocation2 + $0x8] sm:$0xff] %vm693_vm0, %v739_v49 }
 0x2d9   : > { %v744_v50 = vld [vmem:[#allocation2] sm:$0xff] }
 0x2da   : > { %2325 = vmatprep.mubr.msk.f32.mxu0 %vm693_vm0, %v744_v50  ;;  %2336 = vmatprep.mubr.msk.f32.mxu1 %vm693_vm0, %v744_v50 }
 0x2dd   : > { %v745_v54 = vld [vmem:[#allocation2 + $0x8] sm:$0xff] }
 0x2de   : > { %2326 = vmatmul.mubr.msk.f32.vlgmr.msra.gmra.mrb[0].mxu0 %vm693_vm0, %v745_v54  ;;  %2337 = vmatmul.mubr.msk.f32.vlgmr.msra.gmra.mrb[0].mxu1 %vm693_vm0, %v745_v54 }
 0x2df   : > { %2436 = vmatpush3.bf16.msra.mxu0 %v2433_v28  ;;  %2347 = vmatprep.mubr.msk.f32.mxu0 %vm693_vm0, %v744_v50 }
 0x2e0   : > { %2438 = vmatprep.subr.bf16.mxu0 %v2437_v53 }
 0x2e3   : > { %2440 = vmatpush3.bf16.msra.mxu0 %v2437_v53 }
 0x2e6   : > { %2348 = vmatmul.mubr.msk.f32.vlgmr.msra.gmra.mrb[2].mxu0 %vm693_vm0, %v745_v54 }
 0x3b1   : > { %v2327_v57 = vpop.f32.mrb[0].mxu0  ;;  %v2338_v58 = vpop.f32.mrb[0].mxu1 }
 0x3b2   : > { %v922_v59 = vadd.f32 %v2338_v58, %v2220_v55  ;;  %v830_v60 = vpop.f32.mrb[1].mxu0  ;;  %v916_v61 = vpop.f32.mrb[1].mxu1  ;;  %v3766_v10 = vadd.f32 %v2327_v57, %v2217_v56 }
 0x3b3   : > { %v3750_v62 = vadd.f32 %v2217_v56, %v830_v60  ;;  %v917_v63 = vadd.f32 %v2220_v55, %v916_v61 }
 0x3b5   : > { %2354 = vmatprep.mubr.msk.f32.mxu1 %vm1011_vm1, %v3750_v62  ;;  %v2441_v3 = vpack.c.bf16 %v922_v59, %v917_v63  ;;  %v3760_v4 = vpack.i.bf16 %v922_v59, %v917_v63 }
 0x3b7   : > { %2443 = vmatprep.subr.msk.bf16.mxu1 %vm3754_vm2, %v2441_v3 }
 0x3b8   : > { %2446 = vmatpush3.bf16.xpose.msk.msra.mxu1 %vm3754_vm2, %v2441_v3 }
 0x3b9   : > { %v2349_v6 = vpop.f32.mrb[2].mxu0 }
 0x3ba   : > { %v1008_v7 = vadd.f32 %v2349_v6, %v2223_v5  ;;  %v1002_v8 = vpop.f32.mrb[3].mxu0 }
 0x3bb   : > { %v1003_v9 = vadd.f32 %v2223_v5, %v1002_v8 }
 0x3bd   : > { %v2447_v11 = vpack.c.bf16 %v1008_v7, %v1003_v9  ;;  %v3768_v12 = vpack.i.bf16 %v1008_v7, %v1003_v9 }
 0x3bf   : > { %2448 = vmatprep.subr.bf16.mxu1 %v2447_v11  ;;  %2355 = vmatmul.mubr.msk.f32.vlgmr.msra.gmra.mrb[2].mxu1 %vm1011_vm1, %v3766_v10 }
 0x3c0   : > { %2450 = vmatpush3.bf16.msra.mxu1 %v2447_v11 }
 0x492   : > { %v2356_v13 = vpop.f32.mrb[2].mxu1 }
 0x493   : > { %v1090_v14 = vpop.f32.mrb[3].mxu1  ;;  %v1103_v15 = vsel %vm1099_vm3, %v2356_v13, -inf }
 0x494   : > { %1104 = vmax.xlane.f32.xlu1 %v1103_v15  ;;  %v1100_v16 = vsel %vm1099_vm3, %v1090_v14, -inf }
 0x495   : > { %1101 = vmax.xlane.f32.xlu0 %v1100_v16 }
 0x521   : > { %v1105_v17 = vpop.xlane.xlu1 %1104 }
 0x522   : > { %v1107_v18 = vsub.f32 %v2356_v13, %v1105_v17  ;;  %v1102_v19 = vpop.xlane.xlu0 %1101 }
 0x523   : > { %v1106_v20 = vsub.f32 %v1090_v14, %v1102_v19 }
 0x524   : > { %v1110_v21 = vmul.f32 1.442695, %v1107_v18 }
 0x525   : > { %v1108_v22 = vmul.f32 1.442695, %v1106_v20 }
 0x526   : > { %2692 = vpow2.f32 %v1110_v21 }
 0x527   : > { %2694 = vpow2.f32 %v1108_v22 }
 0x530   : > { %v2693_v23 = vpop.eup %2692 }
 0x531   : > { %v2695_v24 = vpop.eup %2694  ;;  %v1115_v25 = vsel %vm1099_vm3, %v2693_v23, 0.0 }
 0x532   : > { %1116 = vadd.xlane.f32.xlu1 %v1115_v25  ;;  %v1112_v26 = vsel %vm1099_vm3, %v2695_v24, 0.0 }
 0x533   : > { %1113 = vadd.xlane.f32.xlu0 %v1112_v26 }
 0x543   : > { %1203 = vrot.lane.b32.xlu1 %v3750_v62, %s3194_s27 }
 0x547   : > { %1205 = vrot.lane.b32.xlu1 %v3766_v10, %s3194_s27 }
 0x549   : > { %2659 = vrot.lane.b32.xlu0 %v3760_v4, %s3194_s27 }
 0x5bf   : > { %v1117_v27 = vpop.xlane.xlu1 %1116 }
 0x5c0   : > { %2696 = vrcp.f32 %v1117_v27  ;;  %v1114_v28 = vpop.xlane.xlu0 %1113 }
 0x5c1   : > { %2698 = vrcp.f32 %v1114_v28 }
 0x5c3   : > { %v1204_v37 = vpop.permute.xlu1 %1203 }
 0x5c4   : > { %v2660_v29 = vpop.permute.xlu0 %2659 }
 0x5c5   : > { %v2662_v30 = vunpack.i.h.bf16 %v2660_v29  ;;  %v2661_v31 = vunpack.i.l.bf16 %v2660_v29 }
 0x5c7   : > { %v2451_v32 = vpack.c.bf16 %v2662_v30, %v2661_v31  ;;  %v1206_v38 = vpop.permute.xlu1 %1205 }
 0x5c9   : > { %2453 = vmatprep.subr.msk.bf16.mxu1 %vm3754_vm2, %v2451_v32 }
 0x5ca   : > { %v2697_v33 = vpop.eup %2696 }
 0x5cb   : > { %v2699_v34 = vpop.eup %2698  ;;  %v1121_v36 = vmul.f32 %v2697_v33, %v2693_v23 }
 0x5cc   : > { %v1120_v35 = vmul.f32 %v2699_v34, %v2695_v24 }
 0x5ce   : > { %2361 = vmatprep.mubr.msk.f32.mxu1 %vm1099_vm3, %v1120_v35 }
 0x5cf   : > { %2362 = vmatmul.mubr.msk.f32.vlgmr.msra.gmra.mrb[4].mxu1 %vm1099_vm3, %v1121_v36 }
 0x5d0   : > { %2456 = vmatpush3.bf16.xpose.msk.msra.mxu1 %vm3754_vm2, %v2451_v32  ;;  %2368 = vmatprep.mubr.msk.f32.mxu1 %vm1011_vm1, %v1204_v37 }
 0x5d7   : > { %2369 = vmatmul.mubr.msk.f32.vlgmr.msra.gmra.mrb[6].mxu1 %vm1011_vm1, %v1206_v38 }
 0x6a2   : > { %v3790_v39 = vpop.f32.mrb[4].mxu1 }
 0x6a3   : > { %v3792_v40 = vpop.f32.mrb[5].mxu1 }
 0x6aa   : > { %v2370_v41 = vpop.f32.mrb[6].mxu1 }
 0x6ab   : > { %v1285_v42 = vpop.f32.mrb[7].mxu1  ;;  %v1297_v43 = vsel %vm1099_vm3, %v2370_v41, -inf }
 0x6ac   : > { %1298 = vmax.xlane.f32.xlu0 %v1297_v43  ;;  %v1294_v44 = vsel %vm1099_vm3, %v1285_v42, -inf }
 0x6ad   : > { %1295 = vmax.xlane.f32.xlu1 %v1294_v44 }
 0x6be   : > { %2664 = vrot.lane.b32.xlu1 %v3768_v12, %s3194_s27 }
 0x6c2   : > { %1405 = vrot.lane.b32.xlu1 %v3750_v62, %s3195_s4 }
 0x6c6   : > { %1407 = vrot.lane.b32.xlu1 %v3766_v10, %s3195_s4 }
 0x739   : > { %v1299_v45 = vpop.xlane.xlu0 %1298 }
 0x73a   : > { %v1301_v46 = vsub.f32 %v2370_v41, %v1299_v45  ;;  %v1296_v47 = vpop.xlane.xlu1 %1295 }
 0x73b   : > { %v1300_v48 = vsub.f32 %v1285_v42, %v1296_v47 }
 0x73c   : > { %v1304_v49 = vmul.f32 1.442695, %v1301_v46 }
 0x73d   : > { %v1302_v50 = vmul.f32 1.442695, %v1300_v48 }
 0x73e   : > { %2700 = vpow2.f32 %v1304_v49  ;;  %v2665_v51 = vpop.permute.xlu1 %2664 }
 0x73f   : > { %v2667_v52 = vunpack.i.h.bf16 %v2665_v51  ;;  %v2666_v53 = vunpack.i.l.bf16 %v2665_v51  ;;  %2702 = vpow2.f32 %v1302_v50 }
 0x741   : > { %v2457_v54 = vpack.c.bf16 %v2667_v52, %v2666_v53 }
 0x742   : > { %v1406_v11 = vpop.permute.xlu1 %1405 }
 0x743   : > { %2458 = vmatprep.subr.bf16.mxu0 %v2457_v54 }
 0x744   : > { %2460 = vmatpush3.bf16.msra.mxu0 %v2457_v54 }
 0x746   : > { %v1408_v13 = vpop.permute.xlu1 %1407 }
 0x748   : > { %v2701_v55 = vpop.eup %2700 }
 0x749   : > { %v1309_v56 = vsel %vm1099_vm3, %v2701_v55, 0.0  ;;  %v2703_v57 = vpop.eup %2702 }
 0x74a   : > { %1310 = vadd.xlane.f32.xlu0 %v1309_v56  ;;  %v1306_v58 = vsel %vm1099_vm3, %v2703_v57, 0.0 }
 0x74e   : > { %1307 = vadd.xlane.f32.xlu0 %v1306_v58 }
 0x764   : > { %2669 = vrot.lane.b32.xlu0 %v3760_v4, %s3195_s4 }
 0x7d7   : > { %v1311_v59 = vpop.xlane.xlu0 %1310 }
 0x7d8   : > { %2704 = vrcp.f32 %v1311_v59 }
 0x7db   : > { %v1308_v60 = vpop.xlane.xlu0 %1307 }
 0x7dc   : > { %2706 = vrcp.f32 %v1308_v60 }
 0x7df   : > { %v2670_v61 = vpop.permute.xlu0 %2669 }
 0x7e0   : > { %v2672_v63 = vunpack.i.h.bf16 %v2670_v61  ;;  %v2671_v3 = vunpack.i.l.bf16 %v2670_v61 }
 0x7e2   : > { %v2461_v5 = vpack.c.bf16 %v2672_v63, %v2671_v3  ;;  %v2705_v6 = vpop.eup %2704 }
 0x7e3   : > { %v1315_v9 = vmul.f32 %v2705_v6, %v2701_v55 }
 0x7e4   : > { %2463 = vmatprep.subr.msk.bf16.mxu0 %vm3754_vm2, %v2461_v5 }
 0x7e6   : > { %v2707_v7 = vpop.eup %2706 }
 0x7e7   : > { %v1314_v8 = vmul.f32 %v2707_v7, %v2703_v57 }
 0x7e9   : > { %2375 = vmatprep.mubr.msk.f32.mxu0 %vm1099_vm3, %v1314_v8 }
 0x7ea   : > { %2376 = vmatmul.mubr.msk.f32.vlgmr.msra.gmra.mrb[4].mxu0 %vm1099_vm3, %v1315_v9 }
 0x7eb   : > { %2466 = vmatpush3.bf16.xpose.msk.msra.mxu0 %vm3754_vm2, %v2461_v5  ;;  %2382 = vmatprep.mubr.msk.f32.mxu0 %vm1011_vm1, %v1406_v11  ;;  %v1838_v11 = vld [vmem:[#allocation21] sm:$0xff] }
 0x7f2   : > { %2383 = vmatmul.mubr.msk.f32.vlgmr.msra.gmra.mrb[6].mxu0 %vm1011_vm1, %v1408_v13  ;;  %v1839_v13 = vld [vmem:[#allocation21 + $0x8] sm:$0xff] }
 0x8bd   : > { %v2377_v14 = vpop.f32.mrb[4].mxu0 }
 0x8be   : > { %v3814_v15 = vpop.f32.mrb[5].mxu0 }
 0x8c5   : > { %v2384_v16 = vpop.f32.mrb[6].mxu0 }
 0x8c6   : > { %v1487_v17 = vpop.f32.mrb[7].mxu0  ;;  %v1499_v18 = vsel %vm1099_vm3, %v2384_v16, -inf }
 0x8c7   : > { %1500 = vmax.xlane.f32.xlu0 %v1499_v18  ;;  %v1496_v19 = vsel %vm1099_vm3, %v1487_v17, -inf }
 0x8c8   : > { %1497 = vmax.xlane.f32.xlu1 %v1496_v19 }
 0x8d9   : > { %2674 = vrot.lane.b32.xlu1 %v3768_v12, %s3195_s4 }
 0x8dd   : > { %1605 = vrot.lane.b32.xlu1 %v3750_v62, %s3196_s11 }
 0x8e1   : > { %1607 = vrot.lane.b32.xlu1 %v3766_v10, %s3196_s11 }
 0x954   : > { %v1501_v20 = vpop.xlane.xlu0 %1500 }
 0x955   : > { %v1503_v21 = vsub.f32 %v2384_v16, %v1501_v20  ;;  %v1498_v22 = vpop.xlane.xlu1 %1497  ;;  %v2481_v16 = vpack.c.bf16 %v1839_v13, %v1838_v11 }
 0x956   : > { %v1502_v23 = vsub.f32 %v1487_v17, %v1498_v22  ;;  %v1841_v17 = vld [vmem:[#allocation21 + $0x18] sm:$0xff] }
 0x957   : > { %v1506_v24 = vmul.f32 1.442695, %v1503_v21 }
 0x958   : > { %v1504_v25 = vmul.f32 1.442695, %v1502_v23 }
 0x959   : > { %2708 = vpow2.f32 %v1506_v24  ;;  %v2675_v26 = vpop.permute.xlu1 %2674 }
 0x95a   : > { %v2677_v27 = vunpack.i.h.bf16 %v2675_v26  ;;  %v2676_v28 = vunpack.i.l.bf16 %v2675_v26  ;;  %2710 = vpow2.f32 %v1504_v25 }
 0x95c   : > { %v2467_v29 = vpack.c.bf16 %v2677_v27, %v2676_v28 }
 0x95d   : > { %v1606_v44 = vpop.permute.xlu1 %1605 }
 0x95e   : > { %2468 = vmatprep.subr.bf16.mxu1 %v2467_v29 }
 0x95f   : > { %2470 = vmatpush3.bf16.msra.mxu1 %v2467_v29 }
 0x963   : > { %v2709_v30 = vpop.eup %2708 }
 0x964   : > { %v1511_v62 = vsel %vm1099_vm3, %v2709_v30, 0.0  ;;  %v2711_v31 = vpop.eup %2710 }
 0x965   : > { %1512 = vadd.xlane.f32.xlu0 %v1511_v62  ;;  %v1508_v10 = vsel %vm1099_vm3, %v2711_v31, 0.0 }
 0x969   : > { %1509 = vadd.xlane.f32.xlu0 %v1508_v10 }
 0x97f   : > { %2679 = vrot.lane.b32.xlu0 %v3760_v4, %s3196_s11  ;;  %v1608_v4 = vpop.permute.xlu1 %1607 }
 0x9f2   : > { %v1513_v32 = vpop.xlane.xlu0 %1512 }
 0x9f3   : > { %2712 = vrcp.f32 %v1513_v32 }
 0x9f6   : > { %v1510_v33 = vpop.xlane.xlu0 %1509 }
 0x9f7   : > { %2714 = vrcp.f32 %v1510_v33 }
 0x9fa   : > { %v2680_v34 = vpop.permute.xlu0 %2679 }
 0x9fb   : > { %v2682_v35 = vunpack.i.h.bf16 %v2680_v34  ;;  %v2681_v36 = vunpack.i.l.bf16 %v2680_v34 }
 0x9fd   : > { %v2471_v37 = vpack.c.bf16 %v2682_v35, %v2681_v36  ;;  %v2713_v38 = vpop.eup %2712  ;;  %v2252_v35 = vld [vmem:[#allocation22] ss:$0 sm:$0xff] }
 0x9fe   : > { %v1517_v43 = vmul.f32 %v2713_v38, %v2709_v30 }
 0x9ff   : > { %2473 = vmatprep.subr.msk.bf16.mxu1 %vm3754_vm2, %v2471_v37 }
 0xa01   : > { %v2715_v41 = vpop.eup %2714 }
 0xa02   : > { %v1516_v42 = vmul.f32 %v2715_v41, %v2711_v31 }
 0xa04   : > { %2389 = vmatprep.mubr.msk.f32.mxu1 %vm1099_vm3, %v1516_v42 }
 0xa05   : > { %2390 = vmatmul.mubr.msk.f32.vlgmr.msra.gmra.mrb[8].mxu1 %vm1099_vm3, %v1517_v43 }
 0xa06   : > { %2476 = vmatpush3.bf16.xpose.msk.msra.mxu1 %vm3754_vm2, %v2471_v37  ;;  %2396 = vmatprep.mubr.msk.f32.mxu1 %vm1011_vm1, %v1606_v44  ;;  %v2253_v37 = vld [vmem:[%s607_s29] ss:$0 sm:$0xff] }
 0xa0d   : > { %2397 = vmatmul.mubr.msk.f32.vlgmr.msra.gmra.mrb[10].mxu1 %vm1011_vm1, %v1608_v4 }
 0xad8   : > { %v2391_v45 = vpop.f32.mrb[8].mxu1 }
 0xad9   : > { %v1596_v46 = vpop.f32.mrb[9].mxu1 }
 0xae0   : > { %v2398_v47 = vpop.f32.mrb[10].mxu1 }
 0xae1   : > { %v1687_v48 = vpop.f32.mrb[11].mxu1  ;;  %v1699_v49 = vsel %vm1099_vm3, %v2398_v47, -inf }
 0xae2   : > { %1700 = vmax.xlane.f32.xlu0 %v1699_v49  ;;  %v1696_v50 = vsel %vm1099_vm3, %v1687_v48, -inf }
 0xae3   : > { %1697 = vmax.xlane.f32.xlu1 %v1696_v50 }
 0xaf4   : > { %2684 = vrot.lane.b32.xlu1 %v3768_v12, %s3196_s11 }
 0xaf8   : > { %1809 = vrot.lane.b32.xlu1 %v2377_v14, %s3197_s7  ;;  %v1840_v14 = vld [vmem:[#allocation21 + $0x10] sm:$0xff] }
 0xaf9   : > { %v2485_v18 = vpack.c.bf16 %v1841_v17, %v1840_v14 }
 0xafc   : > { %1815 = vrot.lane.b32.xlu1 %v1596_v46, %s3198_s6 }
 0xb00   : > { %1817 = vrot.lane.b32.xlu1 %v2391_v45, %s3198_s6 }
 0xb6f   : > { %v1701_v2 = vpop.xlane.xlu0 %1700 }
 0xb70   : > { %v1703_v51 = vsub.f32 %v2398_v47, %v1701_v2  ;;  %v1698_v52 = vpop.xlane.xlu1 %1697 }
 0xb71   : > { %v1702_v53 = vsub.f32 %v1687_v48, %v1698_v52 }
 0xb72   : > { %v1706_v54 = vmul.f32 1.442695, %v1703_v51 }
 0xb73   : > { %v1704_v55 = vmul.f32 1.442695, %v1702_v53 }
 0xb74   : > { %v2685_v56 = vpop.permute.xlu1 %2684 }
 0xb75   : > { %2716 = vpow2.f32 %v1704_v55  ;;  %v2687_v57 = vunpack.i.h.bf16 %v2685_v56  ;;  %v2686_v58 = vunpack.i.l.bf16 %v2685_v56 }
 0xb76   : > { %2718 = vpow2.f32 %v1706_v54 }
 0xb77   : > { %v2477_v59 = vpack.c.bf16 %v2687_v57, %v2686_v58 }
 0xb78   : > { %v1810_v21 = vpop.permute.xlu1 %1809 }
 0xb79   : > { %2478 = vmatprep.subr.bf16.mxu0 %v2477_v59  ;;  %v1830_v27 = vsel %vm1011_vm1, %v3790_v39, %v1810_v21 }
 0xb7a   : > { %2480 = vmatpush3.bf16.msra.mxu0 %v2477_v59 }
 0xb7b   : > { %2482 = vmatprep.subr.bf16.mxu0 %v2481_v16 }
 0xb7c   : > { %v1816_v22 = vpop.permute.xlu1 %1815 }
 0xb7f   : > { %v2717_v12 = vpop.eup %2716 }
 0xb80   : > { %v1708_v60 = vsel %vm1099_vm3, %v2717_v12, 0.0  ;;  %v2719_v61 = vpop.eup %2718  ;;  %v1818_v24 = vpop.permute.xlu1 %1817 }
 0xb81   : > { %1709 = vadd.xlane.f32.xlu0 %v1708_v60  ;;  %v1711_v63 = vsel %vm1099_vm3, %v2719_v61, 0.0  ;;  %v1832_v30 = vsel %vm1099_vm3, %v1830_v27, %v1818_v24 }
 0xb85   : > { %1712 = vadd.xlane.f32.xlu0 %v1711_v63 }
 0xb9b   : > { %1807 = vrot.lane.b32.xlu0 %v3814_v15, %s3197_s7  ;;  %v3199_v15 = vmov 0.0  }
 0xb9c   : > { %743 = vst.msk [vmem:[#allocation3 + $0x8] sm:$0xff] %vm693_vm0, %v3199_v15  ;;  %742 = vst.msk [vmem:[#allocation3] sm:$0xff] %vm693_vm0, %v3199_v15 }
 0xba3   : > { %v1837_v10 = vld [vmem:[#allocation3 + $0x8] sm:$0xff] }
 0xc0e   : > { %v1710_v3 = vpop.xlane.xlu0 %1709 }
 0xc0f   : > { %2720 = vrcp.f32 %v1710_v3 }
 0xc12   : > { %v1713_v5 = vpop.xlane.xlu0 %1712 }
 0xc13   : > { %2722 = vrcp.f32 %v1713_v5 }
 0xc16   : > { %v1808_v23 = vpop.permute.xlu0 %1807 }
 0xc17   : > { %v1829_v25 = vsel %vm1011_vm1, %v3792_v40, %v1808_v23  ;;  %v1836_v40 = vld [vmem:[#allocation3] sm:$0xff] }
 0xc18   : > { %v1831_v28 = vsel %vm1099_vm3, %v1829_v25, %v1816_v22 }
 0xc19   : > { %v2721_v6 = vpop.eup %2720 }
 0xc1a   : > { %v1716_v7 = vmul.f32 %v2721_v6, %v2717_v12 }
 0xc1c   : > { %2403 = vmatprep.mubr.msk.f32.mxu0 %vm1099_vm3, %v1716_v7 }
 0xc1d   : > { %v2723_v8 = vpop.eup %2722 }
 0xc1e   : > { %v1717_v9 = vmul.f32 %v2723_v8, %v2719_v61 }
 0xc20   : > { %2404 = vmatmul.mubr.msk.f32.vlgmr.msra.gmra.mrb[8].mxu0 %vm1099_vm3, %v1717_v9 }
 0xc21   : > { %2484 = vmatpush3.bf16.msra.mxu0 %v2481_v16 }
 0xc22   : > { %2486 = vmatprep.subr.bf16.mxu0 %v2485_v18 }
 0xc25   : > { %2488 = vmatpush3.bf16.msra.mxu0 %v2485_v18 }
 0xcf3   : > { %v2405_v19 = vpop.f32.mrb[8].mxu0 }
 0xcf4   : > { %1825 = vrot.lane.b32.xlu1 %v2405_v19, %s3200_s23  ;;  %v1796_v20 = vpop.f32.mrb[9].mxu0 }
 0xcf5   : > { %1823 = vrot.lane.b32.xlu0 %v1796_v20, %s3200_s23 }
 0xd66   : > { %v1826_v26 = vpop.permute.xlu1 %1825 }
 0xd67   : > { %v1824_v29 = vpop.permute.xlu0 %1823  ;;  %v1835_v31 = vsel %vm1833_vm4, %v1832_v30, %v1826_v26 }
 0xd68   : > { %v1834_v62 = vsel %vm1833_vm4, %v1831_v28, %v1824_v29 }
 0xd69   : > { %2414 = vmatprep.mubr.msk.f32.mxu0 %vm693_vm0, %v1834_v62 }
 0xd6a   : > { %2415 = vmatmul.mubr.msk.f32.vlgmr.msra.gmra.mrb[10].mxu0 %vm693_vm0, %v1835_v31 }
 0xe3d   : > { %v2416_v32 = vpop.f32.mrb[10].mxu0 }
 0xe3e   : > { %v1924_v33 = vadd.f32 %v2416_v32, %v1837_v10  ;;  %v1914_v34 = vpop.f32.mrb[11].mxu0 }
 0xe3f   : > { %v1923_v39 = vadd.f32 %v1914_v34, %v1836_v40 }
 0xe40   : > { %1926 = vst.msk [vmem:[#allocation3 + $0x8] sm:$0xff] %vm693_vm0, %v1924_v33 }
 0xe41   : > { %1925 = vst.msk [vmem:[#allocation3] sm:$0xff] %vm693_vm0, %v1923_v39 }
 0xe47   : > { %v1933_v36 = vld [vmem:[#allocation3 + $0x8] sm:$0xff] }
 0xe48   : > { %v1932_v38 = vld [vmem:[#allocation3] sm:$0xff]  ;;  %v1942_v41 = vadd.f32 %v2252_v35, %v1933_v36 }
 0xe49   : > { %v1941_v42 = vadd.f32 %v2252_v35, %v1932_v38 }
 0xe4a   : > { %v1951_v43 = vmul.f32 %v2253_v37, %v1942_v41 }
 0xe4b   : > { %v1950_v44 = vmul.f32 %v2253_v37, %v1941_v42 }
 0xe4c   : > { %v1953_v4 = vadd.f32 %v1951_v43, %v3728_v1 }
 0xe4d   : > { %v1952_v45 = vadd.f32 %v1950_v44, %v3726_v0 }
 0xe4e   : > { %1955 = vst.msk [vmem:[%s686_s0 + $0x8] sm:$0xff] %vm693_vm0, %v1953_v4 }
 0xe4f   : > { %1954 = vst.msk [vmem:[%s686_s0] sm:$0xff] %vm693_vm0, %v1952_v45 }
 0xe50   : > { %3081 = shalt.err (!%p3078_p1)
}
 0xe51   : > { %s3082_s19 = scalar_lea.hbm %s3868_s17, 256  ;;  %s3086_s29 = scalar_lea.hbm %s4041_s3, 512 }
 0xe52   : > { %p3083_p2 = scmp.ne.s32.totalorder %s3868_s17, %s3082_s19  ;;  %p3087_p7 = scmp.lt.u32.totalorder %s3868_s17, %s4041_s3 }
 0xe53   : > { %p3088_p6 = scmp.lt.u32.totalorder %s3086_s29, %s3082_s19  ;;  %p3090_p3 = scmp.lt.u32.totalorder %s3082_s19, %s3868_s17 }
 0xe54   : > { %p3084_p11 = pnand %p3083_p2, %p4042_p5 }
 0xe55   : > { %p3089_p13 = por %p3088_p6, %p3087_p7 }
 0xe56   : > { %p3085_p12 = pneg %p3084_p11 }
 0xe57   : > { %p3091_p4 = por %p3090_p3, %p3089_p13 }
 0xe59   : > { %p3092_p8 = pnand %p3091_p4, %p3085_p12 }
 0xe5b   : > { %3095 = shalt.err (!%p3092_p8)
}
 0xe5c   : > { %s3202_s11 = smov 128  }
 0xe5d   : > { %2529 = dma.vmem_to_hbm [thread:$0]  (%p4042_p5), %s3871_s9, 256, %s3868_s17, %s1957_s13, %s3202_s11, %s3202_s11, %s3197_s7  }
 0xe5e PF: > { %s4043_s6 = sld [smem:[#allocation34_spill]]  ;;  %s4044_s23 = sld [smem:[#allocation39_spill]] }
 0xe5f   : > { %p4046_p10 = scmp.ge.s32.totalorder %s3178_s26, 2 }
 0xe64   : > { %s1985_s18 = sand.u32 1, %s4043_s6   ;;  %p4045_p0 = scmp.ne.s32.totalorder %s4044_s23, 0 }
 0xe65   : > { %s1986_s0 = scalar_lea.sflag [#allocation6], %s1985_s18 }
 0xe66   : > { %p2570_p9 = pnand %p4046_p10, %p4045_p0 }
 0xe68   : > { %3153 = dma.done.wait (!%p2570_p9), %s1986_s0, 256  }
 0xe69   : > { %3155 = vsyncadd (!%p2570_p9), %s1986_s0, 4294967040  ;;  %s36_s26 = sadd.s32 1, %s3178_s26   ;;  %s4047_s15 = sld [smem:[#allocation35_spill]] }
 0xe6a   : > { %p33_p1 = scmp.ge.s32.totalorder %s36_s26, 4   ;;  %s4048_s23 = sld [smem:[#allocation40_spill]] }
 0xe6b   : > { %s4049_s24 = sld [smem:[#allocation36_spill]]  ;;  %s4050_s25 = sld [smem:[#allocation37_spill]] }
 0xe6c   : > { %s4051_s21 = smov %s3162_s22  ;;  %35 = sbr.rel (!%p33_p1) target bundleno = 27 (0x1b), region = 190 }
 0xe6f   : > { %s4052_s22 = smov %s4047_s15 }
 0xe73   :  { %1991 = vsyncpa [#allocation5], 1 }
 0xe74   :  { %1993 = vsyncpa [#allocation5 + $0x1], 1 }
 0xe75   :  { %1994 = vsyncpa [#allocation8], 1 }
 0xe76   :  { %1996 = vsyncpa [#allocation8 + $0x1], 1 }
 0xe77   :  { %1997 = vsyncpa [#allocation11], 1 }
 0xe78   :  { %1999 = vsyncpa [#allocation11 + $0x1], 1 }
 0xe79   :  { %2000 = vsyncpa [#allocation14], 1 }
 0xe7a   :  { %2001 = vsyncpa [#allocation17], 1 }
 0xe7b   :  { %2002 = vsyncpa [#allocation20], 1 }
 0xe7c   :  { %2003 = vsyncpa [#allocation23], 1 }
 0xe7d   :  { %2004 = vsyncpa [#allocation6], 1 }
 0xe7e   :  { %2006 = vsyncpa [#allocation6 + $0x1], 1 }

</bundles_post_ra>
